<compile_context>
chip_gen: v7x
topology: tpu7x:2x2x1
jax: 0.10.0
libtpu: 0.0.40
codegen_flags: <defaults>
</compile_context>

<pallas_src>
import functools

import jax
import jax.numpy as jnp
from jax import lax
from jax.experimental import pallas as pl
from jax.experimental.pallas import tpu as pltpu


def decoder_kernel(emb0_ref, ctx0_ref, enc_ref, emb_tbl_ref,
                   wih_ref, whh_ref, b_ih_ref, b_hh_ref,
                   wlin_ref, b_lin_ref, watt_ref, batt_ref,
                   out_ref):
    B, E = emb0_ref.shape            # B == batch tile
    H = ctx0_ref.shape[1]
    T = enc_ref.shape[1]
    Vp = out_ref.shape[2]            # padded vocab (multiple of 128)
    L = out_ref.shape[0]
    f32 = jnp.float32
    bf16 = jnp.bfloat16

    def mxu(a, b):
        # bf16 x bf16 -> f32 accumulate on the MXU.
        return jnp.dot(a.astype(bf16), b, preferred_element_type=f32)

    # ---- loop-invariant operands, loaded once per batch tile ----------------
    enc = enc_ref[...]                                    # (B, T, H) f32
    emb_tbl = emb_tbl_ref[...]                            # (Vp, E) bf16
    wih, whh = wih_ref[...], whh_ref[...]                 # bf16
    b_ih, b_hh = b_ih_ref[...], b_hh_ref[...]             # (1, 3H) f32
    wlin, b_lin = wlin_ref[...], b_lin_ref[...]           # (2H, Vp) bf16 / (1, Vp) f32

    # step-invariant attention projection, hoisted out of the decode loop
    enc_proj = (mxu(enc.reshape(B * T, H), watt_ref[...])
                + batt_ref[...]).reshape(B, T, H)         # (B, T, H) f32

    iota_v = lax.broadcasted_iota(jnp.int32, (B, Vp), 1)  # hoisted

    # ---- recurrent state -----------------------------------------------------
    h0 = jnp.zeros((B, H), f32)      # Decoder.init_hidden -> zeros
    ctx0 = ctx0_ref[...]             # (B, H)
    emb0 = emb0_ref[...]             # (B, E)

    def step(l, carry):
        h, ctx, emb = carry

        # GRU cell, PyTorch gate order (r, z, n); per-source fused matmuls.
        gi = mxu(jnp.concatenate([emb, ctx], axis=-1), wih) + b_ih    # (B, 3H)
        gh = mxu(h, whh) + b_hh                                       # (B, 3H)
        r = jax.nn.sigmoid(gi[:, :H] + gh[:, :H])
        z = jax.nn.sigmoid(gi[:, H:2 * H] + gh[:, H:2 * H])
        n = jnp.tanh(gi[:, 2 * H:] + r * gh[:, 2 * H:])
        h = (1.0 - z) * n + z * h                                     # (B, H)

        # linear([hidden, context]) + softmax over the (padded) vocab.
        score = mxu(jnp.concatenate([h, ctx], axis=-1), wlin) + b_lin  # (B, Vp)
        smax = jnp.max(score, axis=-1, keepdims=True)
        es = jnp.exp(score - smax)
        softmaxed = es * pl.reciprocal(jnp.sum(es, axis=-1, keepdims=True))
        out_ref[l] = softmaxed           # full (B, Vp) lane-dense tile per step

        # greedy token (argmax(softmax) == argmax(score)) -> next embedding via
        # one-hot matmul.  TODO(synk): gather for production vocab sizes.
        dec = jnp.min(jnp.where(score == smax, iota_v, Vp),
                      axis=-1, keepdims=True)                         # (B, 1)
        emb = mxu((iota_v == dec).astype(f32), emb_tbl)               # (B, E)

        # attention -> next context.  Tiny per-batch reductions: keep them on
        # the VPU/XLU instead of B one-row MXU matmuls per step.
        ae = jnp.sum(h[:, None, :] * enc_proj, axis=-1)               # (B, T)
        amax = jnp.max(ae, axis=-1, keepdims=True)
        ea = jnp.exp(ae - amax)
        alpha = ea * pl.reciprocal(jnp.sum(ea, axis=-1, keepdims=True))
        ctx = jnp.sum(alpha[:, :, None] * enc, axis=1)                # (B, H)

        return h, ctx, emb

    carry = (h0, ctx0, emb0)
    if L <= 16:
        # small L: static unroll (full LLO scheduling visibility).
        for l in range(L):
            carry = step(l, carry)
    else:
        # larger L: bound vreg live ranges / compile time.
        lax.fori_loop(0, L, step, carry, unroll=2)


@functools.partial(jax.jit, static_argnums=(2,))
def decoder_forward(inputs, context, max_length, encoder_outputs, params):
    """Mirrors Decoder.forward (is_training=False). Returns (B*max_length, V)."""
    f32, bf16 = jnp.float32, jnp.bfloat16
    emb_table = params["embedding"].astype(f32)            # (V, E)
    V, E = emb_table.shape
    H = params["W_att_T"].shape[0]
    B = inputs.shape[0]
    T = encoder_outputs.shape[1]
    L = int(max_length)
    Vp = ((V + 127) // 128) * 128                          # lane-dense vocab

    # glue: initial embedding lookup + squeeze PyTorch's (B,1,H) context.
    emb0 = emb_table[inputs[:, 0]]                         # (B, E)
    ctx0 = context[:, 0, :].astype(f32)                    # (B, H)
    enc = encoder_outputs.astype(f32)                      # (B, T, H)

    # One-time parameter prep.  Padded vocab columns get zero weights and a
    # -1e30 bias so they can never win the softmax or the greedy argmax.
    emb_tbl = jnp.zeros((Vp, E), bf16).at[:V].set(emb_table.astype(bf16))
    wih = params["W_ih_T"].astype(bf16)                    # (E+H, 3H)
    whh = params["W_hh_T"].astype(bf16)                    # (H, 3H)
    b_ih = params["b_ih"].astype(f32)                      # (1, 3H)
    b_hh = params["b_hh"].astype(f32)                      # (1, 3H)
    wlin = jnp.zeros((2 * H, Vp), bf16).at[:, :V].set(params["W_lin_T"].astype(bf16))
    b_lin = jnp.full((1, Vp), -1e30, f32).at[:, :V].set(params["b_lin"].astype(f32))
    watt = params["W_att_T"].astype(bf16)                  # (H, H)
    batt = params["b_att"].astype(f32)                     # (1, H)

    operands = (emb0, ctx0, enc, emb_tbl, wih, whh, b_ih, b_hh,
                wlin, b_lin, watt, batt)

    # batch tile: 8 f32 sublanes; "parallel" shards tiles across TCs on v7x.
    Bt = 8 if B % 8 == 0 else B
    rep2 = lambda b: (0, 0)
    in_specs = [
        pl.BlockSpec((Bt, E), lambda b: (b, 0)),           # emb0
        pl.BlockSpec((Bt, H), lambda b: (b, 0)),           # ctx0
        pl.BlockSpec((Bt, T, H), lambda b: (b, 0, 0)),     # enc
        pl.BlockSpec((Vp, E), rep2),                       # emb_tbl
        pl.BlockSpec((E + H, 3 * H), rep2),                # wih
        pl.BlockSpec((H, 3 * H), rep2),                    # whh
        pl.BlockSpec((1, 3 * H), rep2),                    # b_ih
        pl.BlockSpec((1, 3 * H), rep2),                    # b_hh
        pl.BlockSpec((2 * H, Vp), rep2),                   # wlin
        pl.BlockSpec((1, Vp), rep2),                       # b_lin
        pl.BlockSpec((H, H), rep2),                        # watt
        pl.BlockSpec((1, H), rep2),                        # batt
    ]
    out_spec = pl.BlockSpec((L, Bt, Vp), lambda b: (0, b, 0))

    # explicit scoped-VMEM budget sized from the resident operands (+ slack).
    res_bytes = sum(int(x.size) * x.dtype.itemsize for x in operands)
    res_bytes += L * Bt * Vp * 4
    vmem_limit = int(min(64 * 1024 * 1024, max(4 * 1024 * 1024, 4 * res_bytes)))

    scores = pl.pallas_call(
        decoder_kernel,
        out_shape=jax.ShapeDtypeStruct((L, B, Vp), f32),
        grid=(B // Bt,),
        in_specs=in_specs,
        out_specs=out_spec,
        compiler_params=pltpu.CompilerParams(
            dimension_semantics=("parallel",),
            vmem_limit_bytes=vmem_limit),
    )(*operands)

    # (L, B, Vp) -> (B, L, V) -> (B*L, V)  == torch.cat(decode, 1).view(B*L, -1)
    return jnp.transpose(scores[:, :, :V], (1, 0, 2)).reshape(B * L, V)


def init_params(key, input_size, embedding_size, hidden_size):
    V, E, H = input_size, embedding_size, hidden_size
    ks = jax.random.split(key, 9)
    s = 0.1
    return {
        "embedding": s * jax.random.normal(ks[0], (V, E), jnp.float32),
        # GRU: weight_ih_l0 (3H, E+H), weight_hh_l0 (3H, H) -- stored transposed.
        "W_ih_T": (s * jax.random.normal(ks[1], (3 * H, E + H), jnp.float32)).T,
        "W_hh_T": (s * jax.random.normal(ks[2], (3 * H, H), jnp.float32)).T,
        "b_ih": s * jax.random.normal(ks[3], (1, 3 * H), jnp.float32),
        "b_hh": s * jax.random.normal(ks[4], (1, 3 * H), jnp.float32),
        # Linear: (V, 2H) -- stored transposed.
        "W_lin_T": (s * jax.random.normal(ks[5], (V, 2 * H), jnp.float32)).T,
        "b_lin": s * jax.random.normal(ks[6], (1, V), jnp.float32),
        # Attention linear: (H, H) -- stored transposed.
        "W_att_T": (s * jax.random.normal(ks[7], (H, H), jnp.float32)).T,
        "b_att": s * jax.random.normal(ks[8], (1, H), jnp.float32),
    }


if __name__ == "__main__":
    V, E, H = 64, 16, 32          # input_size (vocab), embedding_size, hidden_size
    B, T, L = 16, 8, 6            # batch (2 tiles of 8), encoder seq len, max_length

    key = jax.random.PRNGKey(0)
    kp, ki, kc, ke = jax.random.split(key, 4)

    params = init_params(kp, V, E, H)
    inputs = jax.random.randint(ki, (B, 1), 0, V, dtype=jnp.int32)    # token ids
    context = jax.random.normal(kc, (B, 1, H), jnp.float32)           # (B, 1, H)
    encoder_outputs = jax.random.normal(ke, (B, T, H), jnp.float32)   # (B, T, H)

    out = decoder_forward(inputs, context, L, encoder_outputs, params)
    out = jax.block_until_ready(out)

    assert out.shape == (B * L, V), out.shape
    assert bool(jnp.all(jnp.isfinite(out)))
    # each row is a softmax distribution over the real vocab -> sums to 1
    assert bool(jnp.allclose(jnp.sum(out, axis=-1), 1.0, atol=1e-3))
    print("KERNEL_OK")
</pallas_src>

<mosaic_0001>
module attributes {stable_mosaic.version = 11 : i64} {
  func.func @decoder_kernel(%arg0: i32, %arg1: memref<8x16xf32, #tpu.memory_space<vmem>>, %arg2: memref<8x32xf32, #tpu.memory_space<vmem>>, %arg3: memref<8x8x32xf32, #tpu.memory_space<vmem>>, %arg4: memref<128x16xbf16, #tpu.memory_space<vmem>>, %arg5: memref<48x96xbf16, #tpu.memory_space<vmem>>, %arg6: memref<32x96xbf16, #tpu.memory_space<vmem>>, %arg7: memref<1x96xf32, #tpu.memory_space<vmem>>, %arg8: memref<1x96xf32, #tpu.memory_space<vmem>>, %arg9: memref<64x128xbf16, #tpu.memory_space<vmem>>, %arg10: memref<1x128xf32, #tpu.memory_space<vmem>>, %arg11: memref<32x32xbf16, #tpu.memory_space<vmem>>, %arg12: memref<1x32xf32, #tpu.memory_space<vmem>>, %arg13: memref<6x8x128xf32, #tpu.memory_space<vmem>>) attributes {dimension_semantics = [#tpu.dimension_semantics<parallel>], iteration_bounds = array<i64: 2>, scalar_prefetch = 0 : i64, scratch_operands = 0 : i64, tpu.core_type = #tpu.core_type<tc>, window_params = [{transform_indices = @transform_0, window_bounds = array<i64: 8, 16>}, {transform_indices = @transform_1, window_bounds = array<i64: 8, 32>}, {transform_indices = @transform_2, window_bounds = array<i64: 8, 8, 32>}, {pipeline_mode = #tpu.pipeline_mode<synchronous>, transform_indices = @transform_3, window_bounds = array<i64: 128, 16>}, {pipeline_mode = #tpu.pipeline_mode<synchronous>, transform_indices = @transform_4, window_bounds = array<i64: 48, 96>}, {pipeline_mode = #tpu.pipeline_mode<synchronous>, transform_indices = @transform_5, window_bounds = array<i64: 32, 96>}, {pipeline_mode = #tpu.pipeline_mode<synchronous>, transform_indices = @transform_6, window_bounds = array<i64: 1, 96>}, {pipeline_mode = #tpu.pipeline_mode<synchronous>, transform_indices = @transform_7, window_bounds = array<i64: 1, 96>}, {pipeline_mode = #tpu.pipeline_mode<synchronous>, transform_indices = @transform_8, window_bounds = array<i64: 64, 128>}, {pipeline_mode = #tpu.pipeline_mode<synchronous>, transform_indices = @transform_9, window_bounds = array<i64: 1, 128>}, {pipeline_mode = #tpu.pipeline_mode<synchronous>, transform_indices = @transform_10, window_bounds = array<i64: 32, 32>}, {pipeline_mode = #tpu.pipeline_mode<synchronous>, transform_indices = @transform_11, window_bounds = array<i64: 1, 32>}, {transform_indices = @transform_12, window_bounds = array<i64: 6, 8, 128>}]} {
    %c0 = arith.constant 0 : index
    %c0_0 = arith.constant 0 : index
    %c0_1 = arith.constant 0 : index
    %0 = vector.load %arg3[%c0, %c0_0, %c0_1] : memref<8x8x32xf32, #tpu.memory_space<vmem>>, vector<8x8x32xf32>
    %c0_2 = arith.constant 0 : index
    %c0_3 = arith.constant 0 : index
    %1 = vector.load %arg4[%c0_2, %c0_3] : memref<128x16xbf16, #tpu.memory_space<vmem>>, vector<128x16xbf16>
    %c0_4 = arith.constant 0 : index
    %c0_5 = arith.constant 0 : index
    %2 = vector.load %arg5[%c0_4, %c0_5] : memref<48x96xbf16, #tpu.memory_space<vmem>>, vector<48x96xbf16>
    %c0_6 = arith.constant 0 : index
    %c0_7 = arith.constant 0 : index
    %3 = vector.load %arg6[%c0_6, %c0_7] : memref<32x96xbf16, #tpu.memory_space<vmem>>, vector<32x96xbf16>
    %c0_8 = arith.constant 0 : index
    %c0_9 = arith.constant 0 : index
    %4 = vector.load %arg7[%c0_8, %c0_9] : memref<1x96xf32, #tpu.memory_space<vmem>>, vector<1x96xf32>
    %c0_10 = arith.constant 0 : index
    %c0_11 = arith.constant 0 : index
    %5 = vector.load %arg8[%c0_10, %c0_11] : memref<1x96xf32, #tpu.memory_space<vmem>>, vector<1x96xf32>
    %c0_12 = arith.constant 0 : index
    %c0_13 = arith.constant 0 : index
    %6 = vector.load %arg9[%c0_12, %c0_13] : memref<64x128xbf16, #tpu.memory_space<vmem>>, vector<64x128xbf16>
    %c0_14 = arith.constant 0 : index
    %c0_15 = arith.constant 0 : index
    %7 = vector.load %arg10[%c0_14, %c0_15] : memref<1x128xf32, #tpu.memory_space<vmem>>, vector<1x128xf32>
    %8 = vector.shape_cast %0 : vector<8x8x32xf32> to vector<64x32xf32>
    %c0_16 = arith.constant 0 : index
    %c0_17 = arith.constant 0 : index
    %9 = vector.load %arg11[%c0_16, %c0_17] : memref<32x32xbf16, #tpu.memory_space<vmem>>, vector<32x32xbf16>
    %10 = arith.truncf %8 : vector<64x32xf32> to vector<64x32xbf16>
    %cst = arith.constant dense<0.000000e+00> : vector<64x32xf32>
    %11 = tpu.matmul %10, %9, %cst {dimension_numbers = #tpu.dot_dimension_numbers<[1], [0], [0], [1], [0, 0, 1, 1], [], []>} : vector<64x32xbf16>, vector<32x32xbf16>, vector<64x32xf32> -> vector<64x32xf32>
    %c0_18 = arith.constant 0 : index
    %c0_19 = arith.constant 0 : index
    %12 = vector.load %arg12[%c0_18, %c0_19] : memref<1x32xf32, #tpu.memory_space<vmem>>, vector<1x32xf32>
    %13 = vector.broadcast %12 : vector<1x32xf32> to vector<64x32xf32>
    %14 = arith.addf %11, %13 : vector<64x32xf32>
    %15 = vector.shape_cast %14 : vector<64x32xf32> to vector<8x8x32xf32>
    %16 = tpu.iota {dimensions = array<i32: 1>} : vector<8x128xi32>
    %cst_20 = arith.constant 0.000000e+00 : f32
    %17 = vector.broadcast %cst_20 : f32 to vector<8x32xf32>
    %c0_21 = arith.constant 0 : index
    %c0_22 = arith.constant 0 : index
    %18 = vector.load %arg2[%c0_21, %c0_22] : memref<8x32xf32, #tpu.memory_space<vmem>>, vector<8x32xf32>
    %c0_23 = arith.constant 0 : index
    %c0_24 = arith.constant 0 : index
    %19 = vector.load %arg1[%c0_23, %c0_24] : memref<8x16xf32, #tpu.memory_space<vmem>>, vector<8x16xf32>
    %20 = tpu.concatenate %19, %18 in 1 : vector<8x16xf32>, vector<8x32xf32> -> vector<8x48xf32>
    %21 = arith.truncf %20 : vector<8x48xf32> to vector<8x48xbf16>
    %cst_25 = arith.constant dense<0.000000e+00> : vector<8x96xf32>
    %22 = tpu.matmul %21, %2, %cst_25 {dimension_numbers = #tpu.dot_dimension_numbers<[1], [0], [0], [1], [0, 0, 1, 1], [], []>} : vector<8x48xbf16>, vector<48x96xbf16>, vector<8x96xf32> -> vector<8x96xf32>
    %23 = vector.broadcast %4 : vector<1x96xf32> to vector<8x96xf32>
    %24 = arith.addf %22, %23 : vector<8x96xf32>
    %25 = arith.truncf %17 : vector<8x32xf32> to vector<8x32xbf16>
    %cst_26 = arith.constant dense<0.000000e+00> : vector<8x96xf32>
    %26 = tpu.matmul %25, %3, %cst_26 {dimension_numbers = #tpu.dot_dimension_numbers<[1], [0], [0], [1], [0, 0, 1, 1], [], []>} : vector<8x32xbf16>, vector<32x96xbf16>, vector<8x96xf32> -> vector<8x96xf32>
    %27 = vector.broadcast %5 : vector<1x96xf32> to vector<8x96xf32>
    %28 = arith.addf %26, %27 : vector<8x96xf32>
    %29 = vector.extract_strided_slice %24 {offsets = [0, 0], sizes = [8, 32], strides = [1, 1]} : vector<8x96xf32> to vector<8x32xf32>
    %30 = vector.extract_strided_slice %28 {offsets = [0, 0], sizes = [8, 32], strides = [1, 1]} : vector<8x96xf32> to vector<8x32xf32>
    %31 = arith.addf %29, %30 : vector<8x32xf32>
    %32 = arith.negf %31 : vector<8x32xf32>
    %33 = math.exp %32 : vector<8x32xf32>
    %cst_27 = arith.constant 1.000000e+00 : f32
    %34 = vector.broadcast %cst_27 : f32 to vector<8x32xf32>
    %35 = arith.addf %34, %33 : vector<8x32xf32>
    %36 = arith.divf %34, %35 : vector<8x32xf32>
    %37 = vector.extract_strided_slice %24 {offsets = [0, 32], sizes = [8, 32], strides = [1, 1]} : vector<8x96xf32> to vector<8x32xf32>
    %38 = vector.extract_strided_slice %28 {offsets = [0, 32], sizes = [8, 32], strides = [1, 1]} : vector<8x96xf32> to vector<8x32xf32>
    %39 = arith.addf %37, %38 : vector<8x32xf32>
    %40 = arith.negf %39 : vector<8x32xf32>
    %41 = math.exp %40 : vector<8x32xf32>
    %cst_28 = arith.constant 1.000000e+00 : f32
    %42 = vector.broadcast %cst_28 : f32 to vector<8x32xf32>
    %43 = arith.addf %42, %41 : vector<8x32xf32>
    %44 = arith.divf %42, %43 : vector<8x32xf32>
    %45 = vector.extract_strided_slice %24 {offsets = [0, 64], sizes = [8, 32], strides = [1, 1]} : vector<8x96xf32> to vector<8x32xf32>
    %46 = vector.extract_strided_slice %28 {offsets = [0, 64], sizes = [8, 32], strides = [1, 1]} : vector<8x96xf32> to vector<8x32xf32>
    %47 = arith.mulf %36, %46 : vector<8x32xf32>
    %48 = arith.addf %45, %47 : vector<8x32xf32>
    %49 = math.tanh %48 : vector<8x32xf32>
    %cst_29 = arith.constant 1.000000e+00 : f32
    %50 = vector.broadcast %cst_29 : f32 to vector<8x32xf32>
    %51 = arith.subf %50, %44 : vector<8x32xf32>
    %52 = arith.mulf %51, %49 : vector<8x32xf32>
    %53 = arith.mulf %44, %17 : vector<8x32xf32>
    %54 = arith.addf %52, %53 : vector<8x32xf32>
    %55 = tpu.concatenate %54, %18 in 1 : vector<8x32xf32>, vector<8x32xf32> -> vector<8x64xf32>
    %56 = arith.truncf %55 : vector<8x64xf32> to vector<8x64xbf16>
    %cst_30 = arith.constant dense<0.000000e+00> : vector<8x128xf32>
    %57 = tpu.matmul %56, %6, %cst_30 {dimension_numbers = #tpu.dot_dimension_numbers<[1], [0], [0], [1], [0, 0, 1, 1], [], []>} : vector<8x64xbf16>, vector<64x128xbf16>, vector<8x128xf32> -> vector<8x128xf32>
    %58 = vector.broadcast %7 : vector<1x128xf32> to vector<8x128xf32>
    %59 = arith.addf %57, %58 : vector<8x128xf32>
    %cst_31 = arith.constant dense<0xFF800000> : vector<8xf32>
    %60 = vector.multi_reduction <maximumf>, %59, %cst_31 [1] : vector<8x128xf32> to vector<8xf32>
    %61 = vector.shape_cast %60 : vector<8xf32> to vector<8x1xf32>
    %62 = vector.broadcast %61 : vector<8x1xf32> to vector<8x128xf32>
    %63 = arith.subf %59, %62 : vector<8x128xf32>
    %64 = math.exp %63 : vector<8x128xf32>
    %cst_32 = arith.constant dense<0.000000e+00> : vector<8xf32>
    %65 = vector.multi_reduction <add>, %64, %cst_32 [1] : vector<8x128xf32> to vector<8xf32>
    %66 = vector.shape_cast %65 : vector<8xf32> to vector<8x1xf32>
    %67 = tpu.reciprocal %66 : vector<8x1xf32> -> vector<8x1xf32>
    %68 = vector.broadcast %67 : vector<8x1xf32> to vector<8x128xf32>
    %69 = arith.mulf %64, %68 : vector<8x128xf32>
    %c0_33 = arith.constant 0 : index
    %c0_34 = arith.constant 0 : index
    %c0_35 = arith.constant 0 : index
    %70 = vector.load %arg13[%c0_33, %c0_34, %c0_35] : memref<6x8x128xf32, #tpu.memory_space<vmem>>, vector<1x8x128xf32>
    %71 = vector.shape_cast %70 : vector<1x8x128xf32> to vector<8x128xf32>
    %72 = vector.shape_cast %69 : vector<8x128xf32> to vector<1x8x128xf32>
    tpu.vector_store %arg13[%c0_33, %c0_34, %c0_35], %72 {strides = array<i32>} : memref<6x8x128xf32, #tpu.memory_space<vmem>>, vector<1x8x128xf32>,
    %73 = vector.broadcast %61 : vector<8x1xf32> to vector<8x128xf32>
    %74 = arith.cmpf oeq, %59, %73 : vector<8x128xf32>
    %c128_i32 = arith.constant 128 : i32
    %75 = vector.broadcast %c128_i32 : i32 to vector<8x128xi32>
    %76 = arith.select %74, %16, %75 : vector<8x128xi1>, vector<8x128xi32>
    %cst_36 = arith.constant dense<2147483647> : vector<8xi32>
    %77 = vector.multi_reduction <minsi>, %76, %cst_36 [1] : vector<8x128xi32> to vector<8xi32>
    %78 = vector.shape_cast %77 : vector<8xi32> to vector<8x1xi32>
    %79 = vector.broadcast %78 : vector<8x1xi32> to vector<8x128xi32>
    %80 = arith.cmpi eq, %16, %79 : vector<8x128xi32>
    %81 = arith.extui %80 : vector<8x128xi1> to vector<8x128xi32>
    %82 = arith.sitofp %81 : vector<8x128xi32> to vector<8x128xf32>
    %83 = arith.truncf %82 : vector<8x128xf32> to vector<8x128xbf16>
    %cst_37 = arith.constant dense<0.000000e+00> : vector<8x16xf32>
    %84 = tpu.matmul %83, %1, %cst_37 {dimension_numbers = #tpu.dot_dimension_numbers<[1], [0], [0], [1], [0, 0, 1, 1], [], []>} : vector<8x128xbf16>, vector<128x16xbf16>, vector<8x16xf32> -> vector<8x16xf32>
    %85 = vector.shape_cast %54 : vector<8x32xf32> to vector<8x1x32xf32>
    %86 = vector.broadcast %85 : vector<8x1x32xf32> to vector<8x8x32xf32>
    %87 = arith.mulf %86, %15 : vector<8x8x32xf32>
    %cst_38 = arith.constant dense<0.000000e+00> : vector<8x8xf32>
    %88 = vector.multi_reduction <add>, %87, %cst_38 [2] : vector<8x8x32xf32> to vector<8x8xf32>
    %cst_39 = arith.constant dense<0xFF800000> : vector<8xf32>
    %89 = vector.multi_reduction <maximumf>, %88, %cst_39 [1] : vector<8x8xf32> to vector<8xf32>
    %90 = vector.shape_cast %89 : vector<8xf32> to vector<8x1xf32>
    %91 = vector.broadcast %90 : vector<8x1xf32> to vector<8x8xf32>
    %92 = arith.subf %88, %91 : vector<8x8xf32>
    %93 = math.exp %92 : vector<8x8xf32>
    %cst_40 = arith.constant dense<0.000000e+00> : vector<8xf32>
    %94 = vector.multi_reduction <add>, %93, %cst_40 [1] : vector<8x8xf32> to vector<8xf32>
    %95 = vector.shape_cast %94 : vector<8xf32> to vector<8x1xf32>
    %96 = tpu.reciprocal %95 : vector<8x1xf32> -> vector<8x1xf32>
    %97 = vector.broadcast %96 : vector<8x1xf32> to vector<8x8xf32>
    %98 = arith.mulf %93, %97 : vector<8x8xf32>
    %99 = vector.shape_cast %98 : vector<8x8xf32> to vector<8x8x1xf32>
    %100 = vector.broadcast %99 : vector<8x8x1xf32> to vector<8x8x32xf32>
    %101 = arith.mulf %100, %0 : vector<8x8x32xf32>
    %cst_41 = arith.constant dense<0.000000e+00> : vector<8x32xf32>
    %102 = vector.multi_reduction <add>, %101, %cst_41 [1] : vector<8x8x32xf32> to vector<8x32xf32>
    %103 = tpu.concatenate %84, %102 in 1 : vector<8x16xf32>, vector<8x32xf32> -> vector<8x48xf32>
    %104 = arith.truncf %103 : vector<8x48xf32> to vector<8x48xbf16>
    %cst_42 = arith.constant dense<0.000000e+00> : vector<8x96xf32>
    %105 = tpu.matmul %104, %2, %cst_42 {dimension_numbers = #tpu.dot_dimension_numbers<[1], [0], [0], [1], [0, 0, 1, 1], [], []>} : vector<8x48xbf16>, vector<48x96xbf16>, vector<8x96xf32> -> vector<8x96xf32>
    %106 = vector.broadcast %4 : vector<1x96xf32> to vector<8x96xf32>
    %107 = arith.addf %105, %106 : vector<8x96xf32>
    %108 = arith.truncf %54 : vector<8x32xf32> to vector<8x32xbf16>
    %cst_43 = arith.constant dense<0.000000e+00> : vector<8x96xf32>
    %109 = tpu.matmul %108, %3, %cst_43 {dimension_numbers = #tpu.dot_dimension_numbers<[1], [0], [0], [1], [0, 0, 1, 1], [], []>} : vector<8x32xbf16>, vector<32x96xbf16>, vector<8x96xf32> -> vector<8x96xf32>
    %110 = vector.broadcast %5 : vector<1x96xf32> to vector<8x96xf32>
    %111 = arith.addf %109, %110 : vector<8x96xf32>
    %112 = vector.extract_strided_slice %107 {offsets = [0, 0], sizes = [8, 32], strides = [1, 1]} : vector<8x96xf32> to vector<8x32xf32>
    %113 = vector.extract_strided_slice %111 {offsets = [0, 0], sizes = [8, 32], strides = [1, 1]} : vector<8x96xf32> to vector<8x32xf32>
    %114 = arith.addf %112, %113 : vector<8x32xf32>
    %115 = arith.negf %114 : vector<8x32xf32>
    %116 = math.exp %115 : vector<8x32xf32>
    %cst_44 = arith.constant 1.000000e+00 : f32
    %117 = vector.broadcast %cst_44 : f32 to vector<8x32xf32>
    %118 = arith.addf %117, %116 : vector<8x32xf32>
    %119 = arith.divf %117, %118 : vector<8x32xf32>
    %120 = vector.extract_strided_slice %107 {offsets = [0, 32], sizes = [8, 32], strides = [1, 1]} : vector<8x96xf32> to vector<8x32xf32>
    %121 = vector.extract_strided_slice %111 {offsets = [0, 32], sizes = [8, 32], strides = [1, 1]} : vector<8x96xf32> to vector<8x32xf32>
    %122 = arith.addf %120, %121 : vector<8x32xf32>
    %123 = arith.negf %122 : vector<8x32xf32>
    %124 = math.exp %123 : vector<8x32xf32>
    %cst_45 = arith.constant 1.000000e+00 : f32
    %125 = vector.broadcast %cst_45 : f32 to vector<8x32xf32>
    %126 = arith.addf %125, %124 : vector<8x32xf32>
    %127 = arith.divf %125, %126 : vector<8x32xf32>
    %128 = vector.extract_strided_slice %107 {offsets = [0, 64], sizes = [8, 32], strides = [1, 1]} : vector<8x96xf32> to vector<8x32xf32>
    %129 = vector.extract_strided_slice %111 {offsets = [0, 64], sizes = [8, 32], strides = [1, 1]} : vector<8x96xf32> to vector<8x32xf32>
    %130 = arith.mulf %119, %129 : vector<8x32xf32>
    %131 = arith.addf %128, %130 : vector<8x32xf32>
    %132 = math.tanh %131 : vector<8x32xf32>
    %cst_46 = arith.constant 1.000000e+00 : f32
    %133 = vector.broadcast %cst_46 : f32 to vector<8x32xf32>
    %134 = arith.subf %133, %127 : vector<8x32xf32>
    %135 = arith.mulf %134, %132 : vector<8x32xf32>
    %136 = arith.mulf %127, %54 : vector<8x32xf32>
    %137 = arith.addf %135, %136 : vector<8x32xf32>
    %138 = tpu.concatenate %137, %102 in 1 : vector<8x32xf32>, vector<8x32xf32> -> vector<8x64xf32>
    %139 = arith.truncf %138 : vector<8x64xf32> to vector<8x64xbf16>
    %cst_47 = arith.constant dense<0.000000e+00> : vector<8x128xf32>
    %140 = tpu.matmul %139, %6, %cst_47 {dimension_numbers = #tpu.dot_dimension_numbers<[1], [0], [0], [1], [0, 0, 1, 1], [], []>} : vector<8x64xbf16>, vector<64x128xbf16>, vector<8x128xf32> -> vector<8x128xf32>
    %141 = vector.broadcast %7 : vector<1x128xf32> to vector<8x128xf32>
    %142 = arith.addf %140, %141 : vector<8x128xf32>
    %cst_48 = arith.constant dense<0xFF800000> : vector<8xf32>
    %143 = vector.multi_reduction <maximumf>, %142, %cst_48 [1] : vector<8x128xf32> to vector<8xf32>
    %144 = vector.shape_cast %143 : vector<8xf32> to vector<8x1xf32>
    %145 = vector.broadcast %144 : vector<8x1xf32> to vector<8x128xf32>
    %146 = arith.subf %142, %145 : vector<8x128xf32>
    %147 = math.exp %146 : vector<8x128xf32>
    %cst_49 = arith.constant dense<0.000000e+00> : vector<8xf32>
    %148 = vector.multi_reduction <add>, %147, %cst_49 [1] : vector<8x128xf32> to vector<8xf32>
    %149 = vector.shape_cast %148 : vector<8xf32> to vector<8x1xf32>
    %150 = tpu.reciprocal %149 : vector<8x1xf32> -> vector<8x1xf32>
    %151 = vector.broadcast %150 : vector<8x1xf32> to vector<8x128xf32>
    %152 = arith.mulf %147, %151 : vector<8x128xf32>
    %c1 = arith.constant 1 : index
    %c0_50 = arith.constant 0 : index
    %c0_51 = arith.constant 0 : index
    %153 = vector.load %arg13[%c1, %c0_50, %c0_51] : memref<6x8x128xf32, #tpu.memory_space<vmem>>, vector<1x8x128xf32>
    %154 = vector.shape_cast %153 : vector<1x8x128xf32> to vector<8x128xf32>
    %155 = vector.shape_cast %152 : vector<8x128xf32> to vector<1x8x128xf32>
    tpu.vector_store %arg13[%c1, %c0_50, %c0_51], %155 {strides = array<i32>} : memref<6x8x128xf32, #tpu.memory_space<vmem>>, vector<1x8x128xf32>,
    %156 = vector.broadcast %144 : vector<8x1xf32> to vector<8x128xf32>
    %157 = arith.cmpf oeq, %142, %156 : vector<8x128xf32>
    %c128_i32_52 = arith.constant 128 : i32
    %158 = vector.broadcast %c128_i32_52 : i32 to vector<8x128xi32>
    %159 = arith.select %157, %16, %158 : vector<8x128xi1>, vector<8x128xi32>
    %cst_53 = arith.constant dense<2147483647> : vector<8xi32>
    %160 = vector.multi_reduction <minsi>, %159, %cst_53 [1] : vector<8x128xi32> to vector<8xi32>
    %161 = vector.shape_cast %160 : vector<8xi32> to vector<8x1xi32>
    %162 = vector.broadcast %161 : vector<8x1xi32> to vector<8x128xi32>
    %163 = arith.cmpi eq, %16, %162 : vector<8x128xi32>
    %164 = arith.extui %163 : vector<8x128xi1> to vector<8x128xi32>
    %165 = arith.sitofp %164 : vector<8x128xi32> to vector<8x128xf32>
    %166 = arith.truncf %165 : vector<8x128xf32> to vector<8x128xbf16>
    %cst_54 = arith.constant dense<0.000000e+00> : vector<8x16xf32>
    %167 = tpu.matmul %166, %1, %cst_54 {dimension_numbers = #tpu.dot_dimension_numbers<[1], [0], [0], [1], [0, 0, 1, 1], [], []>} : vector<8x128xbf16>, vector<128x16xbf16>, vector<8x16xf32> -> vector<8x16xf32>
    %168 = vector.shape_cast %137 : vector<8x32xf32> to vector<8x1x32xf32>
    %169 = vector.broadcast %168 : vector<8x1x32xf32> to vector<8x8x32xf32>
    %170 = arith.mulf %169, %15 : vector<8x8x32xf32>
    %cst_55 = arith.constant dense<0.000000e+00> : vector<8x8xf32>
    %171 = vector.multi_reduction <add>, %170, %cst_55 [2] : vector<8x8x32xf32> to vector<8x8xf32>
    %cst_56 = arith.constant dense<0xFF800000> : vector<8xf32>
    %172 = vector.multi_reduction <maximumf>, %171, %cst_56 [1] : vector<8x8xf32> to vector<8xf32>
    %173 = vector.shape_cast %172 : vector<8xf32> to vector<8x1xf32>
    %174 = vector.broadcast %173 : vector<8x1xf32> to vector<8x8xf32>
    %175 = arith.subf %171, %174 : vector<8x8xf32>
    %176 = math.exp %175 : vector<8x8xf32>
    %cst_57 = arith.constant dense<0.000000e+00> : vector<8xf32>
    %177 = vector.multi_reduction <add>, %176, %cst_57 [1] : vector<8x8xf32> to vector<8xf32>
    %178 = vector.shape_cast %177 : vector<8xf32> to vector<8x1xf32>
    %179 = tpu.reciprocal %178 : vector<8x1xf32> -> vector<8x1xf32>
    %180 = vector.broadcast %179 : vector<8x1xf32> to vector<8x8xf32>
    %181 = arith.mulf %176, %180 : vector<8x8xf32>
    %182 = vector.shape_cast %181 : vector<8x8xf32> to vector<8x8x1xf32>
    %183 = vector.broadcast %182 : vector<8x8x1xf32> to vector<8x8x32xf32>
    %184 = arith.mulf %183, %0 : vector<8x8x32xf32>
    %cst_58 = arith.constant dense<0.000000e+00> : vector<8x32xf32>
    %185 = vector.multi_reduction <add>, %184, %cst_58 [1] : vector<8x8x32xf32> to vector<8x32xf32>
    %186 = tpu.concatenate %167, %185 in 1 : vector<8x16xf32>, vector<8x32xf32> -> vector<8x48xf32>
    %187 = arith.truncf %186 : vector<8x48xf32> to vector<8x48xbf16>
    %cst_59 = arith.constant dense<0.000000e+00> : vector<8x96xf32>
    %188 = tpu.matmul %187, %2, %cst_59 {dimension_numbers = #tpu.dot_dimension_numbers<[1], [0], [0], [1], [0, 0, 1, 1], [], []>} : vector<8x48xbf16>, vector<48x96xbf16>, vector<8x96xf32> -> vector<8x96xf32>
    %189 = vector.broadcast %4 : vector<1x96xf32> to vector<8x96xf32>
    %190 = arith.addf %188, %189 : vector<8x96xf32>
    %191 = arith.truncf %137 : vector<8x32xf32> to vector<8x32xbf16>
    %cst_60 = arith.constant dense<0.000000e+00> : vector<8x96xf32>
    %192 = tpu.matmul %191, %3, %cst_60 {dimension_numbers = #tpu.dot_dimension_numbers<[1], [0], [0], [1], [0, 0, 1, 1], [], []>} : vector<8x32xbf16>, vector<32x96xbf16>, vector<8x96xf32> -> vector<8x96xf32>
    %193 = vector.broadcast %5 : vector<1x96xf32> to vector<8x96xf32>
    %194 = arith.addf %192, %193 : vector<8x96xf32>
    %195 = vector.extract_strided_slice %190 {offsets = [0, 0], sizes = [8, 32], strides = [1, 1]} : vector<8x96xf32> to vector<8x32xf32>
    %196 = vector.extract_strided_slice %194 {offsets = [0, 0], sizes = [8, 32], strides = [1, 1]} : vector<8x96xf32> to vector<8x32xf32>
    %197 = arith.addf %195, %196 : vector<8x32xf32>
    %198 = arith.negf %197 : vector<8x32xf32>
    %199 = math.exp %198 : vector<8x32xf32>
    %cst_61 = arith.constant 1.000000e+00 : f32
    %200 = vector.broadcast %cst_61 : f32 to vector<8x32xf32>
    %201 = arith.addf %200, %199 : vector<8x32xf32>
    %202 = arith.divf %200, %201 : vector<8x32xf32>
    %203 = vector.extract_strided_slice %190 {offsets = [0, 32], sizes = [8, 32], strides = [1, 1]} : vector<8x96xf32> to vector<8x32xf32>
    %204 = vector.extract_strided_slice %194 {offsets = [0, 32], sizes = [8, 32], strides = [1, 1]} : vector<8x96xf32> to vector<8x32xf32>
    %205 = arith.addf %203, %204 : vector<8x32xf32>
    %206 = arith.negf %205 : vector<8x32xf32>
    %207 = math.exp %206 : vector<8x32xf32>
    %cst_62 = arith.constant 1.000000e+00 : f32
    %208 = vector.broadcast %cst_62 : f32 to vector<8x32xf32>
    %209 = arith.addf %208, %207 : vector<8x32xf32>
    %210 = arith.divf %208, %209 : vector<8x32xf32>
    %211 = vector.extract_strided_slice %190 {offsets = [0, 64], sizes = [8, 32], strides = [1, 1]} : vector<8x96xf32> to vector<8x32xf32>
    %212 = vector.extract_strided_slice %194 {offsets = [0, 64], sizes = [8, 32], strides = [1, 1]} : vector<8x96xf32> to vector<8x32xf32>
    %213 = arith.mulf %202, %212 : vector<8x32xf32>
    %214 = arith.addf %211, %213 : vector<8x32xf32>
    %215 = math.tanh %214 : vector<8x32xf32>
    %cst_63 = arith.constant 1.000000e+00 : f32
    %216 = vector.broadcast %cst_63 : f32 to vector<8x32xf32>
    %217 = arith.subf %216, %210 : vector<8x32xf32>
    %218 = arith.mulf %217, %215 : vector<8x32xf32>
    %219 = arith.mulf %210, %137 : vector<8x32xf32>
    %220 = arith.addf %218, %219 : vector<8x32xf32>
    %221 = tpu.concatenate %220, %185 in 1 : vector<8x32xf32>, vector<8x32xf32> -> vector<8x64xf32>
    %222 = arith.truncf %221 : vector<8x64xf32> to vector<8x64xbf16>
    %cst_64 = arith.constant dense<0.000000e+00> : vector<8x128xf32>
    %223 = tpu.matmul %222, %6, %cst_64 {dimension_numbers = #tpu.dot_dimension_numbers<[1], [0], [0], [1], [0, 0, 1, 1], [], []>} : vector<8x64xbf16>, vector<64x128xbf16>, vector<8x128xf32> -> vector<8x128xf32>
    %224 = vector.broadcast %7 : vector<1x128xf32> to vector<8x128xf32>
    %225 = arith.addf %223, %224 : vector<8x128xf32>
    %cst_65 = arith.constant dense<0xFF800000> : vector<8xf32>
    %226 = vector.multi_reduction <maximumf>, %225, %cst_65 [1] : vector<8x128xf32> to vector<8xf32>
    %227 = vector.shape_cast %226 : vector<8xf32> to vector<8x1xf32>
    %228 = vector.broadcast %227 : vector<8x1xf32> to vector<8x128xf32>
    %229 = arith.subf %225, %228 : vector<8x128xf32>
    %230 = math.exp %229 : vector<8x128xf32>
    %cst_66 = arith.constant dense<0.000000e+00> : vector<8xf32>
    %231 = vector.multi_reduction <add>, %230, %cst_66 [1] : vector<8x128xf32> to vector<8xf32>
    %232 = vector.shape_cast %231 : vector<8xf32> to vector<8x1xf32>
    %233 = tpu.reciprocal %232 : vector<8x1xf32> -> vector<8x1xf32>
    %234 = vector.broadcast %233 : vector<8x1xf32> to vector<8x128xf32>
    %235 = arith.mulf %230, %234 : vector<8x128xf32>
    %c2 = arith.constant 2 : index
    %c0_67 = arith.constant 0 : index
    %c0_68 = arith.constant 0 : index
    %236 = vector.load %arg13[%c2, %c0_67, %c0_68] : memref<6x8x128xf32, #tpu.memory_space<vmem>>, vector<1x8x128xf32>
    %237 = vector.shape_cast %236 : vector<1x8x128xf32> to vector<8x128xf32>
    %238 = vector.shape_cast %235 : vector<8x128xf32> to vector<1x8x128xf32>
    tpu.vector_store %arg13[%c2, %c0_67, %c0_68], %238 {strides = array<i32>} : memref<6x8x128xf32, #tpu.memory_space<vmem>>, vector<1x8x128xf32>,
    %239 = vector.broadcast %227 : vector<8x1xf32> to vector<8x128xf32>
    %240 = arith.cmpf oeq, %225, %239 : vector<8x128xf32>
    %c128_i32_69 = arith.constant 128 : i32
    %241 = vector.broadcast %c128_i32_69 : i32 to vector<8x128xi32>
    %242 = arith.select %240, %16, %241 : vector<8x128xi1>, vector<8x128xi32>
    %cst_70 = arith.constant dense<2147483647> : vector<8xi32>
    %243 = vector.multi_reduction <minsi>, %242, %cst_70 [1] : vector<8x128xi32> to vector<8xi32>
    %244 = vector.shape_cast %243 : vector<8xi32> to vector<8x1xi32>
    %245 = vector.broadcast %244 : vector<8x1xi32> to vector<8x128xi32>
    %246 = arith.cmpi eq, %16, %245 : vector<8x128xi32>
    %247 = arith.extui %246 : vector<8x128xi1> to vector<8x128xi32>
    %248 = arith.sitofp %247 : vector<8x128xi32> to vector<8x128xf32>
    %249 = arith.truncf %248 : vector<8x128xf32> to vector<8x128xbf16>
    %cst_71 = arith.constant dense<0.000000e+00> : vector<8x16xf32>
    %250 = tpu.matmul %249, %1, %cst_71 {dimension_numbers = #tpu.dot_dimension_numbers<[1], [0], [0], [1], [0, 0, 1, 1], [], []>} : vector<8x128xbf16>, vector<128x16xbf16>, vector<8x16xf32> -> vector<8x16xf32>
    %251 = vector.shape_cast %220 : vector<8x32xf32> to vector<8x1x32xf32>
    %252 = vector.broadcast %251 : vector<8x1x32xf32> to vector<8x8x32xf32>
    %253 = arith.mulf %252, %15 : vector<8x8x32xf32>
    %cst_72 = arith.constant dense<0.000000e+00> : vector<8x8xf32>
    %254 = vector.multi_reduction <add>, %253, %cst_72 [2] : vector<8x8x32xf32> to vector<8x8xf32>
    %cst_73 = arith.constant dense<0xFF800000> : vector<8xf32>
    %255 = vector.multi_reduction <maximumf>, %254, %cst_73 [1] : vector<8x8xf32> to vector<8xf32>
    %256 = vector.shape_cast %255 : vector<8xf32> to vector<8x1xf32>
    %257 = vector.broadcast %256 : vector<8x1xf32> to vector<8x8xf32>
    %258 = arith.subf %254, %257 : vector<8x8xf32>
    %259 = math.exp %258 : vector<8x8xf32>
    %cst_74 = arith.constant dense<0.000000e+00> : vector<8xf32>
    %260 = vector.multi_reduction <add>, %259, %cst_74 [1] : vector<8x8xf32> to vector<8xf32>
    %261 = vector.shape_cast %260 : vector<8xf32> to vector<8x1xf32>
    %262 = tpu.reciprocal %261 : vector<8x1xf32> -> vector<8x1xf32>
    %263 = vector.broadcast %262 : vector<8x1xf32> to vector<8x8xf32>
    %264 = arith.mulf %259, %263 : vector<8x8xf32>
    %265 = vector.shape_cast %264 : vector<8x8xf32> to vector<8x8x1xf32>
    %266 = vector.broadcast %265 : vector<8x8x1xf32> to vector<8x8x32xf32>
    %267 = arith.mulf %266, %0 : vector<8x8x32xf32>
    %cst_75 = arith.constant dense<0.000000e+00> : vector<8x32xf32>
    %268 = vector.multi_reduction <add>, %267, %cst_75 [1] : vector<8x8x32xf32> to vector<8x32xf32>
    %269 = tpu.concatenate %250, %268 in 1 : vector<8x16xf32>, vector<8x32xf32> -> vector<8x48xf32>
    %270 = arith.truncf %269 : vector<8x48xf32> to vector<8x48xbf16>
    %cst_76 = arith.constant dense<0.000000e+00> : vector<8x96xf32>
    %271 = tpu.matmul %270, %2, %cst_76 {dimension_numbers = #tpu.dot_dimension_numbers<[1], [0], [0], [1], [0, 0, 1, 1], [], []>} : vector<8x48xbf16>, vector<48x96xbf16>, vector<8x96xf32> -> vector<8x96xf32>
    %272 = vector.broadcast %4 : vector<1x96xf32> to vector<8x96xf32>
    %273 = arith.addf %271, %272 : vector<8x96xf32>
    %274 = arith.truncf %220 : vector<8x32xf32> to vector<8x32xbf16>
    %cst_77 = arith.constant dense<0.000000e+00> : vector<8x96xf32>
    %275 = tpu.matmul %274, %3, %cst_77 {dimension_numbers = #tpu.dot_dimension_numbers<[1], [0], [0], [1], [0, 0, 1, 1], [], []>} : vector<8x32xbf16>, vector<32x96xbf16>, vector<8x96xf32> -> vector<8x96xf32>
    %276 = vector.broadcast %5 : vector<1x96xf32> to vector<8x96xf32>
    %277 = arith.addf %275, %276 : vector<8x96xf32>
    %278 = vector.extract_strided_slice %273 {offsets = [0, 0], sizes = [8, 32], strides = [1, 1]} : vector<8x96xf32> to vector<8x32xf32>
    %279 = vector.extract_strided_slice %277 {offsets = [0, 0], sizes = [8, 32], strides = [1, 1]} : vector<8x96xf32> to vector<8x32xf32>
    %280 = arith.addf %278, %279 : vector<8x32xf32>
    %281 = arith.negf %280 : vector<8x32xf32>
    %282 = math.exp %281 : vector<8x32xf32>
    %cst_78 = arith.constant 1.000000e+00 : f32
    %283 = vector.broadcast %cst_78 : f32 to vector<8x32xf32>
    %284 = arith.addf %283, %282 : vector<8x32xf32>
    %285 = arith.divf %283, %284 : vector<8x32xf32>
    %286 = vector.extract_strided_slice %273 {offsets = [0, 32], sizes = [8, 32], strides = [1, 1]} : vector<8x96xf32> to vector<8x32xf32>
    %287 = vector.extract_strided_slice %277 {offsets = [0, 32], sizes = [8, 32], strides = [1, 1]} : vector<8x96xf32> to vector<8x32xf32>
    %288 = arith.addf %286, %287 : vector<8x32xf32>
    %289 = arith.negf %288 : vector<8x32xf32>
    %290 = math.exp %289 : vector<8x32xf32>
    %cst_79 = arith.constant 1.000000e+00 : f32
    %291 = vector.broadcast %cst_79 : f32 to vector<8x32xf32>
    %292 = arith.addf %291, %290 : vector<8x32xf32>
    %293 = arith.divf %291, %292 : vector<8x32xf32>
    %294 = vector.extract_strided_slice %273 {offsets = [0, 64], sizes = [8, 32], strides = [1, 1]} : vector<8x96xf32> to vector<8x32xf32>
    %295 = vector.extract_strided_slice %277 {offsets = [0, 64], sizes = [8, 32], strides = [1, 1]} : vector<8x96xf32> to vector<8x32xf32>
    %296 = arith.mulf %285, %295 : vector<8x32xf32>
    %297 = arith.addf %294, %296 : vector<8x32xf32>
    %298 = math.tanh %297 : vector<8x32xf32>
    %cst_80 = arith.constant 1.000000e+00 : f32
    %299 = vector.broadcast %cst_80 : f32 to vector<8x32xf32>
    %300 = arith.subf %299, %293 : vector<8x32xf32>
    %301 = arith.mulf %300, %298 : vector<8x32xf32>
    %302 = arith.mulf %293, %220 : vector<8x32xf32>
    %303 = arith.addf %301, %302 : vector<8x32xf32>
    %304 = tpu.concatenate %303, %268 in 1 : vector<8x32xf32>, vector<8x32xf32> -> vector<8x64xf32>
    %305 = arith.truncf %304 : vector<8x64xf32> to vector<8x64xbf16>
    %cst_81 = arith.constant dense<0.000000e+00> : vector<8x128xf32>
    %306 = tpu.matmul %305, %6, %cst_81 {dimension_numbers = #tpu.dot_dimension_numbers<[1], [0], [0], [1], [0, 0, 1, 1], [], []>} : vector<8x64xbf16>, vector<64x128xbf16>, vector<8x128xf32> -> vector<8x128xf32>
    %307 = vector.broadcast %7 : vector<1x128xf32> to vector<8x128xf32>
    %308 = arith.addf %306, %307 : vector<8x128xf32>
    %cst_82 = arith.constant dense<0xFF800000> : vector<8xf32>
    %309 = vector.multi_reduction <maximumf>, %308, %cst_82 [1] : vector<8x128xf32> to vector<8xf32>
    %310 = vector.shape_cast %309 : vector<8xf32> to vector<8x1xf32>
    %311 = vector.broadcast %310 : vector<8x1xf32> to vector<8x128xf32>
    %312 = arith.subf %308, %311 : vector<8x128xf32>
    %313 = math.exp %312 : vector<8x128xf32>
    %cst_83 = arith.constant dense<0.000000e+00> : vector<8xf32>
    %314 = vector.multi_reduction <add>, %313, %cst_83 [1] : vector<8x128xf32> to vector<8xf32>
    %315 = vector.shape_cast %314 : vector<8xf32> to vector<8x1xf32>
    %316 = tpu.reciprocal %315 : vector<8x1xf32> -> vector<8x1xf32>
    %317 = vector.broadcast %316 : vector<8x1xf32> to vector<8x128xf32>
    %318 = arith.mulf %313, %317 : vector<8x128xf32>
    %c3 = arith.constant 3 : index
    %c0_84 = arith.constant 0 : index
    %c0_85 = arith.constant 0 : index
    %319 = vector.load %arg13[%c3, %c0_84, %c0_85] : memref<6x8x128xf32, #tpu.memory_space<vmem>>, vector<1x8x128xf32>
    %320 = vector.shape_cast %319 : vector<1x8x128xf32> to vector<8x128xf32>
    %321 = vector.shape_cast %318 : vector<8x128xf32> to vector<1x8x128xf32>
    tpu.vector_store %arg13[%c3, %c0_84, %c0_85], %321 {strides = array<i32>} : memref<6x8x128xf32, #tpu.memory_space<vmem>>, vector<1x8x128xf32>,
    %322 = vector.broadcast %310 : vector<8x1xf32> to vector<8x128xf32>
    %323 = arith.cmpf oeq, %308, %322 : vector<8x128xf32>
    %c128_i32_86 = arith.constant 128 : i32
    %324 = vector.broadcast %c128_i32_86 : i32 to vector<8x128xi32>
    %325 = arith.select %323, %16, %324 : vector<8x128xi1>, vector<8x128xi32>
    %cst_87 = arith.constant dense<2147483647> : vector<8xi32>
    %326 = vector.multi_reduction <minsi>, %325, %cst_87 [1] : vector<8x128xi32> to vector<8xi32>
    %327 = vector.shape_cast %326 : vector<8xi32> to vector<8x1xi32>
    %328 = vector.broadcast %327 : vector<8x1xi32> to vector<8x128xi32>
    %329 = arith.cmpi eq, %16, %328 : vector<8x128xi32>
    %330 = arith.extui %329 : vector<8x128xi1> to vector<8x128xi32>
    %331 = arith.sitofp %330 : vector<8x128xi32> to vector<8x128xf32>
    %332 = arith.truncf %331 : vector<8x128xf32> to vector<8x128xbf16>
    %cst_88 = arith.constant dense<0.000000e+00> : vector<8x16xf32>
    %333 = tpu.matmul %332, %1, %cst_88 {dimension_numbers = #tpu.dot_dimension_numbers<[1], [0], [0], [1], [0, 0, 1, 1], [], []>} : vector<8x128xbf16>, vector<128x16xbf16>, vector<8x16xf32> -> vector<8x16xf32>
    %334 = vector.shape_cast %303 : vector<8x32xf32> to vector<8x1x32xf32>
    %335 = vector.broadcast %334 : vector<8x1x32xf32> to vector<8x8x32xf32>
    %336 = arith.mulf %335, %15 : vector<8x8x32xf32>
    %cst_89 = arith.constant dense<0.000000e+00> : vector<8x8xf32>
    %337 = vector.multi_reduction <add>, %336, %cst_89 [2] : vector<8x8x32xf32> to vector<8x8xf32>
    %cst_90 = arith.constant dense<0xFF800000> : vector<8xf32>
    %338 = vector.multi_reduction <maximumf>, %337, %cst_90 [1] : vector<8x8xf32> to vector<8xf32>
    %339 = vector.shape_cast %338 : vector<8xf32> to vector<8x1xf32>
    %340 = vector.broadcast %339 : vector<8x1xf32> to vector<8x8xf32>
    %341 = arith.subf %337, %340 : vector<8x8xf32>
    %342 = math.exp %341 : vector<8x8xf32>
    %cst_91 = arith.constant dense<0.000000e+00> : vector<8xf32>
    %343 = vector.multi_reduction <add>, %342, %cst_91 [1] : vector<8x8xf32> to vector<8xf32>
    %344 = vector.shape_cast %343 : vector<8xf32> to vector<8x1xf32>
    %345 = tpu.reciprocal %344 : vector<8x1xf32> -> vector<8x1xf32>
    %346 = vector.broadcast %345 : vector<8x1xf32> to vector<8x8xf32>
    %347 = arith.mulf %342, %346 : vector<8x8xf32>
    %348 = vector.shape_cast %347 : vector<8x8xf32> to vector<8x8x1xf32>
    %349 = vector.broadcast %348 : vector<8x8x1xf32> to vector<8x8x32xf32>
    %350 = arith.mulf %349, %0 : vector<8x8x32xf32>
    %cst_92 = arith.constant dense<0.000000e+00> : vector<8x32xf32>
    %351 = vector.multi_reduction <add>, %350, %cst_92 [1] : vector<8x8x32xf32> to vector<8x32xf32>
    %352 = tpu.concatenate %333, %351 in 1 : vector<8x16xf32>, vector<8x32xf32> -> vector<8x48xf32>
    %353 = arith.truncf %352 : vector<8x48xf32> to vector<8x48xbf16>
    %cst_93 = arith.constant dense<0.000000e+00> : vector<8x96xf32>
    %354 = tpu.matmul %353, %2, %cst_93 {dimension_numbers = #tpu.dot_dimension_numbers<[1], [0], [0], [1], [0, 0, 1, 1], [], []>} : vector<8x48xbf16>, vector<48x96xbf16>, vector<8x96xf32> -> vector<8x96xf32>
    %355 = vector.broadcast %4 : vector<1x96xf32> to vector<8x96xf32>
    %356 = arith.addf %354, %355 : vector<8x96xf32>
    %357 = arith.truncf %303 : vector<8x32xf32> to vector<8x32xbf16>
    %cst_94 = arith.constant dense<0.000000e+00> : vector<8x96xf32>
    %358 = tpu.matmul %357, %3, %cst_94 {dimension_numbers = #tpu.dot_dimension_numbers<[1], [0], [0], [1], [0, 0, 1, 1], [], []>} : vector<8x32xbf16>, vector<32x96xbf16>, vector<8x96xf32> -> vector<8x96xf32>
    %359 = vector.broadcast %5 : vector<1x96xf32> to vector<8x96xf32>
    %360 = arith.addf %358, %359 : vector<8x96xf32>
    %361 = vector.extract_strided_slice %356 {offsets = [0, 0], sizes = [8, 32], strides = [1, 1]} : vector<8x96xf32> to vector<8x32xf32>
    %362 = vector.extract_strided_slice %360 {offsets = [0, 0], sizes = [8, 32], strides = [1, 1]} : vector<8x96xf32> to vector<8x32xf32>
    %363 = arith.addf %361, %362 : vector<8x32xf32>
    %364 = arith.negf %363 : vector<8x32xf32>
    %365 = math.exp %364 : vector<8x32xf32>
    %cst_95 = arith.constant 1.000000e+00 : f32
    %366 = vector.broadcast %cst_95 : f32 to vector<8x32xf32>
    %367 = arith.addf %366, %365 : vector<8x32xf32>
    %368 = arith.divf %366, %367 : vector<8x32xf32>
    %369 = vector.extract_strided_slice %356 {offsets = [0, 32], sizes = [8, 32], strides = [1, 1]} : vector<8x96xf32> to vector<8x32xf32>
    %370 = vector.extract_strided_slice %360 {offsets = [0, 32], sizes = [8, 32], strides = [1, 1]} : vector<8x96xf32> to vector<8x32xf32>
    %371 = arith.addf %369, %370 : vector<8x32xf32>
    %372 = arith.negf %371 : vector<8x32xf32>
    %373 = math.exp %372 : vector<8x32xf32>
    %cst_96 = arith.constant 1.000000e+00 : f32
    %374 = vector.broadcast %cst_96 : f32 to vector<8x32xf32>
    %375 = arith.addf %374, %373 : vector<8x32xf32>
    %376 = arith.divf %374, %375 : vector<8x32xf32>
    %377 = vector.extract_strided_slice %356 {offsets = [0, 64], sizes = [8, 32], strides = [1, 1]} : vector<8x96xf32> to vector<8x32xf32>
    %378 = vector.extract_strided_slice %360 {offsets = [0, 64], sizes = [8, 32], strides = [1, 1]} : vector<8x96xf32> to vector<8x32xf32>
    %379 = arith.mulf %368, %378 : vector<8x32xf32>
    %380 = arith.addf %377, %379 : vector<8x32xf32>
    %381 = math.tanh %380 : vector<8x32xf32>
    %cst_97 = arith.constant 1.000000e+00 : f32
    %382 = vector.broadcast %cst_97 : f32 to vector<8x32xf32>
    %383 = arith.subf %382, %376 : vector<8x32xf32>
    %384 = arith.mulf %383, %381 : vector<8x32xf32>
    %385 = arith.mulf %376, %303 : vector<8x32xf32>
    %386 = arith.addf %384, %385 : vector<8x32xf32>
    %387 = tpu.concatenate %386, %351 in 1 : vector<8x32xf32>, vector<8x32xf32> -> vector<8x64xf32>
    %388 = arith.truncf %387 : vector<8x64xf32> to vector<8x64xbf16>
    %cst_98 = arith.constant dense<0.000000e+00> : vector<8x128xf32>
    %389 = tpu.matmul %388, %6, %cst_98 {dimension_numbers = #tpu.dot_dimension_numbers<[1], [0], [0], [1], [0, 0, 1, 1], [], []>} : vector<8x64xbf16>, vector<64x128xbf16>, vector<8x128xf32> -> vector<8x128xf32>
    %390 = vector.broadcast %7 : vector<1x128xf32> to vector<8x128xf32>
    %391 = arith.addf %389, %390 : vector<8x128xf32>
    %cst_99 = arith.constant dense<0xFF800000> : vector<8xf32>
    %392 = vector.multi_reduction <maximumf>, %391, %cst_99 [1] : vector<8x128xf32> to vector<8xf32>
    %393 = vector.shape_cast %392 : vector<8xf32> to vector<8x1xf32>
    %394 = vector.broadcast %393 : vector<8x1xf32> to vector<8x128xf32>
    %395 = arith.subf %391, %394 : vector<8x128xf32>
    %396 = math.exp %395 : vector<8x128xf32>
    %cst_100 = arith.constant dense<0.000000e+00> : vector<8xf32>
    %397 = vector.multi_reduction <add>, %396, %cst_100 [1] : vector<8x128xf32> to vector<8xf32>
    %398 = vector.shape_cast %397 : vector<8xf32> to vector<8x1xf32>
    %399 = tpu.reciprocal %398 : vector<8x1xf32> -> vector<8x1xf32>
    %400 = vector.broadcast %399 : vector<8x1xf32> to vector<8x128xf32>
    %401 = arith.mulf %396, %400 : vector<8x128xf32>
    %c4 = arith.constant 4 : index
    %c0_101 = arith.constant 0 : index
    %c0_102 = arith.constant 0 : index
    %402 = vector.load %arg13[%c4, %c0_101, %c0_102] : memref<6x8x128xf32, #tpu.memory_space<vmem>>, vector<1x8x128xf32>
    %403 = vector.shape_cast %402 : vector<1x8x128xf32> to vector<8x128xf32>
    %404 = vector.shape_cast %401 : vector<8x128xf32> to vector<1x8x128xf32>
    tpu.vector_store %arg13[%c4, %c0_101, %c0_102], %404 {strides = array<i32>} : memref<6x8x128xf32, #tpu.memory_space<vmem>>, vector<1x8x128xf32>,
    %405 = vector.broadcast %393 : vector<8x1xf32> to vector<8x128xf32>
    %406 = arith.cmpf oeq, %391, %405 : vector<8x128xf32>
    %c128_i32_103 = arith.constant 128 : i32
    %407 = vector.broadcast %c128_i32_103 : i32 to vector<8x128xi32>
    %408 = arith.select %406, %16, %407 : vector<8x128xi1>, vector<8x128xi32>
    %cst_104 = arith.constant dense<2147483647> : vector<8xi32>
    %409 = vector.multi_reduction <minsi>, %408, %cst_104 [1] : vector<8x128xi32> to vector<8xi32>
    %410 = vector.shape_cast %409 : vector<8xi32> to vector<8x1xi32>
    %411 = vector.broadcast %410 : vector<8x1xi32> to vector<8x128xi32>
    %412 = arith.cmpi eq, %16, %411 : vector<8x128xi32>
    %413 = arith.extui %412 : vector<8x128xi1> to vector<8x128xi32>
    %414 = arith.sitofp %413 : vector<8x128xi32> to vector<8x128xf32>
    %415 = arith.truncf %414 : vector<8x128xf32> to vector<8x128xbf16>
    %cst_105 = arith.constant dense<0.000000e+00> : vector<8x16xf32>
    %416 = tpu.matmul %415, %1, %cst_105 {dimension_numbers = #tpu.dot_dimension_numbers<[1], [0], [0], [1], [0, 0, 1, 1], [], []>} : vector<8x128xbf16>, vector<128x16xbf16>, vector<8x16xf32> -> vector<8x16xf32>
    %417 = vector.shape_cast %386 : vector<8x32xf32> to vector<8x1x32xf32>
    %418 = vector.broadcast %417 : vector<8x1x32xf32> to vector<8x8x32xf32>
    %419 = arith.mulf %418, %15 : vector<8x8x32xf32>
    %cst_106 = arith.constant dense<0.000000e+00> : vector<8x8xf32>
    %420 = vector.multi_reduction <add>, %419, %cst_106 [2] : vector<8x8x32xf32> to vector<8x8xf32>
    %cst_107 = arith.constant dense<0xFF800000> : vector<8xf32>
    %421 = vector.multi_reduction <maximumf>, %420, %cst_107 [1] : vector<8x8xf32> to vector<8xf32>
    %422 = vector.shape_cast %421 : vector<8xf32> to vector<8x1xf32>
    %423 = vector.broadcast %422 : vector<8x1xf32> to vector<8x8xf32>
    %424 = arith.subf %420, %423 : vector<8x8xf32>
    %425 = math.exp %424 : vector<8x8xf32>
    %cst_108 = arith.constant dense<0.000000e+00> : vector<8xf32>
    %426 = vector.multi_reduction <add>, %425, %cst_108 [1] : vector<8x8xf32> to vector<8xf32>
    %427 = vector.shape_cast %426 : vector<8xf32> to vector<8x1xf32>
    %428 = tpu.reciprocal %427 : vector<8x1xf32> -> vector<8x1xf32>
    %429 = vector.broadcast %428 : vector<8x1xf32> to vector<8x8xf32>
    %430 = arith.mulf %425, %429 : vector<8x8xf32>
    %431 = vector.shape_cast %430 : vector<8x8xf32> to vector<8x8x1xf32>
    %432 = vector.broadcast %431 : vector<8x8x1xf32> to vector<8x8x32xf32>
    %433 = arith.mulf %432, %0 : vector<8x8x32xf32>
    %cst_109 = arith.constant dense<0.000000e+00> : vector<8x32xf32>
    %434 = vector.multi_reduction <add>, %433, %cst_109 [1] : vector<8x8x32xf32> to vector<8x32xf32>
    %435 = tpu.concatenate %416, %434 in 1 : vector<8x16xf32>, vector<8x32xf32> -> vector<8x48xf32>
    %436 = arith.truncf %435 : vector<8x48xf32> to vector<8x48xbf16>
    %cst_110 = arith.constant dense<0.000000e+00> : vector<8x96xf32>
    %437 = tpu.matmul %436, %2, %cst_110 {dimension_numbers = #tpu.dot_dimension_numbers<[1], [0], [0], [1], [0, 0, 1, 1], [], []>} : vector<8x48xbf16>, vector<48x96xbf16>, vector<8x96xf32> -> vector<8x96xf32>
    %438 = vector.broadcast %4 : vector<1x96xf32> to vector<8x96xf32>
    %439 = arith.addf %437, %438 : vector<8x96xf32>
    %440 = arith.truncf %386 : vector<8x32xf32> to vector<8x32xbf16>
    %cst_111 = arith.constant dense<0.000000e+00> : vector<8x96xf32>
    %441 = tpu.matmul %440, %3, %cst_111 {dimension_numbers = #tpu.dot_dimension_numbers<[1], [0], [0], [1], [0, 0, 1, 1], [], []>} : vector<8x32xbf16>, vector<32x96xbf16>, vector<8x96xf32> -> vector<8x96xf32>
    %442 = vector.broadcast %5 : vector<1x96xf32> to vector<8x96xf32>
    %443 = arith.addf %441, %442 : vector<8x96xf32>
    %444 = vector.extract_strided_slice %439 {offsets = [0, 0], sizes = [8, 32], strides = [1, 1]} : vector<8x96xf32> to vector<8x32xf32>
    %445 = vector.extract_strided_slice %443 {offsets = [0, 0], sizes = [8, 32], strides = [1, 1]} : vector<8x96xf32> to vector<8x32xf32>
    %446 = arith.addf %444, %445 : vector<8x32xf32>
    %447 = arith.negf %446 : vector<8x32xf32>
    %448 = math.exp %447 : vector<8x32xf32>
    %cst_112 = arith.constant 1.000000e+00 : f32
    %449 = vector.broadcast %cst_112 : f32 to vector<8x32xf32>
    %450 = arith.addf %449, %448 : vector<8x32xf32>
    %451 = arith.divf %449, %450 : vector<8x32xf32>
    %452 = vector.extract_strided_slice %439 {offsets = [0, 32], sizes = [8, 32], strides = [1, 1]} : vector<8x96xf32> to vector<8x32xf32>
    %453 = vector.extract_strided_slice %443 {offsets = [0, 32], sizes = [8, 32], strides = [1, 1]} : vector<8x96xf32> to vector<8x32xf32>
    %454 = arith.addf %452, %453 : vector<8x32xf32>
    %455 = arith.negf %454 : vector<8x32xf32>
    %456 = math.exp %455 : vector<8x32xf32>
    %cst_113 = arith.constant 1.000000e+00 : f32
    %457 = vector.broadcast %cst_113 : f32 to vector<8x32xf32>
    %458 = arith.addf %457, %456 : vector<8x32xf32>
    %459 = arith.divf %457, %458 : vector<8x32xf32>
    %460 = vector.extract_strided_slice %439 {offsets = [0, 64], sizes = [8, 32], strides = [1, 1]} : vector<8x96xf32> to vector<8x32xf32>
    %461 = vector.extract_strided_slice %443 {offsets = [0, 64], sizes = [8, 32], strides = [1, 1]} : vector<8x96xf32> to vector<8x32xf32>
    %462 = arith.mulf %451, %461 : vector<8x32xf32>
    %463 = arith.addf %460, %462 : vector<8x32xf32>
    %464 = math.tanh %463 : vector<8x32xf32>
    %cst_114 = arith.constant 1.000000e+00 : f32
    %465 = vector.broadcast %cst_114 : f32 to vector<8x32xf32>
    %466 = arith.subf %465, %459 : vector<8x32xf32>
    %467 = arith.mulf %466, %464 : vector<8x32xf32>
    %468 = arith.mulf %459, %386 : vector<8x32xf32>
    %469 = arith.addf %467, %468 : vector<8x32xf32>
    %470 = tpu.concatenate %469, %434 in 1 : vector<8x32xf32>, vector<8x32xf32> -> vector<8x64xf32>
    %471 = arith.truncf %470 : vector<8x64xf32> to vector<8x64xbf16>
    %cst_115 = arith.constant dense<0.000000e+00> : vector<8x128xf32>
    %472 = tpu.matmul %471, %6, %cst_115 {dimension_numbers = #tpu.dot_dimension_numbers<[1], [0], [0], [1], [0, 0, 1, 1], [], []>} : vector<8x64xbf16>, vector<64x128xbf16>, vector<8x128xf32> -> vector<8x128xf32>
    %473 = vector.broadcast %7 : vector<1x128xf32> to vector<8x128xf32>
    %474 = arith.addf %472, %473 : vector<8x128xf32>
    %cst_116 = arith.constant dense<0xFF800000> : vector<8xf32>
    %475 = vector.multi_reduction <maximumf>, %474, %cst_116 [1] : vector<8x128xf32> to vector<8xf32>
    %476 = vector.shape_cast %475 : vector<8xf32> to vector<8x1xf32>
    %477 = vector.broadcast %476 : vector<8x1xf32> to vector<8x128xf32>
    %478 = arith.subf %474, %477 : vector<8x128xf32>
    %479 = math.exp %478 : vector<8x128xf32>
    %cst_117 = arith.constant dense<0.000000e+00> : vector<8xf32>
    %480 = vector.multi_reduction <add>, %479, %cst_117 [1] : vector<8x128xf32> to vector<8xf32>
    %481 = vector.shape_cast %480 : vector<8xf32> to vector<8x1xf32>
    %482 = tpu.reciprocal %481 : vector<8x1xf32> -> vector<8x1xf32>
    %483 = vector.broadcast %482 : vector<8x1xf32> to vector<8x128xf32>
    %484 = arith.mulf %479, %483 : vector<8x128xf32>
    %c5 = arith.constant 5 : index
    %c0_118 = arith.constant 0 : index
    %c0_119 = arith.constant 0 : index
    %485 = vector.load %arg13[%c5, %c0_118, %c0_119] : memref<6x8x128xf32, #tpu.memory_space<vmem>>, vector<1x8x128xf32>
    %486 = vector.shape_cast %485 : vector<1x8x128xf32> to vector<8x128xf32>
    %487 = vector.shape_cast %484 : vector<8x128xf32> to vector<1x8x128xf32>
    tpu.vector_store %arg13[%c5, %c0_118, %c0_119], %487 {strides = array<i32>} : memref<6x8x128xf32, #tpu.memory_space<vmem>>, vector<1x8x128xf32>,
    return
  }
  func.func @transform_0(%arg0: i32) -> (i32, i32) {
    %c0_i32 = arith.constant 0 : i32
    %c0_i32_0 = arith.constant 0 : i32
    return %arg0, %c0_i32 : i32, i32
  }
  func.func @transform_1(%arg0: i32) -> (i32, i32) {
    %c0_i32 = arith.constant 0 : i32
    %c0_i32_0 = arith.constant 0 : i32
    return %arg0, %c0_i32 : i32, i32
  }
  func.func @transform_2(%arg0: i32) -> (i32, i32, i32) {
    %c0_i32 = arith.constant 0 : i32
    %c0_i32_0 = arith.constant 0 : i32
    %c0_i32_1 = arith.constant 0 : i32
    return %arg0, %c0_i32, %c0_i32_0 : i32, i32, i32
  }
  func.func @transform_3(%arg0: i32) -> (i32, i32) {
    %c0_i32 = arith.constant 0 : i32
    %c0_i32_0 = arith.constant 0 : i32
    %c0_i32_1 = arith.constant 0 : i32
    return %c0_i32, %c0_i32_0 : i32, i32
  }
  func.func @transform_4(%arg0: i32) -> (i32, i32) {
    %c0_i32 = arith.constant 0 : i32
    %c0_i32_0 = arith.constant 0 : i32
    %c0_i32_1 = arith.constant 0 : i32
    return %c0_i32, %c0_i32_0 : i32, i32
  }
  func.func @transform_5(%arg0: i32) -> (i32, i32) {
    %c0_i32 = arith.constant 0 : i32
    %c0_i32_0 = arith.constant 0 : i32
    %c0_i32_1 = arith.constant 0 : i32
    return %c0_i32, %c0_i32_0 : i32, i32
  }
  func.func @transform_6(%arg0: i32) -> (i32, i32) {
    %c0_i32 = arith.constant 0 : i32
    %c0_i32_0 = arith.constant 0 : i32
    %c0_i32_1 = arith.constant 0 : i32
    return %c0_i32, %c0_i32_0 : i32, i32
  }
  func.func @transform_7(%arg0: i32) -> (i32, i32) {
    %c0_i32 = arith.constant 0 : i32
    %c0_i32_0 = arith.constant 0 : i32
    %c0_i32_1 = arith.constant 0 : i32
    return %c0_i32, %c0_i32_0 : i32, i32
  }
  func.func @transform_8(%arg0: i32) -> (i32, i32) {
    %c0_i32 = arith.constant 0 : i32
    %c0_i32_0 = arith.constant 0 : i32
    %c0_i32_1 = arith.constant 0 : i32
    return %c0_i32, %c0_i32_0 : i32, i32
  }
  func.func @transform_9(%arg0: i32) -> (i32, i32) {
    %c0_i32 = arith.constant 0 : i32
    %c0_i32_0 = arith.constant 0 : i32
    %c0_i32_1 = arith.constant 0 : i32
    return %c0_i32, %c0_i32_0 : i32, i32
  }
  func.func @transform_10(%arg0: i32) -> (i32, i32) {
    %c0_i32 = arith.constant 0 : i32
    %c0_i32_0 = arith.constant 0 : i32
    %c0_i32_1 = arith.constant 0 : i32
    return %c0_i32, %c0_i32_0 : i32, i32
  }
  func.func @transform_11(%arg0: i32) -> (i32, i32) {
    %c0_i32 = arith.constant 0 : i32
    %c0_i32_0 = arith.constant 0 : i32
    %c0_i32_1 = arith.constant 0 : i32
    return %c0_i32, %c0_i32_0 : i32, i32
  }
  func.func @transform_12(%arg0: i32) -> (i32, i32, i32) {
    %c0_i32 = arith.constant 0 : i32
    %c0_i32_0 = arith.constant 0 : i32
    %c0_i32_1 = arith.constant 0 : i32
    return %c0_i32, %arg0, %c0_i32_0 : i32, i32, i32
  }
}

</mosaic_0001>

<bundles_post_ra>
// kernel: decoder_forward.1
= control target key start
LH: loop header
LB: loop body
LE: loop exit
PB: predicated region body
PF: predicated region fallthrough
CT: control target
= control target key end

     0   :  { %s5716_s21 = smov 0   ;;  %s5718_s22 = smov 0   ;;  %s7375_s0 = inlined_call_operand.vmem [shape: f32[16,16], index: 0, kind: input, shape index: {}]   ;;  %s7376_s1 = inlined_call_operand.vmem [shape: f32[16,32], index: 1, kind: input, shape index: {}]   ;;  %s7377_s2 = inlined_call_operand.vmem [shape: f32[16,8,32], index: 2, kind: input, shape index: {}]   ;;  %s7378_s3 = inlined_call_operand.vmem [shape: bf16[128,16], index: 3, kind: input, shape index: {}]   ;;  %s7379_s4 = inlined_call_operand.vmem [shape: bf16[48,96], index: 4, kind: input, shape index: {}]   ;;  %s7380_s5 = inlined_call_operand.vmem [shape: bf16[32,96], index: 5, kind: input, shape index: {}]   ;;  %s7381_s6 = inlined_call_operand.vmem [shape: f32[1,96], index: 6, kind: input, shape index: {}]   ;;  %s7382_s7 = inlined_call_operand.vmem [shape: f32[1,96], index: 7, kind: input, shape index: {}]   ;;  %s7383_s8 = inlined_call_operand.vmem [shape: bf16[64,128], index: 8, kind: input, shape index: {}]   ;;  %s7384_s9 = inlined_call_operand.vmem [shape: f32[1,128], index: 9, kind: input, shape index: {}]   ;;  %s7385_s10 = inlined_call_operand.vmem [shape: bf16[32,32], index: 10, kind: input, shape index: {}]   ;;  %s7386_s11 = inlined_call_operand.vmem [shape: f32[1,32], index: 11, kind: input, shape index: {}]   ;;  %s7387_s12 = inlined_call_operand.vmem [shape: f32[6,16,128], index: 12, kind: output, shape index: {}]  }
   0x1   :  { %s5720_s23 = smov 0  }
   0x2 LB: > { %s5729_s24 = sadd.s32 4294967295, %s5640_s23   ;;  %s5731_s25 = sadd.s32 1, %s5640_s23   ;;  %s5640_s23 = sphi %s5720_s23, %s7473_s23   ;;  %s5636_s22 = sphi %s5718_s22, %s7472_s22   ;;  %s5632_s21 = sphi %s5716_s21, %s7471_s21  }
   0x3   : > { %s293_s26 = ssub.s32 %s5640_s23, %s5731_s25  ;;  %s296_s27 = sadd.s32 1, %s5636_s22 }
   0x4   : > { %p294_p0 = scmp.eq.s32.totalorder %s293_s26, 0  ;;  %p306_p1 = scmp.ne.s32.totalorder %s5636_s22, %s5632_s21 }
   0x5   : > { %p307_p2 = scmp.eq.s32.totalorder %s5729_s24, 1  ;;  %p4866_p3 = scmp.ge.s32.totalorder %s5640_s23, 1 }
   0x6   : > { %s5739_s28 = scalar_select %p294_p0, %s5636_s22, %s296_s27  }
   0x7   : > { %p5741_p4 = por %p307_p2, %p306_p1  ;;  %p381_p5 = scmp.lt.s32.totalorder %s5640_s23, 3 }
   0x9   : > { %p382_p6 = pnand %p4866_p3, %p381_p5 }
   0xb   : > { %385 = sbr.rel (%p382_p6) target bundleno = 9664 (0x25c0), region = 68 }
  0x12   : > { %p430_p7 = scmp.lt.s32.totalorder %s5729_s24, 1  ;;  %v5749_v0 = vld [vmem:[%s7379_s4] sm:$0xff]   ;;  %v7397_v1 = vmov 0.0   ;;  %v5757_v2 = vld [vmem:[%s7379_s4 + $0x8] sm:$0xff]   ;;  %vm5643_vm0 = vmmov 0   ;;  %v5771_v4 = vld [vmem:[%s7379_s4 + $0x10] sm:$0xff]  }
  0x13   : > { %5079 = vmatprep.subr.bf16.mxu1 %v7397_v1  ;;  %5085 = vmatprep.mubr.msk.bf16.mxu1 %vm5643_vm0, %v7397_v1  ;;  %v5644_v5 = vmov 0   ;;  %s5645_s27 = smov 16   ;;  %vm603_vm1 = vcmask 130048   ;;  %vm630_vm2 = vcmask 392192   ;;  %v5785_v9 = vld [vmem:[%s7380_s5] sm:$0xff]   ;;  %v5792_v11 = vld [vmem:[%s7380_s5 + $0x8] sm:$0xff]  }
  0x14   : > { %s431_s14 = scalar_select %p430_p7, %s5729_s24, 1  ;;  %5080 = vmatpush3.bf16.msra.mxu1 %v5749_v0  ;;  %5394 = vset.pattern.permute.xlu1 %v5644_v5  ;;  %v5400_v12 = vld [vmem:[%s7385_s10] sm:$0xff]   ;;  %v5401_v13 = vld [vmem:[%s7385_s10 + $0x8] sm:$0xff]   ;;  %vm517_vm3 = vcmask 261120   ;;  %vm800_vm4 = vcmask 523264   ;;  %vm1187_vm5 = vcmask 1041409  }
  0x15   : > { %5081 = vmatprep.subr.bf16.mxu1 %v7397_v1  ;;  %5393 = vset.pattern.permute.xlu0 %v5644_v5  ;;  %s5808_s30 = sshll.u32 %s5729_s24, 3  ;;  %v5859_v30 = vld [vmem:[%s7382_s7] ss:$0 sm:$0xff]  ;;  %s5648_s15 = smov 32   ;;  %vm1189_vm6 = vcmask 1042434   ;;  %vm1191_vm7 = vcmask 1043459  }
  0x16   : > { %s4867_s17 = sshll.u32 %s431_s14, 3  ;;  %p439_p8 = scmp.lt.s32.totalorder %s5808_s30, 15  ;;  %5067 = vmatprep.subr.bf16.mxu0 %v5400_v12  ;;  %v5866_v36 = vld [vmem:[%s7381_s6] ss:$0 sm:$0xff]  ;;  %vm1193_vm8 = vcmask 1044484   ;;  %vm1195_vm9 = vcmask 1045509  }
  0x17   : > { %s437_s20 = scalar_lea.vmem %s7376_s1, %s4867_s17  ;;  %s433_s14 = scalar_lea.vmem %s7375_s0, %s4867_s17  ;;  %5068 = vmatpush3.bf16.msra.mxu0 %v5400_v12  ;;  %v4871_v46 = vld [vmem:[%s7386_s11] ss:$0 sm:$0xff]  ;;  %v5649_v12 = vmov 1966171168   ;;  %vm1197_vm10 = vcmask 1046534   ;;  %vm1199_vm11 = vcmask 1047559  }
  0x18   : > { %v5765_v3 = vld [vmem:[%s437_s20] sm:$0xff]  ;;  %5082 = vmatpush3.bf16.msra.mxu1 %v5757_v2  ;;  %s440_s13 = scalar_select %p439_p8, %s5808_s30, 15  ;;  %5069 = vmatprep.subr.bf16.mxu0 %v5401_v13  ;;  %vm1202_vm12 = vcmask 64512  }
  0x19   : > { %600 = vrot.lane.b32.xlu0 %v5765_v3, %s5645_s27  ;;  %5083 = vmatprep.subr.bf16.mxu1 %v7397_v1  ;;  %v598_v6 = vld [vmem:[%s433_s14] sm:$0xff]  ;;  %s5646_s17 = smov 64   ;;  %s4735_s24 = scalar_lea.vmem (%p5741_p4), %s7387_s12, %s5808_s30 }
  0x1a   : > { %s4870_s14 = sshll.u32 %s440_s13, 3 }
  0x1b   : > { %s5815_s18 = scalar_lea.vmem %s7377_s2, %s4870_s14  ;;  %5070 = vmatpush3.bf16.msra.mxu0 %v5401_v13  ;;  %s5647_s14 = smov 96   ;;  %v964_v13 = vunpack.c.l.s4 %v5649_v12 }
  0x1c   : > { %5084 = vmatpush3.bf16.msra.mxu1 %v5771_v4  ;;  %v5818_v14 = vld [vmem:[%s5815_s18] sm:$0xff]  ;;  %v5821_v15 = vld [vmem:[%s5815_s18 + $0x8] sm:$0xff]  ;;  %v5824_v16 = vld [vmem:[%s5815_s18 + $0x10] sm:$0xff]  ;;  %5097 = vmatprep.subr.bf16.mxu0 %v7397_v1 }
  0x1d   : > { %5089 = vmatprep.subr.bf16.mxu1 %v7397_v1  ;;  %v494_v17 = vpack.c.bf16 %v5821_v15, %v5818_v14  ;;  %v5829_v18 = vld [vmem:[%s5815_s18 + $0x18] sm:$0xff]  ;;  %v5832_v19 = vld [vmem:[%s5815_s18 + $0x20] sm:$0xff]  ;;  %v5835_v20 = vld [vmem:[%s5815_s18 + $0x28] sm:$0xff] }
  0x1e   : > { %v495_v21 = vpack.c.bf16 %v5829_v18, %v5824_v16  ;;  %v496_v22 = vpack.c.bf16 %v5835_v20, %v5832_v19  ;;  %v5846_v23 = vld [vmem:[%s5815_s18 + $0x30] sm:$0xff]  ;;  %v5849_v24 = vld [vmem:[%s5815_s18 + $0x38] sm:$0xff] }
  0x1f   : > { %5071 = vmatprep.mubr.msk.bf16.mxu0 %vm517_vm3, %v494_v17  ;;  %v497_v25 = vpack.c.bf16 %v5849_v24, %v5846_v23  ;;  %v965_v17 = vunpack.c.0.s8 %v964_v13 }
  0x20   : > { %5072 = vmatmul.mubr.msk.bf16.vlgmr.msra.gmra.mrb[0].mxu0 %vm517_vm3, %v495_v21 }
  0x21   : > { %5075 = vmatprep.mubr.msk.bf16.mxu0 %vm517_vm3, %v496_v22 }
  0x28   : > { %5076 = vmatmul.mubr.msk.bf16.gmra.mrb[4].mxu0 %vm517_vm3, %v497_v25 }
  0x29   : > { %5105 = vmatprep.mubr.msk.bf16.mxu0 %vm5643_vm0, %v7397_v1 }
  0x8b   : > { %v601_v7 = vpop.permute.xlu0 %600 }
  0x8c   : > { %v604_v8 = vsel %vm603_vm1, %v598_v6, %v601_v7  ;;  %v5891_v6 = vld [vmem:[%s7383_s8 + $0x8] sm:$0xff]   ;;  %v5899_v7 = vld [vmem:[%s7383_s8 + $0x10] sm:$0xff]  }
  0x8d   : > { %v605_v10 = vpack.c.bf16 %v604_v8, %v604_v8  ;;  %v5908_v8 = vld [vmem:[%s7383_s8 + $0x18] sm:$0xff]  }
  0x8f   : > { %5086 = vmatmul.mubr.msk.bf16.vlgmr.msra.gmra.mrb[0].mxu1 %vm630_vm2, %v605_v10  ;;  %v595_v10 = vlaneseq }
  0x90   : > { %5090 = vmatpush3.bf16.msra.mxu1 %v5785_v9  ;;  %5093 = vmatprep.mubr.msk.bf16.mxu1 %vm5643_vm0, %v7397_v1 }
  0x91   : > { %5091 = vmatprep.subr.bf16.mxu1 %v7397_v1  ;;  %v5913_v21 = vshrl.u32 %v595_v10, 7 }
  0x94   : > { %5092 = vmatpush3.bf16.msra.mxu1 %v5792_v11 }
  0x95   : > { %5109 = vmatprep.subr.bf16.mxu1 %v7397_v1 }
  0x97   : > { %5094 = vmatmul.mubr.bf16.vlgmr.msra.gmra.mrb[4].mxu1 %v5644_v5  ;;  %v5885_v5 = vld [vmem:[%s7383_s8] sm:$0xff]  }
  0x98   : > { %5125 = vmatprep.mubr.msk.bf16.mxu1 %vm5643_vm0, %v7397_v1  ;;  %5098 = vmatpush3.bf16.msra.mxu0 %v5885_v5 }
  0x99   : > { %5099 = vmatprep.subr.bf16.mxu0 %v7397_v1 }
  0x9c   : > { %5100 = vmatpush3.bf16.msra.mxu0 %v5891_v6 }
  0x9d   : > { %5101 = vmatprep.subr.bf16.mxu0 %v7397_v1 }
  0xa0   : > { %5102 = vmatpush3.bf16.msra.mxu0 %v5899_v7 }
  0xa1   : > { %5103 = vmatprep.subr.bf16.mxu0 %v7397_v1 }
  0xa4   : > { %5104 = vmatpush3.bf16.msra.mxu0 %v5908_v8 }
  0xa5   : > { %5129 = vmatprep.subr.bf16.mxu0 %v7397_v1 }
  0xf3   : > { %v5073_v45 = vpop.f32.mrb[0].mxu0 }
  0xf4   : > { %v5873_v47 = vadd.f32 %v5073_v45, %v4871_v46  ;;  %v564_v48 = vpop.f32.mrb[1].mxu0 }
  0xf5   : > { %v565_v49 = vadd.f32 %v4871_v46, %v564_v48  ;;  %v5074_v50 = vpop.f32.mrb[2].mxu0 }
  0xf6   : > { %v567_v51 = vpop.f32.mrb[3].mxu0  ;;  %v576_v62 = vadd.f32 %v5074_v50, %v4871_v46 }
  0xf7   : > { %v568_v61 = vadd.f32 %v4871_v46, %v567_v51 }
  0xfb   : > { %v5077_v52 = vpop.f32.mrb[4].mxu0 }
  0xfc   : > { %v5875_v53 = vadd.f32 %v5077_v52, %v4871_v46  ;;  %v580_v54 = vpop.f32.mrb[5].mxu0 }
  0xfd   : > { %v581_v55 = vadd.f32 %v4871_v46, %v580_v54  ;;  %v5078_v56 = vpop.f32.mrb[6].mxu0 }
  0xfe   : > { %v583_v57 = vpop.f32.mrb[7].mxu0 }
  0xff   : > { %v584_v63 = vadd.f32 %v4871_v46, %v583_v57 }
 0x162   : > { %v668_v26 = vpop.f32.mrb[0].mxu1 }
 0x163   : > { %v5087_v27 = vpop.f32.mrb[1].mxu1  ;;  %v669_v37 = vadd.f32 %v5866_v36, %v668_v26 }
 0x164   : > { %v671_v28 = vpop.f32.mrb[2].mxu1 }
 0x165   : > { %v5088_v29 = vpop.f32.mrb[3].mxu1  ;;  %v5916_v28 = vsub.s32 %v965_v17, %v5913_v21 }
 0x16a   : > { %v729_v31 = vpop.f32.mrb[4].mxu1 }
 0x16b   : > { %v730_v32 = vadd.f32 %v5859_v30, %v729_v31  ;;  %v5095_v33 = vpop.f32.mrb[5].mxu1 }
 0x16c   : > { %v732_v34 = vpop.f32.mrb[6].mxu1 }
 0x16d   : > { %743 = vrot.lane.b32.xlu0 %v730_v32, %s5646_s17  ;;  %v5096_v35 = vpop.f32.mrb[7].mxu1  ;;  %v735_v38 = vadd.f32 %v730_v32, %v669_v37 }
 0x16f   : > { %v4886_v39 = vmul.f32 -1.442695, %v735_v38 }
 0x171   : > { %5414 = vpow2.f32 %v4886_v39  ;;  %v5932_v39 = vsub.s32 0, %v5913_v21 }
 0x17b   : > { %v5415_v40 = vpop.eup %5414 }
 0x17c   : > { %v739_v41 = vadd.f32 1.0, %v5415_v40 }
 0x17e   : > { %5416 = vrcp.f32 %v739_v41 }
 0x188   : > { %v5417_v42 = vpop.eup %5416 }
 0x189   : > { %v753_v22 = vsub.f32 1.0, %v5417_v42  ;;  %v759_v26 = vmul.f32 0.0, %v5417_v42 }
 0x1df   : > { %v744_v43 = vpop.permute.xlu0 %743 }
 0x1e0   : > { %v746_v44 = vmul.f32 %v5417_v42, %v744_v43 }
 0x1e2   : > { %748 = vrot.lane.b32.xlu1 %v746_v44, %s5646_s17 }
 0x254   : > { %v749_v58 = vpop.permute.xlu1 %748 }
 0x255   : > { %v751_v59 = vadd.f32 %v749_v58, %v669_v37 }
 0x257   : > { %5418 = vtanh.f32 %v751_v59 }
 0x261   : > { %v5419_v60 = vpop.eup %5418 }
 0x262   : > { %755 = vrot.lane.b32.xlu1 %v5419_v60, %s5647_s14 }
 0x266   : > { %765 = vrot.lane.b32.xlu1 %v5765_v3, %s5648_s15  ;;  %v592_v3 = vadd.f32 %v5078_v56, %v4871_v46 }
 0x26a   : > { %1061 = vrot.lane.b32.xlu1 %v568_v61, %s5648_s15 }
 0x26e   : > { %1065 = vrot.lane.b32.xlu1 %v576_v62, %s5648_s15 }
 0x272   : > { %1069 = vrot.lane.b32.xlu1 %v584_v63, %s5648_s15 }
 0x276   : > { %1073 = vrot.lane.b32.xlu1 %v592_v3, %s5648_s15 }
 0x2d4   : > { %v756_v25 = vpop.permute.xlu1 %755 }
 0x2d5   : > { %v758_v27 = vmul.f32 %v756_v25, %v753_v22 }
 0x2d7   : > { %v5918_v29 = vadd.f32 %v759_v26, %v758_v27 }
 0x2d8   : > { %v766_v31 = vpop.permute.xlu1 %765 }
 0x2d9   : > { %762 = vrot.lane.b32.xlu0 %v5918_v29, %s5647_s14  ;;  %v969_v32 = vrot.slane %v5918_v29, %v5916_v28  ;;  %v962_v33 = vcombine.high %v5918_v29, %v5918_v29 }
 0x2db   : > { %v977_v34 = vcombine.high %v969_v32, %v969_v32  ;;  %v976_v35 = vrot.slane %v962_v33, %v5916_v28  ;;  %v985_v56 = vrot.slane %v969_v32, %v5916_v28 }
 0x2dc   : > { %v5927_v37 = vpop.permute.xlu1 %1061 }
 0x2dd   : > { %7423 = vst [vmem:[#allocation3_spill] sm:$0xff] %v5927_v37  ;;  %1059 = vrot.lane.b32.xlu0 %v565_v49, %s5648_s15  ;;  %v999_v38 = vrot.slane %v977_v34, %v5916_v28  ;;  %v978_v42 = vcombine.high %v976_v35, %v976_v35  ;;  %v1007_v60 = vcombine.high %v985_v56, %v985_v56 }
 0x2de   : > { %v992_v3 = vrot.slane %v976_v35, %v5916_v28 }
 0x2df   : > { %v1018_v40 = vrot.slane %v999_v38, %v5932_v39  ;;  %v1009_v41 = vcombine.high %v999_v38, %v999_v38  ;;  %v1006_v46 = vrot.slane %v978_v42, %v5916_v28  ;;  %v1022_v63 = vrot.slane %v1007_v60, %v5932_v39 }
 0x2e0   : > { %v5935_v43 = vpop.permute.xlu1 %1065  ;;  %v1030_v22 = vrot.slane %v992_v3, %v5932_v39  ;;  %v1008_v25 = vcombine.high %v992_v3, %v992_v3 }
 0x2e1   : > { %7424 = vst [vmem:[#allocation4_spill] sm:$0xff] %v5935_v43  ;;  %1063 = vrot.lane.b32.xlu0 %v5873_v47, %s5648_s15  ;;  %v1084_v44 = vmul.f32 %v5927_v37, %v1018_v40  ;;  %v1026_v45 = vrot.slane %v1009_v41, %v5932_v39  ;;  %v1034_v50 = vrot.slane %v1006_v46, %v5932_v39 }
 0x2e2   : > { %v1010_v51 = vcombine.high %v1006_v46, %v1006_v46 }
 0x2e3   : > { %1101 = vrot.lane.b32.xlu1 %v1084_v44, %s5647_s14  ;;  %v1086_v49 = vmul.f32 %v5935_v43, %v1026_v45 }
 0x2e4   : > { %v5943_v48 = vpop.permute.xlu1 %1069  ;;  %v1042_v54 = vrot.slane %v1010_v51, %v5932_v39 }
 0x2e5   : > { %7425 = vst [vmem:[#allocation5_spill] sm:$0xff] %v5943_v48  ;;  %1067 = vrot.lane.b32.xlu0 %v581_v55, %s5648_s15  ;;  %v1088_v47 = vmul.f32 %v5943_v48, %v1034_v50 }
 0x2e7   : > { %1105 = vrot.lane.b32.xlu1 %v1086_v49, %s5647_s14 }
 0x2e8   : > { %v5952_v52 = vpop.permute.xlu1 %1073 }
 0x2e9   : > { %1071 = vrot.lane.b32.xlu0 %v5875_v53, %s5648_s15  ;;  %7426 = vst [vmem:[#allocation6_spill] sm:$0xff] %v5952_v52  ;;  %v1090_v55 = vmul.f32 %v5952_v52, %v1042_v54  ;;  %v1014_v53 = vrot.slane %v985_v56, %v5932_v39 }
 0x2eb   : > { %1109 = vrot.lane.b32.xlu1 %v1088_v47, %s5647_s14  ;;  %v6001_v47 = vld [vmem:[%s7384_s9] ss:$0 sm:$0xff] }
 0x2ec   : > { %7430 = vst [vmem:[#allocation10_spill] sm:$0xff] %v6001_v47 }
 0x2ef   : > { %1113 = vrot.lane.b32.xlu1 %v1090_v55, %s5647_s14 }
 0x34b   : > { %v763_v57 = vpop.permute.xlu0 %762 }
 0x34c   : > { %v768_v58 = vsel %vm517_vm3, %v763_v57, %v766_v31 }
 0x34d   : > { %v769_v59 = vpack.c.bf16 %v768_v58, %v768_v58 }
 0x34f   : > { %v5961_v61 = vpop.permute.xlu0 %1059  ;;  %5106 = vmatmul.mubr.msk.bf16.vlgmr.msra.gmra.mrb[8].mxu0 %vm800_vm4, %v769_v59  ;;  %v6008_v59 = vand.u32 127, %v595_v10 }
 0x350   : > { %v1083_v62 = vmul.f32 %v5961_v61, %v1014_v53  ;;  %5130 = vmatpush3.bf16.msra.mxu0 %v5749_v0  ;;  %5135 = vmatprep.mubr.msk.bf16.mxu0 %vm5643_vm0, %v7397_v1 }
 0x351   : > { %5131 = vmatprep.subr.bf16.mxu0 %v7397_v1  ;;  %v6012_v60 = vsub.s32 %v6008_v59, %v5913_v21 }
 0x352   : > { %1099 = vrot.lane.b32.xlu0 %v1083_v62, %s5647_s14 }
 0x353   : > { %v5972_v12 = vpop.permute.xlu0 %1063 }
 0x354   : > { %7427 = vst [vmem:[#allocation7_spill] sm:$0xff] %v5972_v12  ;;  %v1085_v13 = vmul.f32 %v5972_v12, %v1022_v63  ;;  %5132 = vmatpush3.bf16.msra.mxu0 %v5757_v2  ;;  %v1038_v2 = vrot.slane %v1008_v25, %v5932_v39 }
 0x355   : > { %v1102_v17 = vpop.permute.xlu1 %1101  ;;  %5133 = vmatprep.subr.bf16.mxu0 %v7397_v1 }
 0x356   : > { %1103 = vrot.lane.b32.xlu0 %v1085_v13, %s5647_s14  ;;  %v1126_v0 = vsel %vm517_vm3, %v1102_v17, 0.0 }
 0x357   : > { %v5980_v26 = vpop.permute.xlu0 %1067  ;;  %1127 = vadd.xlane.f32.xlu1 %v1126_v0 }
 0x358   : > { %7428 = vst [vmem:[#allocation8_spill] sm:$0xff] %v5980_v26  ;;  %v1087_v27 = vmul.f32 %v5980_v26, %v1030_v22  ;;  %5134 = vmatpush3.bf16.msra.mxu0 %v5771_v4 }
 0x359   : > { %5147 = vmatprep.subr.bf16.mxu0 %v7397_v1  ;;  %v1106_v35 = vpop.permute.xlu1 %1105 }
 0x35a   : > { %1107 = vrot.lane.b32.xlu0 %v1087_v27, %s5647_s14  ;;  %v1132_v44 = vsel %vm517_vm3, %v1106_v35, 0.0 }
 0x35b   : > { %v5987_v31 = vpop.permute.xlu0 %1071 }
 0x35c   : > { %7429 = vst [vmem:[#allocation9_spill] sm:$0xff] %v5987_v31  ;;  %v1089_v32 = vmul.f32 %v5987_v31, %v1038_v2 }
 0x35d   : > { %v1110_v40 = vpop.permute.xlu1 %1109 }
 0x35e   : > { %1111 = vrot.lane.b32.xlu0 %v1089_v32, %s5647_s14  ;;  %v1138_v49 = vsel %vm517_vm3, %v1110_v40, 0.0 }
 0x361   : > { %v1114_v50 = vpop.permute.xlu1 %1113 }
 0x362   : > { %v1144_v51 = vsel %vm517_vm3, %v1114_v50, 0.0 }
 0x3c4   : > { %v1100_v33 = vpop.permute.xlu0 %1099 }
 0x3c5   : > { %v1123_v34 = vsel %vm517_vm3, %v1100_v33, 0.0 }
 0x3c6   : > { %1124 = vadd.xlane.f32.xlu0 %v1123_v34 }
 0x3c8   : > { %v1104_v38 = vpop.permute.xlu0 %1103 }
 0x3c9   : > { %v1129_v4 = vsel %vm517_vm3, %v1104_v38, 0.0 }
 0x3ca   : > { %1130 = vadd.xlane.f32.xlu0 %v1129_v4 }
 0x3cc   : > { %v1108_v41 = vpop.permute.xlu0 %1107 }
 0x3cd   : > { %v1135_v42 = vsel %vm517_vm3, %v1108_v41, 0.0 }
 0x3ce   : > { %1136 = vadd.xlane.f32.xlu1 %v1135_v42  ;;  %1133 = vadd.xlane.f32.xlu0 %v1132_v44 }
 0x3d0   : > { %v1112_v45 = vpop.permute.xlu0 %1111 }
 0x3d1   : > { %v1141_v46 = vsel %vm517_vm3, %v1112_v45, 0.0 }
 0x3d2   : > { %1142 = vadd.xlane.f32.xlu1 %v1141_v46  ;;  %1139 = vadd.xlane.f32.xlu0 %v1138_v49 }
 0x3d6   : > { %1145 = vadd.xlane.f32.xlu0 %v1144_v51 }
 0x3e4   : > { %v1128_v62 = vpop.xlane.xlu1 %1127 }
 0x3e5   : > { %v1162_v17 = vrot.slane %v1128_v62, %v6012_v60 }
 0x422   : > { %v838_v54 = vpop.f32.mrb[8].mxu0 }
 0x423   : > { %v6004_v55 = vadd.f32 %v6001_v47, %v838_v54  ;;  %v5107_v56 = vpop.f32.mrb[9].mxu0 }
 0x424   : > { %v841_v57 = vpop.f32.mrb[10].mxu0  ;;  %v6042_v56 = vsub.s32 1, %v5913_v21 }
 0x425   : > { %7431 = vst [vmem:[#allocation11_spill] sm:$0xff] %v6004_v55  ;;  %v5108_v58 = vpop.f32.mrb[11].mxu0  ;;  %844 = vmax.xlane.f32.xlu1 %v6004_v55  ;;  %v6045_v57 = vsub.s32 2, %v5913_v21 }
 0x426   : > { %v6048_v58 = vsub.s32 3, %v5913_v21 }
 0x453   : > { %v1125_v53 = vpop.xlane.xlu0 %1124 }
 0x454   : > { %v1158_v3 = vrot.slane %v1125_v53, %v6012_v60 }
 0x456   : > { %v1188_v10 = vsel %vm1187_vm5, %v1162_v17, %v1158_v3 }
 0x457   : > { %v1131_v63 = vpop.xlane.xlu0 %1130 }
 0x458   : > { %v1166_v13 = vrot.slane %v1131_v63, %v6012_v60 }
 0x45a   : > { %v1190_v27 = vsel %vm1189_vm6, %v1166_v13, %v1188_v10 }
 0x45b   : > { %v1134_v0 = vpop.xlane.xlu0 %1133  ;;  %v1137_v22 = vpop.xlane.xlu1 %1136 }
 0x45c   : > { %v1170_v25 = vrot.slane %v1134_v0, %v6012_v60  ;;  %v1174_v2 = vrot.slane %v1137_v22, %v6012_v60 }
 0x45e   : > { %v1192_v32 = vsel %vm1191_vm7, %v1170_v25, %v1190_v27 }
 0x45f   : > { %v1140_v33 = vpop.xlane.xlu0 %1139  ;;  %v1143_v34 = vpop.xlane.xlu1 %1142  ;;  %v1194_v38 = vsel %vm1193_vm8, %v1174_v2, %v1192_v32  ;;  %v6054_v2 = vsub.s32 4, %v5913_v21 }
 0x460   : > { %v1178_v35 = vrot.slane %v1140_v33, %v6012_v60  ;;  %v1182_v4 = vrot.slane %v1143_v34, %v6012_v60 }
 0x462   : > { %v1196_v40 = vsel %vm1195_vm9, %v1178_v35, %v1194_v38 }
 0x463   : > { %v1146_v41 = vpop.xlane.xlu0 %1145  ;;  %v1198_v44 = vsel %vm1197_vm10, %v1182_v4, %v1196_v40  ;;  %v6058_v40 = vsub.s32 5, %v5913_v21 }
 0x464   : > { %v1186_v42 = vrot.slane %v1146_v41, %v6012_v60 }
 0x466   : > { %v1200_v45 = vsel %vm1199_vm11, %v1186_v42, %v1198_v44 }
 0x467   : > { %v1203_v46 = vsel %vm1202_vm12, %v1200_v45, -inf }
 0x468   : > { %1204 = vmax.xlane.f32.xlu0 %v1203_v46 }
 0x4b2   : > { %v6030_v49 = vpop.xlane.xlu1 %844 }
 0x4b3   : > { %7432 = vst [vmem:[#allocation12_spill] sm:$0xff] %v6030_v49  ;;  %vm854_vm13 = vcmp.eq.f32.partialorder %v6004_v55, %v6030_v49 }
 0x4b4   : > { %v6035_v50 = vsel %vm854_vm13, %v6008_v59, 128 }
 0x4b5   : > { %v857_v51 = vshra.s32 %v6035_v50, 16 }
 0x4b7   : > { %v6038_v54 = vcvt.s32.f32 %v857_v51 }
 0x4b9   : > { %860 = vmin.xlane.f32.xlu1 %v6038_v54 }
 0x4f5   : > { %v1205_v3 = vpop.xlane.xlu0 %1204 }
 0x4f6   : > { %v1210_v13 = vrot.slane %v1205_v3, %v5932_v39  ;;  %v1214_v17 = vrot.slane %v1205_v3, %v6042_v56  ;;  %v1218_v10 = vrot.slane %v1205_v3, %v6045_v57  ;;  %v1222_v32 = vrot.slane %v1205_v3, %v6048_v58 }
 0x4f7   : > { %v1226_v42 = vrot.slane %v1205_v3, %v6054_v2 }
 0x4f8   : > { %v1247_v25 = vsub.f32 %v1125_v53, %v1210_v13  ;;  %v1248_v27 = vsub.f32 %v1128_v62, %v1214_v17  ;;  %v1249_v35 = vsub.f32 %v1131_v63, %v1218_v10  ;;  %v1250_v45 = vsub.f32 %v1134_v0, %v1222_v32 }
 0x4f9   : > { %v6062_v53 = vsub.s32 6, %v5913_v21  ;;  %v1230_v62 = vrot.slane %v1205_v3, %v6058_v40  ;;  %v1251_v51 = vsub.f32 %v1137_v22, %v1226_v42  ;;  %v6066_v63 = vsub.s32 7, %v5913_v21 }
 0x4fa   : > { %v1255_v38 = vmul.f32 1.442695, %v1247_v25  ;;  %v1257_v4 = vmul.f32 1.442695, %v1248_v27  ;;  %v1259_v44 = vmul.f32 1.442695, %v1249_v35 }
 0x4fb   : > { %v1261_v46 = vmul.f32 1.442695, %v1250_v45  ;;  %v1234_v13 = vrot.slane %v1205_v3, %v6062_v53  ;;  %v1263_v17 = vmul.f32 1.442695, %v1251_v51  ;;  %v1252_v10 = vsub.f32 %v1140_v33, %v1230_v62  ;;  %v6103_v45 = vld [vmem:[%s7378_s3 + $0x8] sm:$0xff]   ;;  %v6110_v62 = vld [vmem:[%s7378_s3 + $0x10] sm:$0xff]  }
 0x4fc   : > { %5420 = vpow2.f32 %v1255_v38  ;;  %v1238_v0 = vrot.slane %v1205_v3, %v6066_v63  ;;  %v6124_v51 = vld [vmem:[%s7378_s3 + $0x20] sm:$0xff]  }
 0x4fd   : > { %5422 = vpow2.f32 %v1257_v4  ;;  %v1265_v22 = vmul.f32 1.442695, %v1252_v10  ;;  %v1253_v32 = vsub.f32 %v1143_v34, %v1234_v13  ;;  %v6131_v13 = vld [vmem:[%s7378_s3 + $0x28] sm:$0xff]   ;;  %v856_v10 = vand.u32 65535, %v6035_v50 }
 0x4fe   : > { %5424 = vpow2.f32 %v1259_v44  ;;  %v1254_v33 = vsub.f32 %v1146_v41, %v1238_v0  ;;  %v6097_v44 = vld [vmem:[%s7378_s3] sm:$0xff]  }
 0x4ff   : > { %5426 = vpow2.f32 %v1261_v46  ;;  %v1267_v35 = vmul.f32 1.442695, %v1253_v32  ;;  %5110 = vmatpush3.bf16.msra.mxu1 %v6097_v44  ;;  %v6117_v46 = vld [vmem:[%s7378_s3 + $0x18] sm:$0xff]  }
 0x500   : > { %5428 = vpow2.f32 %v1263_v17  ;;  %v1269_v4 = vmul.f32 1.442695, %v1254_v33  ;;  %5111 = vmatprep.subr.bf16.mxu1 %v7397_v1  ;;  %v6138_v17 = vld [vmem:[%s7378_s3 + $0x30] sm:$0xff]  }
 0x501   : > { %5430 = vpow2.f32 %v1265_v22  ;;  %v858_v22 = vcvt.s32.f32 %v856_v10 }
 0x502   : > { %5432 = vpow2.f32 %v1267_v35  ;;  %v6148_v35 = vld [vmem:[%s7378_s3 + $0x38] sm:$0xff]  }
 0x503   : > { %5434 = vpow2.f32 %v1269_v4  ;;  %5112 = vmatpush3.bf16.msra.mxu1 %v6103_v45 }
 0x504   : > { %5113 = vmatprep.subr.bf16.mxu1 %v7397_v1 }
 0x506   : > { %v6069_v25 = vpop.eup %5420 }
 0x507   : > { %v6071_v27 = vpop.eup %5422  ;;  %1280 = vperm.xlu0 %5393, %v6069_v25   ;;  %5114 = vmatpush3.bf16.msra.mxu1 %v6110_v62 }
 0x508   : > { %1283 = vperm.xlu1 %5394, %v6071_v27   ;;  %v6076_v21 = vpop.eup %5424  ;;  %5115 = vmatprep.subr.bf16.mxu1 %v7397_v1 }
 0x509   : > { %v6079_v38 = vpop.eup %5426 }
 0x50a   : > { %v6082_v42 = vpop.eup %5428 }
 0x50b   : > { %v6085_v3 = vpop.eup %5430  ;;  %5116 = vmatpush3.bf16.msra.mxu1 %v6117_v46 }
 0x50c   : > { %1286 = vperm.xlu1 %5394, %v6076_v21   ;;  %v6088_v34 = vpop.eup %5432  ;;  %5117 = vmatprep.subr.bf16.mxu1 %v7397_v1 }
 0x50d   : > { %v6091_v41 = vpop.eup %5434 }
 0x50f   : > { %5118 = vmatpush3.bf16.msra.mxu1 %v6124_v51 }
 0x510   : > { %1289 = vperm.xlu1 %5394, %v6079_v38   ;;  %5119 = vmatprep.subr.bf16.mxu1 %v7397_v1 }
 0x513   : > { %5120 = vmatpush3.bf16.msra.mxu1 %v6131_v13 }
 0x514   : > { %1292 = vperm.xlu1 %5394, %v6082_v42   ;;  %5121 = vmatprep.subr.bf16.mxu1 %v7397_v1 }
 0x517   : > { %5122 = vmatpush3.bf16.msra.mxu1 %v6138_v17 }
 0x518   : > { %1295 = vperm.xlu1 %5394, %v6085_v3   ;;  %5123 = vmatprep.subr.bf16.mxu1 %v7397_v1 }
 0x51b   : > { %5124 = vmatpush3.bf16.msra.mxu1 %v6148_v35 }
 0x51c   : > { %1298 = vperm.xlu1 %5394, %v6088_v34   ;;  %5139 = vmatprep.subr.bf16.mxu1 %v7397_v1 }
 0x520   : > { %1301 = vperm.xlu1 %5394, %v6091_v41  }
 0x546   : > { %v861_v0 = vpop.xlane.xlu1 %860 }
 0x547   : > { %vm862_vm14 = vcmp.eq.f32.partialorder %v6038_v54, %v861_v0 }
 0x548   : > { %v863_v32 = vsel %vm862_vm14, %v858_v22, inf }
 0x549   : > { %864 = vmin.xlane.f32.xlu1 %v863_v32 }
 0x586   : > { %v1281_v50 = vpop.permute.xlu0 %1280 }
 0x587   : > { %v1284_v33 = vpop.permute.xlu1 %1283  ;;  %v1306_v10 = vrot.slane %v1281_v50, %v6012_v60 }
 0x588   : > { %v1310_v54 = vrot.slane %v1284_v33, %v6012_v60 }
 0x58a   : > { %v1335_v48 = vsel %vm1187_vm5, %v1310_v54, %v1306_v10 }
 0x58b   : > { %v1287_v4 = vpop.permute.xlu1 %1286 }
 0x58c   : > { %v1314_v22 = vrot.slane %v1287_v4, %v6012_v60 }
 0x58e   : > { %v1336_v26 = vsel %vm1189_vm6, %v1314_v22, %v1335_v48 }
 0x58f   : > { %v1290_v55 = vpop.permute.xlu1 %1289 }
 0x590   : > { %v1318_v32 = vrot.slane %v1290_v55, %v6012_v60 }
 0x592   : > { %v1337_v12 = vsel %vm1191_vm7, %v1318_v32, %v1336_v26 }
 0x593   : > { %v1293_v49 = vpop.permute.xlu1 %1292 }
 0x594   : > { %v1322_v52 = vrot.slane %v1293_v49, %v6012_v60 }
 0x596   : > { %v1338_v50 = vsel %vm1193_vm8, %v1322_v52, %v1337_v12  ;;  %v7407_v52 = vmov 1.0|1.0  }
 0x597   : > { %v1296_v47 = vpop.permute.xlu1 %1295 }
 0x598   : > { %v1326_v1 = vrot.slane %v1296_v47, %v6012_v60  ;;  %v867_v47 = vcvt.f32.s32 %v861_v0 }
 0x59a   : > { %v1339_v55 = vsel %vm1195_vm9, %v1326_v1, %v1338_v50  ;;  %v868_v54 = vshll.u32 %v867_v47, 16  ;;  %v7433_v1 = vmov 0.0   ;;  %v1563_v47 = vpack.c.bf16 %v5918_v29, %v5918_v29 }
 0x59b   : > { %v1299_v31 = vpop.permute.xlu1 %1298 }
 0x59c   : > { %v1330_v43 = vrot.slane %v1299_v31, %v6012_v60 }
 0x59e   : > { %v1340_v49 = vsel %vm1197_vm10, %v1330_v43, %v1339_v55 }
 0x59f   : > { %v1302_v33 = vpop.permute.xlu1 %1301 }
 0x5a0   : > { %v1334_v4 = vrot.slane %v1302_v33, %v6012_v60 }
 0x5a2   : > { %v1341_v37 = vsel %vm1199_vm11, %v1334_v4, %v1340_v49 }
 0x5a3   : > { %v1343_v10 = vsel %vm1202_vm12, %v1341_v37, 0.0 }
 0x5a4   : > { %1344 = vadd.xlane.f32.xlu0 %v1343_v10 }
 0x5d6   : > { %v865_v48 = vpop.xlane.xlu1 %864 }
 0x5d7   : > { %v866_v31 = vcvt.f32.s32 %v865_v48 }
 0x5d9   : > { %v869_v22 = vadd.s32 %v868_v54, %v866_v31 }
 0x5db   : > { %vm870_vm15 = vcmp.eq.s32.totalorder %v6008_v59, %v869_v22 }
 0x5dc   : > { %vm4902_vm13 = vmpackc.low %vm870_vm15, %vm870_vm15 }
 0x5dd   : > { %5126 = vmatmul.mubr.msk.bf16.vlgmr.msra.gmra.mrb[8].mxu1 %vm4902_vm13, %v7407_v52 }
 0x5de   : > { %5140 = vmatpush3.bf16.msra.mxu1 %v5785_v9  ;;  %5143 = vmatprep.mubr.msk.bf16.mxu1 %vm5643_vm0, %v7433_v1 }
 0x5df   : > { %5141 = vmatprep.subr.bf16.mxu1 %v7433_v1 }
 0x5e2   : > { %5142 = vmatpush3.bf16.msra.mxu1 %v5792_v11 }
 0x5e3   : > { %5159 = vmatprep.subr.bf16.mxu1 %v7433_v1 }
 0x631   : > { %v1345_v37 = vpop.xlane.xlu0 %1344 }
 0x632   : > { %5436 = vrcp.f32 %v1345_v37 }
 0x63c   : > { %v5437_v43 = vpop.eup %5436 }
 0x63d   : > { %v1351_v12 = vrot.slane %v5437_v43, %v5932_v39  ;;  %v1355_v26 = vrot.slane %v5437_v43, %v6042_v56  ;;  %v1363_v32 = vrot.slane %v5437_v43, %v6048_v58  ;;  %v1359_v50 = vrot.slane %v5437_v43, %v6045_v57 }
 0x63e   : > { %v1371_v4 = vrot.slane %v5437_v43, %v6058_v40  ;;  %v1367_v55 = vrot.slane %v5437_v43, %v6054_v2  ;;  %v1379_v49 = vrot.slane %v5437_v43, %v6066_v63  ;;  %v1375_v10 = vrot.slane %v5437_v43, %v6062_v53 }
 0x63f   : > { %v1388_v0 = vmul.f32 %v6069_v25, %v1351_v12  ;;  %v1389_v9 = vmul.f32 %v6071_v27, %v1355_v26  ;;  %v1391_v11 = vmul.f32 %v6079_v38, %v1363_v32  ;;  %v1390_v33 = vmul.f32 %v6076_v21, %v1359_v50 }
 0x640   : > { %v1393_v25 = vmul.f32 %v6085_v3, %v1371_v4  ;;  %v1392_v27 = vmul.f32 %v6082_v42, %v1367_v55  ;;  %v1395_v38 = vmul.f32 %v6091_v41, %v1379_v49  ;;  %v1394_v21 = vmul.f32 %v6088_v34, %v1375_v10 }
 0x641   : > { %1398 = vperm.xlu0 %5393, %v1388_v0   ;;  %1403 = vperm.xlu1 %5394, %v1389_v9  }
 0x645   : > { %1413 = vperm.xlu0 %5393, %v1391_v11   ;;  %1408 = vperm.xlu1 %5394, %v1390_v33  }
 0x649   : > { %1423 = vperm.xlu0 %5393, %v1393_v25   ;;  %1418 = vperm.xlu1 %5394, %v1392_v27  }
 0x64d   : > { %1433 = vperm.xlu0 %5393, %v1395_v38   ;;  %1428 = vperm.xlu1 %5394, %v1394_v21  }
 0x651   : > { %1565 = vrot.lane.b32.xlu1 %v1563_v47, %s5647_s14 }
 0x6b0   : > { %v6195_v3 = vpop.f32.mrb[8].mxu1 }
 0x6b1   : > { %v5127_v42 = vpop.f32.mrb[9].mxu1 }
 0x6b2   : > { %v959_v48 = vpop.f32.mrb[10].mxu1 }
 0x6b3   : > { %v5128_v54 = vpop.f32.mrb[11].mxu1 }
 0x6c0   : > { %v1399_v31 = vpop.permute.xlu0 %1398  ;;  %v1404_v22 = vpop.permute.xlu1 %1403 }
 0x6c1   : > { %v1436_v37 = vmul.f32 %v1399_v31, %v5818_v14  ;;  %v1437_v41 = vmul.f32 %v1404_v22, %v5821_v15 }
 0x6c3   : > { %v1444_v34 = vsel %vm517_vm3, %v1436_v37, 0.0  ;;  %v1451_v43 = vsel %vm517_vm3, %v1437_v41, 0.0 }
 0x6c4   : > { %v1445_v12 = vrot.slane %v1444_v34, 4  ;;  %v1452_v26 = vrot.slane %v1451_v43, 4  ;;  %v1414_v0 = vpop.permute.xlu0 %1413  ;;  %v1409_v9 = vpop.permute.xlu1 %1408 }
 0x6c5   : > { %v1439_v32 = vmul.f32 %v1414_v0, %v5829_v18  ;;  %v1438_v50 = vmul.f32 %v1409_v9, %v5824_v16 }
 0x6c6   : > { %v1446_v11 = vadd.f32 %v1445_v12, %v1444_v34  ;;  %v1453_v33 = vadd.f32 %v1452_v26, %v1451_v43 }
 0x6c7   : > { %v1465_v4 = vsel %vm517_vm3, %v1439_v32, 0.0  ;;  %v1458_v14 = vsel %vm517_vm3, %v1438_v50, 0.0 }
 0x6c8   : > { %v1447_v55 = vrot.slane %v1446_v11, 2  ;;  %v1454_v15 = vrot.slane %v1453_v33, 2  ;;  %v1466_v25 = vrot.slane %v1465_v4, 4  ;;  %v1459_v27 = vrot.slane %v1458_v14, 4  ;;  %v1424_v49 = vpop.permute.xlu0 %1423  ;;  %v1419_v10 = vpop.permute.xlu1 %1418 }
 0x6c9   : > { %v1441_v38 = vmul.f32 %v1424_v49, %v5835_v20  ;;  %v1440_v21 = vmul.f32 %v1419_v10, %v5832_v19 }
 0x6ca   : > { %v1448_v47 = vadd.f32 %v1447_v55, %v1446_v11  ;;  %v1455_v18 = vadd.f32 %v1454_v15, %v1453_v33  ;;  %v1467_v42 = vadd.f32 %v1466_v25, %v1465_v4  ;;  %v1460_v16 = vadd.f32 %v1459_v27, %v1458_v14 }
 0x6cb   : > { %v1479_v48 = vsel %vm517_vm3, %v1441_v38, 0.0  ;;  %v1472_v54 = vsel %vm517_vm3, %v1440_v21, 0.0 }
 0x6cc   : > { %v1449_v31 = vrot.slane %v1448_v47, 1  ;;  %v1456_v22 = vrot.slane %v1455_v18, 1  ;;  %v1468_v37 = vrot.slane %v1467_v42, 2  ;;  %v1461_v41 = vrot.slane %v1460_v16, 2  ;;  %v1434_v34 = vpop.permute.xlu0 %1433  ;;  %v1429_v43 = vpop.permute.xlu1 %1428 }
 0x6cd   : > { %v1480_v12 = vrot.slane %v1479_v48, 4  ;;  %v1473_v26 = vrot.slane %v1472_v54, 4  ;;  %v1443_v20 = vmul.f32 %v1434_v34, %v5849_v24  ;;  %v1442_v19 = vmul.f32 %v1429_v43, %v5846_v23 }
 0x6ce   : > { %v1450_v0 = vadd.f32 %v1449_v31, %v1448_v47  ;;  %v1469_v9 = vadd.f32 %v1468_v37, %v1467_v42  ;;  %v1462_v32 = vadd.f32 %v1461_v41, %v1460_v16  ;;  %v1457_v14 = vadd.f32 %v1456_v22, %v1455_v18 }
 0x6cf   : > { %v1481_v50 = vadd.f32 %v1480_v12, %v1479_v48  ;;  %v1474_v11 = vadd.f32 %v1473_v26, %v1472_v54  ;;  %v1493_v33 = vsel %vm517_vm3, %v1443_v20, 0.0  ;;  %v1486_v4 = vsel %vm517_vm3, %v1442_v19, 0.0 }
 0x6d0   : > { %v1470_v55 = vrot.slane %v1469_v9, 1  ;;  %v1463_v15 = vrot.slane %v1462_v32, 1  ;;  %v1494_v25 = vrot.slane %v1493_v33, 4  ;;  %v1566_v27 = vpop.permute.xlu1 %1565  ;;  %v1487_v38 = vrot.slane %v1486_v4, 4 }
 0x6d1   : > { %v1482_v49 = vrot.slane %v1481_v50, 2  ;;  %v1475_v10 = vrot.slane %v1474_v11, 2  ;;  %5144 = vmatmul.mubr.msk.bf16.vlgmr.msra.gmra.mrb[12].mxu1 %vm517_vm3, %v1566_v27  ;;  %v1508_v18 = vsel %vm1187_vm5, %v1457_v14, %v1450_v0 }
 0x6d2   : > { %v1464_v23 = vadd.f32 %v1463_v15, %v1462_v32  ;;  %v1495_v24 = vadd.f32 %v1494_v25, %v1493_v33  ;;  %5160 = vmatpush3.bf16.msra.mxu1 %v6097_v44  ;;  %5175 = vmatprep.mubr.msk.bf16.mxu1 %vm5643_vm0, %v7433_v1  ;;  %v1488_v42 = vadd.f32 %v1487_v38, %v1486_v4 }
 0x6d3   : > { %v1483_v21 = vadd.f32 %v1482_v49, %v1481_v50  ;;  %v1476_v47 = vadd.f32 %v1475_v10, %v1474_v11  ;;  %5161 = vmatprep.subr.bf16.mxu1 %v7433_v1  ;;  %v1471_v16 = vadd.f32 %v1470_v55, %v1469_v9 }
 0x6d4   : > { %v1496_v48 = vrot.slane %v1495_v24, 2  ;;  %v1489_v22 = vrot.slane %v1488_v42, 2  ;;  %v1509_v37 = vsel %vm1189_vm6, %v1464_v23, %v1508_v18 }
 0x6d5   : > { %v1484_v54 = vrot.slane %v1483_v21, 1  ;;  %v1477_v31 = vrot.slane %v1476_v47, 1  ;;  %v1510_v20 = vsel %vm1191_vm7, %v1471_v16, %v1509_v37 }
 0x6d6   : > { %v1497_v41 = vadd.f32 %v1496_v48, %v1495_v24  ;;  %5162 = vmatpush3.bf16.msra.mxu1 %v6103_v45  ;;  %v1490_v43 = vadd.f32 %v1489_v22, %v1488_v42 }
 0x6d7   : > { %v1478_v34 = vadd.f32 %v1477_v31, %v1476_v47  ;;  %5163 = vmatprep.subr.bf16.mxu1 %v7433_v1  ;;  %v1485_v12 = vadd.f32 %v1484_v54, %v1483_v21 }
 0x6d8   : > { %v1498_v26 = vrot.slane %v1497_v41, 1  ;;  %v1491_v19 = vrot.slane %v1490_v43, 1 }
 0x6d9   : > { %v1511_v0 = vsel %vm1193_vm8, %v1478_v34, %v1510_v20 }
 0x6da   : > { %v1499_v9 = vadd.f32 %v1498_v26, %v1497_v41  ;;  %5164 = vmatpush3.bf16.msra.mxu1 %v6110_v62  ;;  %v1492_v32 = vadd.f32 %v1491_v19, %v1490_v43  ;;  %v1512_v50 = vsel %vm1195_vm9, %v1485_v12, %v1511_v0 }
 0x6db   : > { %5165 = vmatprep.subr.bf16.mxu1 %v7433_v1 }
 0x6dc   : > { %v1513_v11 = vsel %vm1197_vm10, %v1492_v32, %v1512_v50 }
 0x6dd   : > { %v1514_v33 = vsel %vm1199_vm11, %v1499_v9, %v1513_v11 }
 0x6de   : > { %5166 = vmatpush3.bf16.msra.mxu1 %v6117_v46  ;;  %1515 = vrot.lane.b32.xlu0 %v1514_v33, %s5645_s27 }
 0x6df   : > { %5167 = vmatprep.subr.bf16.mxu1 %v7433_v1 }
 0x6e2   : > { %5168 = vmatpush3.bf16.msra.mxu1 %v6124_v51 }
 0x6e3   : > { %5169 = vmatprep.subr.bf16.mxu1 %v7433_v1 }
 0x6e6   : > { %5170 = vmatpush3.bf16.msra.mxu1 %v6131_v13 }
 0x6e7   : > { %5171 = vmatprep.subr.bf16.mxu1 %v7433_v1 }
 0x6ea   : > { %5172 = vmatpush3.bf16.msra.mxu1 %v6138_v17 }
 0x6eb   : > { %5173 = vmatprep.subr.bf16.mxu1 %v7433_v1 }
 0x6ee   : > { %5174 = vmatpush3.bf16.msra.mxu1 %v6148_v35 }
 0x6ef   : > { %5209 = vmatprep.subr.bf16.mxu1 %v7433_v1 }
 0x750   : > { %v1516_v4 = vpop.permute.xlu0 %1515 }
 0x751   : > { %v1518_v14 = vsel %vm603_vm1, %v6195_v3, %v1516_v4  ;;  %v7434_v4 = vld [vmem:[#allocation3_spill] sm:$0xff] }
 0x752   : > { %v1519_v55 = vpack.c.bf16 %v1518_v14, %v1518_v14 }
 0x754   : > { %5136 = vmatmul.mubr.msk.bf16.vlgmr.msra.gmra.mrb[12].mxu0 %vm630_vm2, %v1519_v55 }
 0x755   : > { %5148 = vmatpush3.bf16.msra.mxu0 %v5885_v5  ;;  %5155 = vmatprep.mubr.msk.bf16.mxu0 %vm5643_vm0, %v7433_v1 }
 0x756   : > { %5149 = vmatprep.subr.bf16.mxu0 %v7433_v1 }
 0x759   : > { %5150 = vmatpush3.bf16.msra.mxu0 %v5891_v6 }
 0x75a   : > { %5151 = vmatprep.subr.bf16.mxu0 %v7433_v1 }
 0x75d   : > { %5152 = vmatpush3.bf16.msra.mxu0 %v5899_v7 }
 0x75e   : > { %5153 = vmatprep.subr.bf16.mxu0 %v7433_v1 }
 0x761   : > { %5154 = vmatpush3.bf16.msra.mxu0 %v5908_v8 }
 0x762   : > { %5179 = vmatprep.subr.bf16.mxu0 %v7433_v1 }
 0x7a4   : > { %v1604_v3 = vpop.f32.mrb[12].mxu1 }
 0x7a5   : > { %v1605_v5 = vadd.f32 %v5859_v30, %v1604_v3  ;;  %v5145_v15 = vpop.f32.mrb[13].mxu1 }
 0x7a6   : > { %v1607_v25 = vpop.f32.mrb[14].mxu1 }
 0x7a7   : > { %1618 = vrot.lane.b32.xlu1 %v1605_v5, %s5646_s17  ;;  %v5146_v27 = vpop.f32.mrb[15].mxu1 }
 0x819   : > { %v1619_v42 = vpop.permute.xlu1 %1618 }
 0x827   : > { %v1557_v49 = vpop.f32.mrb[12].mxu0 }
 0x828   : > { %v1558_v6 = vadd.f32 %v5866_v36, %v1557_v49  ;;  %v5137_v10 = vpop.f32.mrb[13].mxu0  ;;  %v7436_v49 = vld [vmem:[#allocation4_spill] sm:$0xff] }
 0x829   : > { %v1560_v38 = vpop.f32.mrb[14].mxu0 }
 0x82a   : > { %v1610_v7 = vadd.f32 %v1605_v5, %v1558_v6  ;;  %v5138_v23 = vpop.f32.mrb[15].mxu0  ;;  %v7435_v5 = vld [vmem:[#allocation7_spill] sm:$0xff] }
 0x82c   : > { %v4906_v24 = vmul.f32 -1.442695, %v1610_v7  ;;  %v7437_v7 = vld [vmem:[#allocation8_spill] sm:$0xff] }
 0x82e   : > { %5438 = vpow2.f32 %v4906_v24 }
 0x838   : > { %v5439_v8 = vpop.eup %5438 }
 0x839   : > { %v1614_v21 = vadd.f32 1.0, %v5439_v8  ;;  %v7438_v8 = vld [vmem:[#allocation5_spill] sm:$0xff] }
 0x83b   : > { %5440 = vrcp.f32 %v1614_v21 }
 0x845   : > { %v5441_v47 = vpop.eup %5440 }
 0x846   : > { %v1621_v30 = vmul.f32 %v5441_v47, %v1619_v42  ;;  %v1628_v36 = vsub.f32 1.0, %v5441_v47  ;;  %v1634_v31 = vmul.f32 %v5441_v47, %v5918_v29  ;;  %v7439_v42 = vld [vmem:[#allocation9_spill] sm:$0xff] }
 0x848   : > { %1623 = vrot.lane.b32.xlu0 %v1621_v30, %s5646_s17 }
 0x8ba   : > { %v1624_v18 = vpop.permute.xlu0 %1623 }
 0x8bb   : > { %v1626_v16 = vadd.f32 %v1624_v18, %v1558_v6  ;;  %v7440_v18 = vld [vmem:[#allocation6_spill] sm:$0xff] }
 0x8bd   : > { %5442 = vtanh.f32 %v1626_v16 }
 0x8c7   : > { %v5443_v48 = vpop.eup %5442 }
 0x8c8   : > { %1630 = vrot.lane.b32.xlu1 %v5443_v48, %s5647_s14 }
 0x8cc   : > { %1640 = vrot.lane.b32.xlu1 %v1514_v33, %s5648_s15 }
 0x93a   : > { %v1631_v54 = vpop.permute.xlu1 %1630 }
 0x93b   : > { %v1633_v22 = vmul.f32 %v1631_v54, %v1628_v36 }
 0x93d   : > { %v6260_v37 = vadd.f32 %v1634_v31, %v1633_v22  ;;  %v6302_v22 = vld [vmem:[%s7379_s4] sm:$0xff]  }
 0x93e   : > { %v1641_v48 = vpop.permute.xlu1 %1640 }
 0x93f   : > { %1637 = vrot.lane.b32.xlu0 %v6260_v37, %s5647_s14  ;;  %v1766_v41 = vrot.slane %v6260_v37, %v5916_v28  ;;  %v1759_v34 = vcombine.high %v6260_v37, %v6260_v37 }
 0x941   : > { %v1782_v43 = vrot.slane %v1766_v41, %v5916_v28  ;;  %v1774_v12 = vcombine.high %v1766_v41, %v1766_v41  ;;  %v1773_v26 = vrot.slane %v1759_v34, %v5916_v28 }
 0x943   : > { %v1811_v20 = vrot.slane %v1782_v43, %v5932_v39  ;;  %v1796_v29 = vrot.slane %v1774_v12, %v5916_v28  ;;  %v1804_v19 = vcombine.high %v1782_v43, %v1782_v43  ;;  %v1789_v0 = vrot.slane %v1773_v26, %v5916_v28  ;;  %v6312_v43 = vld [vmem:[%s7379_s4 + $0x8] sm:$0xff]  }
 0x944   : > { %v1775_v9 = vcombine.high %v1773_v26, %v1773_v26 }
 0x945   : > { %v1848_v32 = vmul.f32 %v1811_v20, %v5961_v61  ;;  %v1815_v50 = vrot.slane %v1796_v29, %v5932_v39  ;;  %v1819_v11 = vrot.slane %v1804_v19, %v5932_v39  ;;  %v1806_v33 = vcombine.high %v1796_v29, %v1796_v29  ;;  %v6321_v19 = vld [vmem:[%s7379_s4 + $0x10] sm:$0xff]  }
 0x946   : > { %v1803_v3 = vrot.slane %v1775_v9, %v5916_v28  ;;  %v1827_v25 = vrot.slane %v1789_v0, %v5932_v39  ;;  %v1805_v27 = vcombine.high %v1789_v0, %v1789_v0 }
 0x947   : > { %1864 = vrot.lane.b32.xlu0 %v1848_v32, %s5647_s14  ;;  %v1849_v14 = vmul.f32 %v1815_v50, %v7434_v4  ;;  %v1823_v55 = vrot.slane %v1806_v33, %v5932_v39  ;;  %v1850_v15 = vmul.f32 %v1819_v11, %v7435_v5 }
 0x948   : > { %v1831_v10 = vrot.slane %v1803_v3, %v5932_v39  ;;  %v1807_v38 = vcombine.high %v1803_v3, %v1803_v3  ;;  %v1852_v23 = vmul.f32 %v1827_v25, %v7437_v7  ;;  %v1835_v24 = vrot.slane %v1805_v27, %v5932_v39 }
 0x949   : > { %1866 = vrot.lane.b32.xlu1 %v1849_v14, %s5647_s14  ;;  %v1851_v6 = vmul.f32 %v1823_v55, %v7436_v49 }
 0x94a   : > { %v1853_v21 = vmul.f32 %v1831_v10, %v7438_v8  ;;  %v1839_v47 = vrot.slane %v1807_v38, %v5932_v39  ;;  %v1854_v30 = vmul.f32 %v1835_v24, %v7439_v42 }
 0x94b   : > { %1868 = vrot.lane.b32.xlu0 %v1850_v15, %s5647_s14 }
 0x94c   : > { %v1855_v16 = vmul.f32 %v1839_v47, %v7440_v18 }
 0x94d   : > { %1870 = vrot.lane.b32.xlu1 %v1851_v6, %s5647_s14 }
 0x94f   : > { %1872 = vrot.lane.b32.xlu0 %v1852_v23, %s5647_s14 }
 0x951   : > { %1874 = vrot.lane.b32.xlu1 %v1853_v21, %s5647_s14 }
 0x953   : > { %1876 = vrot.lane.b32.xlu0 %v1854_v30, %s5647_s14 }
 0x955   : > { %1878 = vrot.lane.b32.xlu1 %v1855_v16, %s5647_s14 }
 0x9b1   : > { %v1638_v36 = vpop.permute.xlu0 %1637 }
 0x9b2   : > { %v1643_v54 = vsel %vm517_vm3, %v1638_v36, %v1641_v48 }
 0x9b3   : > { %v1644_v31 = vpack.c.bf16 %v1643_v54, %v1643_v54 }
 0x9b5   : > { %5156 = vmatmul.mubr.msk.bf16.vlgmr.msra.gmra.mrb[16].mxu0 %vm800_vm4, %v1644_v31 }
 0x9b6   : > { %5180 = vmatpush3.bf16.msra.mxu0 %v6302_v22  ;;  %5185 = vmatprep.mubr.msk.bf16.mxu0 %vm5643_vm0, %v7433_v1 }
 0x9b7   : > { %5181 = vmatprep.subr.bf16.mxu0 %v7433_v1 }
 0x9b9   : > { %v1865_v41 = vpop.permute.xlu0 %1864 }
 0x9ba   : > { %v1888_v34 = vsel %vm517_vm3, %v1865_v41, 0.0  ;;  %5182 = vmatpush3.bf16.msra.mxu0 %v6312_v43 }
 0x9bb   : > { %1889 = vadd.xlane.f32.xlu0 %v1888_v34  ;;  %v1867_v12 = vpop.permute.xlu1 %1866  ;;  %5183 = vmatprep.subr.bf16.mxu0 %v7433_v1 }
 0x9bc   : > { %v1891_v26 = vsel %vm517_vm3, %v1867_v12, 0.0 }
 0x9bd   : > { %v1869_v20 = vpop.permute.xlu0 %1868  ;;  %1892 = vadd.xlane.f32.xlu1 %v1891_v26 }
 0x9be   : > { %v1894_v29 = vsel %vm517_vm3, %v1869_v20, 0.0  ;;  %5184 = vmatpush3.bf16.msra.mxu0 %v6321_v19 }
 0x9bf   : > { %1895 = vadd.xlane.f32.xlu0 %v1894_v29  ;;  %v1871_v0 = vpop.permute.xlu1 %1870  ;;  %5189 = vmatprep.subr.bf16.mxu0 %v7433_v1 }
 0x9c0   : > { %v1897_v50 = vsel %vm517_vm3, %v1871_v0, 0.0 }
 0x9c1   : > { %v1873_v9 = vpop.permute.xlu0 %1872 }
 0x9c2   : > { %v1900_v32 = vsel %vm517_vm3, %v1873_v9, 0.0 }
 0x9c3   : > { %1901 = vadd.xlane.f32.xlu1 %v1900_v32  ;;  %1898 = vadd.xlane.f32.xlu0 %v1897_v50  ;;  %v1875_v11 = vpop.permute.xlu1 %1874 }
 0x9c4   : > { %v1903_v55 = vsel %vm517_vm3, %v1875_v11, 0.0  ;;  %v7441_v11 = vld [vmem:[#allocation10_spill] sm:$0xff] }
 0x9c5   : > { %v1877_v33 = vpop.permute.xlu0 %1876 }
 0x9c6   : > { %v1906_v14 = vsel %vm517_vm3, %v1877_v33, 0.0 }
 0x9c7   : > { %1907 = vadd.xlane.f32.xlu1 %v1906_v14  ;;  %1904 = vadd.xlane.f32.xlu0 %v1903_v55  ;;  %v1879_v3 = vpop.permute.xlu1 %1878 }
 0x9c8   : > { %v1909_v15 = vsel %vm517_vm3, %v1879_v3, 0.0 }
 0x9cb   : > { %1910 = vadd.xlane.f32.xlu0 %v1909_v15 }
 0xa48   : > { %v1890_v25 = vpop.xlane.xlu0 %1889 }
 0xa49   : > { %v1923_v38 = vrot.slane %v1890_v25, %v6012_v60 }
 0xa4a   : > { %v1893_v27 = vpop.xlane.xlu1 %1892 }
 0xa4b   : > { %v1927_v6 = vrot.slane %v1893_v27, %v6012_v60 }
 0xa4c   : > { %v6331_v10 = vpop.xlane.xlu0 %1895 }
 0xa4d   : > { %v1931_v23 = vrot.slane %v6331_v10, %v6012_v60  ;;  %v1952_v24 = vsel %vm1187_vm5, %v1927_v6, %v1923_v38 }
 0xa4f   : > { %v1953_v16 = vsel %vm1189_vm6, %v1931_v23, %v1952_v24 }
 0xa50   : > { %v1899_v21 = vpop.xlane.xlu0 %1898  ;;  %v6337_v47 = vpop.xlane.xlu1 %1901 }
 0xa51   : > { %v1935_v30 = vrot.slane %v1899_v21, %v6012_v60  ;;  %v1939_v48 = vrot.slane %v6337_v47, %v6012_v60 }
 0xa53   : > { %v1954_v36 = vsel %vm1191_vm7, %v1935_v30, %v1953_v16 }
 0xa54   : > { %v1905_v54 = vpop.xlane.xlu0 %1904  ;;  %v1908_v31 = vpop.xlane.xlu1 %1907  ;;  %v1955_v34 = vsel %vm1193_vm8, %v1939_v48, %v1954_v36 }
 0xa55   : > { %v1943_v41 = vrot.slane %v1905_v54, %v6012_v60  ;;  %v1947_v12 = vrot.slane %v1908_v31, %v6012_v60 }
 0xa57   : > { %v1956_v26 = vsel %vm1195_vm9, %v1943_v41, %v1955_v34 }
 0xa58   : > { %v1911_v20 = vpop.xlane.xlu0 %1910  ;;  %v1957_v0 = vsel %vm1197_vm10, %v1947_v12, %v1956_v26 }
 0xa59   : > { %v1951_v29 = vrot.slane %v1911_v20, %v6012_v60 }
 0xa5b   : > { %v1958_v9 = vsel %vm1199_vm11, %v1951_v29, %v1957_v0 }
 0xa5c   : > { %v1960_v32 = vsel %vm1202_vm12, %v1958_v9, -inf }
 0xa5d   : > { %1961 = vmax.xlane.f32.xlu0 %v1960_v32 }
 0xa88   : > { %v1682_v50 = vpop.f32.mrb[16].mxu0 }
 0xa89   : > { %v6353_v33 = vadd.f32 %v7441_v11, %v1682_v50  ;;  %v5157_v14 = vpop.f32.mrb[17].mxu0 }
 0xa8a   : > { %v1685_v55 = vpop.f32.mrb[18].mxu0 }
 0xa8b   : > { %7442 = vst [vmem:[#allocation3_spill] sm:$0xff] %v6353_v33  ;;  %v5158_v3 = vpop.f32.mrb[19].mxu0  ;;  %1688 = vmax.xlane.f32.xlu1 %v6353_v33 }
 0xaea   : > { %v1962_v15 = vpop.xlane.xlu0 %1961 }
 0xaeb   : > { %v1967_v6 = vrot.slane %v1962_v15, %v5932_v39  ;;  %v1979_v38 = vrot.slane %v1962_v15, %v6048_v58  ;;  %v1987_v23 = vrot.slane %v1962_v15, %v6058_v40  ;;  %v1995_v48 = vrot.slane %v1962_v15, %v6066_v63 }
 0xaec   : > { %v1975_v50 = vrot.slane %v1962_v15, %v6045_v57  ;;  %v1983_v55 = vrot.slane %v1962_v15, %v6054_v2 }
 0xaed   : > { %v2004_v24 = vsub.f32 %v1890_v25, %v1967_v6  ;;  %v2007_v30 = vsub.f32 %v1899_v21, %v1979_v38  ;;  %v2009_v41 = vsub.f32 %v1905_v54, %v1987_v23  ;;  %v2011_v12 = vsub.f32 %v1911_v20, %v1995_v48 }
 0xaee   : > { %v1971_v20 = vrot.slane %v1962_v15, %v6042_v56  ;;  %v2006_v6 = vsub.f32 %v6331_v10, %v1975_v50  ;;  %v1991_v38 = vrot.slane %v1962_v15, %v6062_v53 }
 0xaef   : > { %v2012_v16 = vmul.f32 1.442695, %v2004_v24  ;;  %v2018_v36 = vmul.f32 1.442695, %v2007_v30  ;;  %v2022_v34 = vmul.f32 1.442695, %v2009_v41  ;;  %v2008_v24 = vsub.f32 %v6337_v47, %v1983_v55 }
 0xaf0   : > { %v2026_v26 = vmul.f32 1.442695, %v2011_v12  ;;  %v2005_v14 = vsub.f32 %v1893_v27, %v1971_v20  ;;  %v2016_v23 = vmul.f32 1.442695, %v2006_v6 }
 0xaf1   : > { %5444 = vpow2.f32 %v2012_v16  ;;  %v2020_v30 = vmul.f32 1.442695, %v2008_v24  ;;  %v2010_v16 = vsub.f32 %v1908_v31, %v1991_v38 }
 0xaf2   : > { %5446 = vpow2.f32 %v2018_v36  ;;  %v2014_v3 = vmul.f32 1.442695, %v2005_v14 }
 0xaf3   : > { %5448 = vpow2.f32 %v2022_v34  ;;  %v2024_v48 = vmul.f32 1.442695, %v2010_v16 }
 0xaf4   : > { %5450 = vpow2.f32 %v2026_v26 }
 0xaf5   : > { %5452 = vpow2.f32 %v2014_v3 }
 0xaf6   : > { %5454 = vpow2.f32 %v2016_v23 }
 0xaf7   : > { %5456 = vpow2.f32 %v2020_v30 }
 0xaf8   : > { %5458 = vpow2.f32 %v2024_v48 }
 0xafb   : > { %v6360_v29 = vpop.eup %5444 }
 0xafc   : > { %2037 = vperm.xlu0 %5393, %v6360_v29   ;;  %v6363_v0 = vpop.eup %5446 }
 0xafd   : > { %v6366_v25 = vpop.eup %5448 }
 0xafe   : > { %v6369_v21 = vpop.eup %5450 }
 0xaff   : > { %v6383_v36 = vpop.eup %5452 }
 0xb00   : > { %2046 = vperm.xlu0 %5393, %v6363_v0   ;;  %v6386_v27 = vpop.eup %5454 }
 0xb01   : > { %v6389_v10 = vpop.eup %5456 }
 0xb02   : > { %v6392_v15 = vpop.eup %5458 }
 0xb04   : > { %2052 = vperm.xlu0 %5393, %v6366_v25  }
 0xb08   : > { %2058 = vperm.xlu0 %5393, %v6369_v21  }
 0xb18   : > { %v6372_v54 = vpop.xlane.xlu1 %1688 }
 0xb19   : > { %7443 = vst [vmem:[#allocation7_spill] sm:$0xff] %v6372_v54  ;;  %vm1699_vm14 = vcmp.eq.f32.partialorder %v6353_v33, %v6372_v54 }
 0xb1a   : > { %v1700_v9 = vsel %vm1699_vm14, %v6008_v59, 128 }
 0xb1b   : > { %v1702_v32 = vshra.s32 %v1700_v9, 16  ;;  %v1701_v47 = vand.u32 65535, %v1700_v9 }
 0xb1d   : > { %v1704_v11 = vcvt.s32.f32 %v1702_v32  ;;  %v1703_v34 = vcvt.s32.f32 %v1701_v47 }
 0xb1f   : > { %1705 = vmin.xlane.f32.xlu1 %v1704_v11 }
 0xb30   : > { %2040 = vperm.xlu1 %5394, %v6383_v36  }
 0xb34   : > { %2043 = vperm.xlu1 %5394, %v6386_v27  }
 0xb38   : > { %2049 = vperm.xlu1 %5394, %v6389_v10  }
 0xb3c   : > { %2055 = vperm.xlu1 %5394, %v6392_v15  }
 0xb7b   : > { %v2038_v31 = vpop.permute.xlu0 %2037 }
 0xb7c   : > { %v2063_v50 = vrot.slane %v2038_v31, %v6012_v60 }
 0xb7f   : > { %v2047_v26 = vpop.permute.xlu0 %2046 }
 0xb80   : > { %v2075_v38 = vrot.slane %v2047_v26, %v6012_v60 }
 0xb83   : > { %v2053_v55 = vpop.permute.xlu0 %2052 }
 0xb84   : > { %v2083_v48 = vrot.slane %v2053_v55, %v6012_v60 }
 0xb87   : > { %v2059_v30 = vpop.permute.xlu0 %2058 }
 0xbac   : > { %v1706_v41 = vpop.xlane.xlu1 %1705 }
 0xbad   : > { %vm1707_vm15 = vcmp.eq.f32.partialorder %v1704_v11, %v1706_v41 }
 0xbae   : > { %v1708_v12 = vsel %vm1707_vm15, %v1703_v34, inf  ;;  %v2091_v34 = vrot.slane %v2059_v30, %v6012_v60  ;;  %v2320_v30 = vpack.c.bf16 %v6260_v37, %v6260_v37 }
 0xbaf   : > { %1709 = vmin.xlane.f32.xlu1 %v1708_v12 }
 0xbb0   : > { %v2041_v20 = vpop.permute.xlu1 %2040 }
 0xbb1   : > { %v2067_v32 = vrot.slane %v2041_v20, %v6012_v60 }
 0xbb3   : > { %v2092_v6 = vsel %vm1187_vm5, %v2067_v32, %v2063_v50  ;;  %v1712_v50 = vcvt.f32.s32 %v1706_v41 }
 0xbb4   : > { %v2044_v14 = vpop.permute.xlu1 %2043 }
 0xbb5   : > { %v2071_v3 = vrot.slane %v2044_v14, %v6012_v60 }
 0xbb7   : > { %v2093_v9 = vsel %vm1189_vm6, %v2071_v3, %v2092_v6  ;;  %v1713_v3 = vshll.u32 %v1712_v50, 16 }
 0xbb8   : > { %v2050_v23 = vpop.permute.xlu1 %2049  ;;  %v2094_v24 = vsel %vm1191_vm7, %v2075_v38, %v2093_v9 }
 0xbb9   : > { %v2079_v11 = vrot.slane %v2050_v23, %v6012_v60 }
 0xbbb   : > { %v2095_v16 = vsel %vm1193_vm8, %v2079_v11, %v2094_v24 }
 0xbbc   : > { %v2056_v47 = vpop.permute.xlu1 %2055  ;;  %v2096_v12 = vsel %vm1195_vm9, %v2083_v48, %v2095_v16  ;;  %v6451_v16 = vld [vmem:[%s5815_s18] sm:$0xff] }
 0xbbd   : > { %v2087_v31 = vrot.slane %v2056_v47, %v6012_v60  ;;  %v6455_v47 = vld [vmem:[%s5815_s18 + $0x8] sm:$0xff] }
 0xbbf   : > { %v2097_v20 = vsel %vm1197_vm10, %v2087_v31, %v2096_v12 }
 0xbc0   : > { %v2098_v26 = vsel %vm1199_vm11, %v2091_v34, %v2097_v20 }
 0xbc1   : > { %v2100_v32 = vsel %vm1202_vm12, %v2098_v26, 0.0 }
 0xbc2   : > { %2101 = vadd.xlane.f32.xlu0 %v2100_v32  ;;  %v6461_v32 = vld [vmem:[%s5815_s18 + $0x18] sm:$0xff] }
 0xc3c   : > { %v1710_v14 = vpop.xlane.xlu1 %1709 }
 0xc3d   : > { %v1711_v6 = vcvt.f32.s32 %v1710_v14  ;;  %v6465_v14 = vld [vmem:[%s5815_s18 + $0x10] sm:$0xff] }
 0xc3f   : > { %v1714_v9 = vadd.s32 %v1713_v3, %v1711_v6 }
 0xc41   : > { %vm1715_vm13 = vcmp.eq.s32.totalorder %v6008_v59, %v1714_v9 }
 0xc42   : > { %vm4910_vm14 = vmpackc.low %vm1715_vm13, %vm1715_vm13 }
 0xc43   : > { %5176 = vmatmul.mubr.msk.bf16.vlgmr.msra.gmra.mrb[16].mxu1 %vm4910_vm14, %v7407_v52 }
 0xc44   : > { %5210 = vmatpush3.bf16.msra.mxu1 %v6097_v44  ;;  %5225 = vmatprep.mubr.msk.bf16.mxu1 %vm5643_vm0, %v7433_v1 }
 0xc45   : > { %5211 = vmatprep.subr.bf16.mxu1 %v7433_v1 }
 0xc48   : > { %5212 = vmatpush3.bf16.msra.mxu1 %v6103_v45 }
 0xc49   : > { %5213 = vmatprep.subr.bf16.mxu1 %v7433_v1 }
 0xc4c   : > { %5214 = vmatpush3.bf16.msra.mxu1 %v6110_v62 }
 0xc4d   : > { %5215 = vmatprep.subr.bf16.mxu1 %v7433_v1 }
 0xc4f   : > { %v2102_v41 = vpop.xlane.xlu0 %2101 }
 0xc50   : > { %5460 = vrcp.f32 %v2102_v41  ;;  %5216 = vmatpush3.bf16.msra.mxu1 %v6117_v46 }
 0xc51   : > { %5217 = vmatprep.subr.bf16.mxu1 %v7433_v1 }
 0xc54   : > { %5218 = vmatpush3.bf16.msra.mxu1 %v6124_v51 }
 0xc55   : > { %5219 = vmatprep.subr.bf16.mxu1 %v7433_v1 }
 0xc58   : > { %5220 = vmatpush3.bf16.msra.mxu1 %v6131_v13 }
 0xc59   : > { %5221 = vmatprep.subr.bf16.mxu1 %v7433_v1 }
 0xc5a   : > { %v5461_v44 = vpop.eup %5460 }
 0xc5b   : > { %v2108_v45 = vrot.slane %v5461_v44, %v5932_v39  ;;  %v2112_v62 = vrot.slane %v5461_v44, %v6042_v56  ;;  %v2120_v38 = vrot.slane %v5461_v44, %v6048_v58  ;;  %v2116_v51 = vrot.slane %v5461_v44, %v6045_v57 }
 0xc5c   : > { %5222 = vmatpush3.bf16.msra.mxu1 %v6138_v17  ;;  %v2128_v17 = vrot.slane %v5461_v44, %v6058_v40 }
 0xc5d   : > { %v2145_v55 = vmul.f32 %v6360_v29, %v2108_v45  ;;  %v2146_v46 = vmul.f32 %v6383_v36, %v2112_v62  ;;  %5223 = vmatprep.subr.bf16.mxu1 %v7433_v1  ;;  %v2148_v13 = vmul.f32 %v6363_v0, %v2120_v38  ;;  %v2147_v23 = vmul.f32 %v6386_v27, %v2116_v51 }
 0xc5e   : > { %v2124_v29 = vrot.slane %v5461_v44, %v6054_v2  ;;  %v2150_v36 = vmul.f32 %v6366_v25, %v2128_v17  ;;  %v2132_v0 = vrot.slane %v5461_v44, %v6062_v53  ;;  %v6475_v17 = vld [vmem:[%s5815_s18 + $0x20] sm:$0xff] }
 0xc5f   : > { %2155 = vperm.xlu0 %5393, %v2145_v55   ;;  %2160 = vperm.xlu1 %5394, %v2146_v46  }
 0xc60   : > { %5224 = vmatpush3.bf16.msra.mxu1 %v6148_v35  ;;  %v2149_v11 = vmul.f32 %v6389_v10, %v2124_v29  ;;  %v2136_v35 = vrot.slane %v5461_v44, %v6066_v63  ;;  %v2151_v24 = vmul.f32 %v6392_v15, %v2132_v0 }
 0xc61   : > { %5259 = vmatprep.subr.bf16.mxu1 %v7433_v1 }
 0xc62   : > { %v2152_v27 = vmul.f32 %v6369_v21, %v2136_v35 }
 0xc63   : > { %2170 = vperm.xlu0 %5393, %v2148_v13   ;;  %2165 = vperm.xlu1 %5394, %v2147_v23   ;;  %v6471_v13 = vld [vmem:[%s5815_s18 + $0x28] sm:$0xff] }
 0xc67   : > { %2180 = vperm.xlu0 %5393, %v2150_v36   ;;  %2175 = vperm.xlu1 %5394, %v2149_v11  }
 0xc6b   : > { %2190 = vperm.xlu0 %5393, %v2152_v27   ;;  %2185 = vperm.xlu1 %5394, %v2151_v24  }
 0xc6f   : > { %2322 = vrot.lane.b32.xlu0 %v2320_v30, %s5647_s14 }
 0xcde   : > { %v2156_v25 = vpop.permute.xlu0 %2155  ;;  %v2161_v10 = vpop.permute.xlu1 %2160 }
 0xcdf   : > { %v2193_v48 = vmul.f32 %v6451_v16, %v2156_v25  ;;  %v2194_v21 = vmul.f32 %v6455_v47, %v2161_v10 }
 0xce1   : > { %v2201_v15 = vsel %vm517_vm3, %v2193_v48, 0.0  ;;  %v2208_v31 = vsel %vm517_vm3, %v2194_v21, 0.0 }
 0xce2   : > { %v2202_v34 = vrot.slane %v2201_v15, 4  ;;  %v2209_v12 = vrot.slane %v2208_v31, 4  ;;  %v2171_v20 = vpop.permute.xlu0 %2170  ;;  %v2166_v26 = vpop.permute.xlu1 %2165 }
 0xce3   : > { %v2196_v50 = vmul.f32 %v6461_v32, %v2171_v20  ;;  %v2195_v3 = vmul.f32 %v6465_v14, %v2166_v26  ;;  %v6485_v26 = vld [vmem:[%s5815_s18 + $0x30] sm:$0xff] }
 0xce4   : > { %v2203_v6 = vadd.f32 %v2202_v34, %v2201_v15  ;;  %v2210_v9 = vadd.f32 %v2209_v12, %v2208_v31  ;;  %v6481_v12 = vld [vmem:[%s5815_s18 + $0x38] sm:$0xff] }
 0xce5   : > { %v2222_v41 = vsel %vm517_vm3, %v2196_v50, 0.0  ;;  %v2215_v44 = vsel %vm517_vm3, %v2195_v3, 0.0 }
 0xce6   : > { %v2204_v45 = vrot.slane %v2203_v6, 2  ;;  %v2211_v62 = vrot.slane %v2210_v9, 2  ;;  %v2223_v55 = vrot.slane %v2222_v41, 4  ;;  %v2216_v46 = vrot.slane %v2215_v44, 4  ;;  %v2181_v38 = vpop.permute.xlu0 %2180  ;;  %v2176_v51 = vpop.permute.xlu1 %2175 }
 0xce7   : > { %v2198_v23 = vmul.f32 %v6471_v13, %v2181_v38  ;;  %v2197_v29 = vmul.f32 %v6475_v17, %v2176_v51 }
 0xce8   : > { %v2205_v36 = vadd.f32 %v2204_v45, %v2203_v6  ;;  %v2212_v11 = vadd.f32 %v2211_v62, %v2210_v9  ;;  %v2224_v35 = vadd.f32 %v2223_v55, %v2222_v41  ;;  %v2217_v0 = vadd.f32 %v2216_v46, %v2215_v44 }
 0xce9   : > { %v2236_v27 = vsel %vm517_vm3, %v2198_v23, 0.0  ;;  %v2229_v24 = vsel %vm517_vm3, %v2197_v29, 0.0 }
 0xcea   : > { %v2206_v30 = vrot.slane %v2205_v36, 1  ;;  %v2213_v25 = vrot.slane %v2212_v11, 1  ;;  %v2225_v10 = vrot.slane %v2224_v35, 2  ;;  %v2218_v48 = vrot.slane %v2217_v0, 2  ;;  %v2191_v21 = vpop.permute.xlu0 %2190  ;;  %v2186_v15 = vpop.permute.xlu1 %2185 }
 0xceb   : > { %v2237_v31 = vrot.slane %v2236_v27, 4  ;;  %v2230_v34 = vrot.slane %v2229_v24, 4  ;;  %v2200_v20 = vmul.f32 %v6481_v12, %v2191_v21  ;;  %v2199_v50 = vmul.f32 %v6485_v26, %v2186_v15 }
 0xcec   : > { %v2207_v3 = vadd.f32 %v2206_v30, %v2205_v36  ;;  %v2226_v6 = vadd.f32 %v2225_v10, %v2224_v35  ;;  %v2219_v9 = vadd.f32 %v2218_v48, %v2217_v0  ;;  %v2214_v55 = vadd.f32 %v2213_v25, %v2212_v11 }
 0xced   : > { %v2238_v41 = vadd.f32 %v2237_v31, %v2236_v27  ;;  %v2231_v44 = vadd.f32 %v2230_v34, %v2229_v24  ;;  %v2250_v45 = vsel %vm517_vm3, %v2200_v20, 0.0  ;;  %v2243_v62 = vsel %vm517_vm3, %v2199_v50, 0.0 }
 0xcee   : > { %v2227_v46 = vrot.slane %v2226_v6, 1  ;;  %v2220_v38 = vrot.slane %v2219_v9, 1  ;;  %v2251_v51 = vrot.slane %v2250_v45, 4  ;;  %v2244_v21 = vrot.slane %v2243_v62, 4 }
 0xcef   : > { %v2239_v23 = vrot.slane %v2238_v41, 2  ;;  %v2232_v29 = vrot.slane %v2231_v44, 2  ;;  %v2265_v35 = vsel %vm1187_vm5, %v2214_v55, %v2207_v3 }
 0xcf0   : > { %v2221_v52 = vadd.f32 %v2220_v38, %v2219_v9  ;;  %v2252_v33 = vadd.f32 %v2251_v51, %v2250_v45  ;;  %v2245_v36 = vadd.f32 %v2244_v21, %v2243_v62  ;;  %v2228_v0 = vadd.f32 %v2227_v46, %v2226_v6  ;;  %v2323_v21 = vpop.permute.xlu0 %2322 }
 0xcf1   : > { %v2240_v54 = vadd.f32 %v2239_v23, %v2238_v41  ;;  %v2233_v15 = vadd.f32 %v2232_v29, %v2231_v44  ;;  %v6503_v23 = vld [vmem:[%s7380_s5] sm:$0xff]   ;;  %v6512_v29 = vld [vmem:[%s7380_s5 + $0x8] sm:$0xff]  }
 0xcf2   : > { %v2253_v27 = vrot.slane %v2252_v33, 2  ;;  %v2266_v24 = vsel %vm1189_vm6, %v2221_v52, %v2265_v35  ;;  %v2246_v11 = vrot.slane %v2245_v36, 2  ;;  %v6536_v35 = vld [vmem:[%s7383_s8 + $0x10] sm:$0xff]  }
 0xcf3   : > { %v2241_v30 = vrot.slane %v2240_v54, 1  ;;  %v2234_v10 = vrot.slane %v2233_v15, 1  ;;  %v2267_v50 = vsel %vm1191_vm7, %v2228_v0, %v2266_v24  ;;  %v6543_v0 = vld [vmem:[%s7383_s8 + $0x18] sm:$0xff]  }
 0xcf4   : > { %v2254_v25 = vadd.f32 %v2253_v27, %v2252_v33  ;;  %v2247_v31 = vadd.f32 %v2246_v11, %v2245_v36  ;;  %v6529_v36 = vld [vmem:[%s7383_s8 + $0x8] sm:$0xff]  }
 0xcf5   : > { %v2235_v48 = vadd.f32 %v2234_v10, %v2233_v15  ;;  %v2242_v34 = vadd.f32 %v2241_v30, %v2240_v54  ;;  %v6520_v15 = vld [vmem:[%s7383_s8] sm:$0xff]  }
 0xcf6   : > { %v2255_v20 = vrot.slane %v2254_v25, 1  ;;  %v2248_v9 = vrot.slane %v2247_v31, 1 }
 0xcf7   : > { %v2268_v41 = vsel %vm1193_vm8, %v2235_v48, %v2267_v50  ;;  %v6557_v50 = vld [vmem:[%s7381_s6] ss:$0 sm:$0xff] }
 0xcf8   : > { %v2256_v44 = vadd.f32 %v2255_v20, %v2254_v25  ;;  %v2249_v45 = vadd.f32 %v2248_v9, %v2247_v31  ;;  %v2269_v3 = vsel %vm1195_vm9, %v2242_v34, %v2268_v41  ;;  %v6550_v25 = vld [vmem:[%s7382_s7] ss:$0 sm:$0xff] }
 0xcfa   : > { %v2270_v6 = vsel %vm1197_vm10, %v2249_v45, %v2269_v3 }
 0xcfb   : > { %v2271_v52 = vsel %vm1199_vm11, %v2256_v44, %v2270_v6 }
 0xcfc   : > { %2272 = vrot.lane.b32.xlu1 %v2271_v52, %s5645_s27 }
 0xd16   : > { %v1753_v33 = vpop.f32.mrb[16].mxu1 }
 0xd17   : > { %v5177_v62 = vpop.f32.mrb[17].mxu1 }
 0xd18   : > { %v1756_v55 = vpop.f32.mrb[18].mxu1 }
 0xd19   : > { %v5178_v54 = vpop.f32.mrb[19].mxu1 }
 0xd6e   : > { %v2273_v46 = vpop.permute.xlu1 %2272 }
 0xd6f   : > { %v2275_v38 = vsel %vm603_vm1, %v1753_v33, %v2273_v46 }
 0xd70   : > { %v2276_v51 = vpack.c.bf16 %v2275_v38, %v2275_v38 }
 0xd72   : > { %5186 = vmatmul.mubr.msk.bf16.vlgmr.msra.gmra.mrb[20].mxu0 %vm630_vm2, %v2276_v51 }
 0xd73   : > { %5190 = vmatpush3.bf16.msra.mxu0 %v6503_v23  ;;  %5193 = vmatprep.mubr.msk.bf16.mxu0 %vm5643_vm0, %v7433_v1 }
 0xd74   : > { %5191 = vmatprep.subr.bf16.mxu0 %v7433_v1 }
 0xd77   : > { %5192 = vmatpush3.bf16.msra.mxu0 %v6512_v29 }
 0xd78   : > { %5197 = vmatprep.subr.bf16.mxu0 %v7433_v1 }
 0xd7a   : > { %5194 = vmatmul.mubr.msk.bf16.vlgmr.msra.gmra.mrb[24].mxu0 %vm517_vm3, %v2323_v21 }
 0xd7b   : > { %5198 = vmatpush3.bf16.msra.mxu0 %v6520_v15  ;;  %5205 = vmatprep.mubr.msk.bf16.mxu0 %vm5643_vm0, %v7433_v1 }
 0xd7c   : > { %5199 = vmatprep.subr.bf16.mxu0 %v7433_v1 }
 0xd7f   : > { %5200 = vmatpush3.bf16.msra.mxu0 %v6529_v36 }
 0xd80   : > { %5201 = vmatprep.subr.bf16.mxu0 %v7433_v1 }
 0xd83   : > { %5202 = vmatpush3.bf16.msra.mxu0 %v6536_v35 }
 0xd84   : > { %5203 = vmatprep.subr.bf16.mxu0 %v7433_v1 }
 0xd87   : > { %5204 = vmatpush3.bf16.msra.mxu0 %v6543_v0 }
 0xd88   : > { %5229 = vmatprep.subr.bf16.mxu0 %v7433_v1 }
 0xe45   : > { %v2314_v27 = vpop.f32.mrb[20].mxu0 }
 0xe46   : > { %v5187_v24 = vpop.f32.mrb[21].mxu0  ;;  %v2315_v9 = vadd.f32 %v6557_v50, %v2314_v27 }
 0xe47   : > { %v2317_v30 = vpop.f32.mrb[22].mxu0 }
 0xe48   : > { %v5188_v10 = vpop.f32.mrb[23].mxu0 }
 0xe4d   : > { %v2361_v11 = vpop.f32.mrb[24].mxu0 }
 0xe4e   : > { %v2362_v48 = vadd.f32 %v6550_v25, %v2361_v11  ;;  %v5195_v31 = vpop.f32.mrb[25].mxu0 }
 0xe4f   : > { %v2364_v34 = vpop.f32.mrb[26].mxu0 }
 0xe50   : > { %2375 = vrot.lane.b32.xlu1 %v2362_v48, %s5646_s17  ;;  %v5196_v20 = vpop.f32.mrb[27].mxu0  ;;  %v2367_v41 = vadd.f32 %v2362_v48, %v2315_v9 }
 0xe52   : > { %v4914_v44 = vmul.f32 -1.442695, %v2367_v41 }
 0xe54   : > { %5462 = vpow2.f32 %v4914_v44 }
 0xe5e   : > { %v5463_v45 = vpop.eup %5462 }
 0xe5f   : > { %v2371_v3 = vadd.f32 1.0, %v5463_v45 }
 0xe61   : > { %5464 = vrcp.f32 %v2371_v3 }
 0xe6b   : > { %v5465_v6 = vpop.eup %5464 }
 0xe6c   : > { %v2385_v38 = vsub.f32 1.0, %v5465_v6  ;;  %v2391_v21 = vmul.f32 %v5465_v6, %v6260_v37 }
 0xec2   : > { %v2376_v33 = vpop.permute.xlu1 %2375 }
 0xec3   : > { %v2378_v62 = vmul.f32 %v5465_v6, %v2376_v33 }
 0xec5   : > { %2380 = vrot.lane.b32.xlu0 %v2378_v62, %s5646_s17 }
 0xf37   : > { %v2381_v55 = vpop.permute.xlu0 %2380 }
 0xf38   : > { %v2383_v54 = vadd.f32 %v2381_v55, %v2315_v9 }
 0xf3a   : > { %5466 = vtanh.f32 %v2383_v54 }
 0xf44   : > { %v5467_v46 = vpop.eup %5466 }
 0xf45   : > { %2387 = vrot.lane.b32.xlu1 %v5467_v46, %s5647_s14 }
 0xf49   : > { %2397 = vrot.lane.b32.xlu1 %v2271_v52, %s5648_s15 }
 0xfb7   : > { %v2388_v51 = vpop.permute.xlu1 %2387 }
 0xfb8   : > { %v2390_v27 = vmul.f32 %v2388_v51, %v2385_v38 }
 0xfba   : > { %v6564_v24 = vadd.f32 %v2391_v21, %v2390_v27 }
 0xfbc   : > { %2394 = vrot.lane.b32.xlu0 %v6564_v24, %s5647_s14  ;;  %v2523_v30 = vrot.slane %v6564_v24, %v5916_v28  ;;  %v2516_v10 = vcombine.high %v6564_v24, %v6564_v24 }
 0xfbe   : > { %v2539_v11 = vrot.slane %v2523_v30, %v5916_v28  ;;  %v2531_v48 = vcombine.high %v2523_v30, %v2523_v30  ;;  %v2530_v52 = vrot.slane %v2516_v10, %v5916_v28 }
 0xfc0   : > { %v2568_v31 = vrot.slane %v2539_v11, %v5932_v39  ;;  %v2561_v37 = vcombine.high %v2539_v11, %v2539_v11  ;;  %v2553_v34 = vrot.slane %v2531_v48, %v5916_v28  ;;  %v2546_v20 = vrot.slane %v2530_v52, %v5916_v28 }
 0xfc1   : > { %v2532_v9 = vcombine.high %v2530_v52, %v2530_v52 }
 0xfc2   : > { %v2605_v41 = vmul.f32 %v2568_v31, %v5961_v61  ;;  %v2572_v44 = vrot.slane %v2553_v34, %v5932_v39  ;;  %v2576_v45 = vrot.slane %v2561_v37, %v5932_v39  ;;  %v2563_v3 = vcombine.high %v2553_v34, %v2553_v34  ;;  %v2398_v31 = vpop.permute.xlu1 %2397 }
 0xfc3   : > { %v2560_v62 = vrot.slane %v2532_v9, %v5916_v28  ;;  %v2584_v54 = vrot.slane %v2546_v20, %v5932_v39  ;;  %v2562_v46 = vcombine.high %v2546_v20, %v2546_v20 }
 0xfc4   : > { %2621 = vrot.lane.b32.xlu0 %v2605_v41, %s5647_s14  ;;  %v2606_v6 = vmul.f32 %v2572_v44, %v7434_v4  ;;  %v2580_v33 = vrot.slane %v2563_v3, %v5932_v39  ;;  %v2607_v55 = vmul.f32 %v2576_v45, %v7435_v5 }
 0xfc5   : > { %v2588_v51 = vrot.slane %v2560_v62, %v5932_v39  ;;  %v2564_v21 = vcombine.high %v2560_v62, %v2560_v62  ;;  %v2609_v27 = vmul.f32 %v2584_v54, %v7437_v7  ;;  %v2592_v30 = vrot.slane %v2562_v46, %v5932_v39 }
 0xfc6   : > { %2623 = vrot.lane.b32.xlu1 %v2606_v6, %s5647_s14  ;;  %v2608_v38 = vmul.f32 %v2580_v33, %v7436_v49 }
 0xfc7   : > { %v2610_v10 = vmul.f32 %v2588_v51, %v7438_v8  ;;  %v2596_v11 = vrot.slane %v2564_v21, %v5932_v39  ;;  %v2611_v48 = vmul.f32 %v2592_v30, %v7439_v42 }
 0xfc8   : > { %2625 = vrot.lane.b32.xlu0 %v2607_v55, %s5647_s14 }
 0xfc9   : > { %v2612_v52 = vmul.f32 %v2596_v11, %v7440_v18 }
 0xfca   : > { %2627 = vrot.lane.b32.xlu1 %v2608_v38, %s5647_s14 }
 0xfcc   : > { %2629 = vrot.lane.b32.xlu0 %v2609_v27, %s5647_s14 }
 0xfce   : > { %2631 = vrot.lane.b32.xlu1 %v2610_v10, %s5647_s14 }
 0xfd0   : > { %2633 = vrot.lane.b32.xlu0 %v2611_v48, %s5647_s14 }
 0xfd2   : > { %2635 = vrot.lane.b32.xlu1 %v2612_v52, %s5647_s14 }
0x102e   : > { %v2395_v37 = vpop.permute.xlu0 %2394 }
0x102f   : > { %v2400_v34 = vsel %vm517_vm3, %v2395_v37, %v2398_v31 }
0x1030   : > { %v2401_v20 = vpack.c.bf16 %v2400_v34, %v2400_v34 }
0x1032   : > { %5206 = vmatmul.mubr.msk.bf16.vlgmr.msra.gmra.mrb[28].mxu0 %vm800_vm4, %v2401_v20 }
0x1033   : > { %5230 = vmatpush3.bf16.msra.mxu0 %v6302_v22  ;;  %5235 = vmatprep.mubr.msk.bf16.mxu0 %vm5643_vm0, %v7433_v1 }
0x1034   : > { %5231 = vmatprep.subr.bf16.mxu0 %v7433_v1 }
0x1036   : > { %v2622_v9 = vpop.permute.xlu0 %2621 }
0x1037   : > { %v2645_v41 = vsel %vm517_vm3, %v2622_v9, 0.0  ;;  %5232 = vmatpush3.bf16.msra.mxu0 %v6312_v43 }
0x1038   : > { %2646 = vadd.xlane.f32.xlu0 %v2645_v41  ;;  %v2624_v44 = vpop.permute.xlu1 %2623  ;;  %5233 = vmatprep.subr.bf16.mxu0 %v7433_v1 }
0x1039   : > { %v2648_v45 = vsel %vm517_vm3, %v2624_v44, 0.0 }
0x103a   : > { %v2626_v3 = vpop.permute.xlu0 %2625  ;;  %2649 = vadd.xlane.f32.xlu1 %v2648_v45 }
0x103b   : > { %v2651_v22 = vsel %vm517_vm3, %v2626_v3, 0.0  ;;  %5234 = vmatpush3.bf16.msra.mxu0 %v6321_v19 }
0x103c   : > { %2652 = vadd.xlane.f32.xlu0 %v2651_v22  ;;  %v2628_v6 = vpop.permute.xlu1 %2627  ;;  %5239 = vmatprep.subr.bf16.mxu0 %v7433_v1 }
0x103d   : > { %v2654_v43 = vsel %vm517_vm3, %v2628_v6, 0.0 }
0x103e   : > { %v2630_v33 = vpop.permute.xlu0 %2629 }
0x103f   : > { %v2657_v62 = vsel %vm517_vm3, %v2630_v33, 0.0 }
0x1040   : > { %2658 = vadd.xlane.f32.xlu1 %v2657_v62  ;;  %2655 = vadd.xlane.f32.xlu0 %v2654_v43  ;;  %v2632_v55 = vpop.permute.xlu1 %2631 }
0x1041   : > { %v2660_v38 = vsel %vm517_vm3, %v2632_v55, 0.0 }
0x1042   : > { %v2634_v54 = vpop.permute.xlu0 %2633 }
0x1043   : > { %v2663_v46 = vsel %vm517_vm3, %v2634_v54, 0.0 }
0x1044   : > { %2664 = vadd.xlane.f32.xlu1 %v2663_v46  ;;  %2661 = vadd.xlane.f32.xlu0 %v2660_v38  ;;  %v2636_v19 = vpop.permute.xlu1 %2635 }
0x1045   : > { %v2666_v51 = vsel %vm517_vm3, %v2636_v19, 0.0  ;;  %v6641_v19 = vld [vmem:[%s7384_s9] ss:$0 sm:$0xff] }
0x1048   : > { %2667 = vadd.xlane.f32.xlu0 %v2666_v51 }
0x10c5   : > { %v2647_v21 = vpop.xlane.xlu0 %2646 }
0x10c6   : > { %v2680_v11 = vrot.slane %v2647_v21, %v6012_v60 }
0x10c7   : > { %v2650_v27 = vpop.xlane.xlu1 %2649 }
0x10c8   : > { %v2684_v30 = vrot.slane %v2650_v27, %v6012_v60 }
0x10c9   : > { %v6620_v10 = vpop.xlane.xlu0 %2652 }
0x10ca   : > { %v2688_v48 = vrot.slane %v6620_v10, %v6012_v60  ;;  %v2709_v52 = vsel %vm1187_vm5, %v2684_v30, %v2680_v11 }
0x10cc   : > { %v2710_v20 = vsel %vm1189_vm6, %v2688_v48, %v2709_v52 }
0x10cd   : > { %v2656_v31 = vpop.xlane.xlu0 %2655  ;;  %v2659_v37 = vpop.xlane.xlu1 %2658 }
0x10ce   : > { %v2692_v34 = vrot.slane %v2656_v31, %v6012_v60  ;;  %v2696_v9 = vrot.slane %v2659_v37, %v6012_v60 }
0x10d0   : > { %v2711_v41 = vsel %vm1191_vm7, %v2692_v34, %v2710_v20 }
0x10d1   : > { %v2662_v44 = vpop.xlane.xlu0 %2661  ;;  %v2665_v45 = vpop.xlane.xlu1 %2664  ;;  %v2712_v22 = vsel %vm1193_vm8, %v2696_v9, %v2711_v41 }
0x10d2   : > { %v2700_v3 = vrot.slane %v2662_v44, %v6012_v60  ;;  %v2704_v6 = vrot.slane %v2665_v45, %v6012_v60 }
0x10d4   : > { %v2713_v33 = vsel %vm1195_vm9, %v2700_v3, %v2712_v22 }
0x10d5   : > { %v2668_v62 = vpop.xlane.xlu0 %2667  ;;  %v2714_v55 = vsel %vm1197_vm10, %v2704_v6, %v2713_v33 }
0x10d6   : > { %v2708_v43 = vrot.slane %v2668_v62, %v6012_v60 }
0x10d8   : > { %v2715_v54 = vsel %vm1199_vm11, %v2708_v43, %v2714_v55 }
0x10d9   : > { %v2717_v46 = vsel %vm1202_vm12, %v2715_v54, -inf }
0x10da   : > { %2718 = vmax.xlane.f32.xlu0 %v2717_v46 }
0x1105   : > { %v2439_v38 = vpop.f32.mrb[28].mxu0 }
0x1106   : > { %v6644_v51 = vadd.f32 %v6641_v19, %v2439_v38  ;;  %v5207_v30 = vpop.f32.mrb[29].mxu0 }
0x1107   : > { %v2442_v11 = vpop.f32.mrb[30].mxu0 }
0x1108   : > { %7444 = vst [vmem:[#allocation4_spill] sm:$0xff] %v6644_v51  ;;  %2445 = vmax.xlane.f32.xlu1 %v6644_v51  ;;  %v5208_v48 = vpop.f32.mrb[31].mxu0 }
0x1167   : > { %v2719_v52 = vpop.xlane.xlu0 %2718 }
0x1168   : > { %v2724_v34 = vrot.slane %v2719_v52, %v5932_v39  ;;  %v2736_v20 = vrot.slane %v2719_v52, %v6048_v58  ;;  %v2744_v9 = vrot.slane %v2719_v52, %v6058_v40  ;;  %v2752_v6 = vrot.slane %v2719_v52, %v6066_v63 }
0x116a   : > { %v2761_v41 = vsub.f32 %v2647_v21, %v2724_v34  ;;  %v2764_v3 = vsub.f32 %v2656_v31, %v2736_v20  ;;  %v2766_v33 = vsub.f32 %v2662_v44, %v2744_v9  ;;  %v2768_v55 = vsub.f32 %v2668_v62, %v2752_v6 }
0x116b   : > { %v2728_v62 = vrot.slane %v2719_v52, %v6042_v56  ;;  %v2732_v34 = vrot.slane %v2719_v52, %v6045_v57  ;;  %v2748_v6 = vrot.slane %v2719_v52, %v6062_v53 }
0x116c   : > { %v2769_v22 = vmul.f32 1.442695, %v2761_v41  ;;  %v2775_v43 = vmul.f32 1.442695, %v2764_v3  ;;  %v2779_v54 = vmul.f32 1.442695, %v2766_v33  ;;  %v2740_v41 = vrot.slane %v2719_v52, %v6054_v2 }
0x116d   : > { %v2783_v46 = vmul.f32 1.442695, %v2768_v55  ;;  %v2762_v20 = vsub.f32 %v2650_v27, %v2728_v62  ;;  %v2763_v3 = vsub.f32 %v6620_v10, %v2732_v34  ;;  %v2767_v55 = vsub.f32 %v2665_v45, %v2748_v6 }
0x116e   : > { %5468 = vpow2.f32 %v2769_v22  ;;  %v2765_v33 = vsub.f32 %v2659_v37, %v2740_v41 }
0x116f   : > { %5470 = vpow2.f32 %v2775_v43  ;;  %v2771_v22 = vmul.f32 1.442695, %v2762_v20  ;;  %v2773_v43 = vmul.f32 1.442695, %v2763_v3 }
0x1170   : > { %5472 = vpow2.f32 %v2779_v54  ;;  %v2777_v54 = vmul.f32 1.442695, %v2765_v33 }
0x1171   : > { %5474 = vpow2.f32 %v2783_v46  ;;  %v2781_v46 = vmul.f32 1.442695, %v2767_v55 }
0x1172   : > { %5476 = vpow2.f32 %v2771_v22 }
0x1173   : > { %5478 = vpow2.f32 %v2773_v43 }
0x1174   : > { %5480 = vpow2.f32 %v2777_v54 }
0x1175   : > { %5482 = vpow2.f32 %v2781_v46 }
0x1178   : > { %v6651_v38 = vpop.eup %5468 }
0x1179   : > { %2794 = vperm.xlu0 %5393, %v6651_v38   ;;  %v6654_v30 = vpop.eup %5470 }
0x117a   : > { %v6657_v21 = vpop.eup %5472 }
0x117b   : > { %v6660_v31 = vpop.eup %5474 }
0x117d   : > { %2803 = vperm.xlu0 %5393, %v6654_v30  }
0x1181   : > { %2809 = vperm.xlu0 %5393, %v6657_v21  }
0x1185   : > { %2815 = vperm.xlu0 %5393, %v6660_v31  }
0x1195   : > { %v6663_v44 = vpop.xlane.xlu1 %2445 }
0x1196   : > { %7445 = vst [vmem:[#allocation8_spill] sm:$0xff] %v6663_v44  ;;  %vm2456_vm15 = vcmp.eq.f32.partialorder %v6644_v51, %v6663_v44  ;;  %v6673_v51 = vpop.eup %5476 }
0x1197   : > { %v2457_v11 = vsel %vm2456_vm15, %v6008_v59, 128  ;;  %v6676_v27 = vpop.eup %5478 }
0x1198   : > { %v2459_v48 = vshra.s32 %v2457_v11, 16  ;;  %v6679_v10 = vpop.eup %5480  ;;  %v2458_v45 = vand.u32 65535, %v2457_v11 }
0x1199   : > { %v6682_v37 = vpop.eup %5482 }
0x119a   : > { %v2461_v9 = vcvt.s32.f32 %v2459_v48  ;;  %v2460_v48 = vcvt.s32.f32 %v2458_v45 }
0x119c   : > { %2462 = vmin.xlane.f32.xlu1 %v2461_v9 }
0x11ad   : > { %2797 = vperm.xlu1 %5394, %v6673_v51  }
0x11b1   : > { %2800 = vperm.xlu1 %5394, %v6676_v27  }
0x11b5   : > { %2806 = vperm.xlu1 %5394, %v6679_v10  }
0x11b9   : > { %2812 = vperm.xlu1 %5394, %v6682_v37  }
0x11f8   : > { %v2795_v52 = vpop.permute.xlu0 %2794 }
0x11f9   : > { %v2820_v22 = vrot.slane %v2795_v52, %v6012_v60 }
0x11fc   : > { %v2804_v20 = vpop.permute.xlu0 %2803 }
0x11fd   : > { %v2832_v54 = vrot.slane %v2804_v20, %v6012_v60 }
0x1200   : > { %v2810_v33 = vpop.permute.xlu0 %2809 }
0x1201   : > { %v2840_v52 = vrot.slane %v2810_v33, %v6012_v60  ;;  %v7446_v33 = vmov 1.0|1.0  }
0x1229   : > { %v2463_v62 = vpop.xlane.xlu1 %2462 }
0x122a   : > { %vm2464_vm13 = vcmp.eq.f32.partialorder %v2461_v9, %v2463_v62 }
0x122b   : > { %v2465_v34 = vsel %vm2464_vm13, %v2460_v48, inf  ;;  %v2816_v48 = vpop.permute.xlu0 %2815 }
0x122c   : > { %2466 = vmin.xlane.f32.xlu1 %v2465_v34 }
0x122d   : > { %v2798_v41 = vpop.permute.xlu1 %2797 }
0x122e   : > { %v2824_v3 = vrot.slane %v2798_v41, %v6012_v60 }
0x1230   : > { %v2849_v55 = vsel %vm1187_vm5, %v2824_v3, %v2820_v22 }
0x1231   : > { %v2801_v6 = vpop.permute.xlu1 %2800 }
0x1232   : > { %v2828_v43 = vrot.slane %v2801_v6, %v6012_v60  ;;  %v2848_v6 = vrot.slane %v2816_v48, %v6012_v60 }
0x1234   : > { %v2850_v11 = vsel %vm1189_vm6, %v2828_v43, %v2849_v55  ;;  %v2469_v55 = vcvt.f32.s32 %v2463_v62  ;;  %v5586_v62 = vld [vmem:[%s7378_s3 + $0x10] sm:$0xff]  }
0x1235   : > { %v2807_v46 = vpop.permute.xlu1 %2806  ;;  %v2851_v45 = vsel %vm1191_vm7, %v2832_v54, %v2850_v11 }
0x1236   : > { %v2836_v9 = vrot.slane %v2807_v46, %v6012_v60  ;;  %v2470_v54 = vshll.u32 %v2469_v55, 16 }
0x1238   : > { %v2852_v34 = vsel %vm1193_vm8, %v2836_v9, %v2851_v45  ;;  %v5584_v45 = vld [vmem:[%s7378_s3] sm:$0xff]  }
0x1239   : > { %v2813_v41 = vpop.permute.xlu1 %2812  ;;  %v2853_v3 = vsel %vm1195_vm9, %v2840_v52, %v2852_v34  ;;  %v5587_v34 = vld [vmem:[%s7378_s3 + $0x18] sm:$0xff]   ;;  %v5588_v52 = vld [vmem:[%s7378_s3 + $0x20] sm:$0xff]  }
0x123a   : > { %v2844_v44 = vrot.slane %v2813_v41, %v6012_v60  ;;  %v5589_v41 = vld [vmem:[%s7378_s3 + $0x28] sm:$0xff]  }
0x123c   : > { %v2854_v22 = vsel %vm1197_vm10, %v2844_v44, %v2853_v3  ;;  %v5585_v44 = vld [vmem:[%s7378_s3 + $0x8] sm:$0xff]  }
0x123d   : > { %v2855_v20 = vsel %vm1199_vm11, %v2848_v6, %v2854_v22 }
0x123e   : > { %v2857_v43 = vsel %vm1202_vm12, %v2855_v20, 0.0  ;;  %v6734_v20 = vld [vmem:[%s7378_s3 + $0x30] sm:$0xff]  }
0x123f   : > { %2858 = vadd.xlane.f32.xlu0 %v2857_v43  ;;  %7447 = vst [vmem:[#allocation5_spill] sm:$0xff] %v6734_v20 }
0x12b9   : > { %v2467_v11 = vpop.xlane.xlu1 %2466 }
0x12ba   : > { %v2468_v46 = vcvt.f32.s32 %v2467_v11 }
0x12bc   : > { %v2471_v9 = vadd.s32 %v2470_v54, %v2468_v46  ;;  %v6745_v46 = vld [vmem:[%s7378_s3 + $0x38] sm:$0xff]  }
0x12bd   : > { %7448 = vst [vmem:[#allocation9_spill] sm:$0xff] %v6745_v46 }
0x12be   : > { %vm2472_vm14 = vcmp.eq.s32.totalorder %v6008_v59, %v2471_v9 }
0x12bf   : > { %vm4918_vm15 = vmpackc.low %vm2472_vm14, %vm2472_vm14 }
0x12c0   : > { %5226 = vmatmul.mubr.msk.bf16.vlgmr.msra.gmra.mrb[20].mxu1 %vm4918_vm15, %v7446_v33 }
0x12c1   : > { %5260 = vmatpush3.bf16.msra.mxu1 %v5584_v45  ;;  %5275 = vmatprep.mubr.msk.bf16.mxu1 %vm5643_vm0, %v7433_v1 }
0x12c2   : > { %5261 = vmatprep.subr.bf16.mxu1 %v7433_v1 }
0x12c5   : > { %5262 = vmatpush3.bf16.msra.mxu1 %v5585_v44 }
0x12c6   : > { %5263 = vmatprep.subr.bf16.mxu1 %v7433_v1 }
0x12c9   : > { %5264 = vmatpush3.bf16.msra.mxu1 %v5586_v62 }
0x12ca   : > { %5265 = vmatprep.subr.bf16.mxu1 %v7433_v1 }
0x12cc   : > { %v2859_v48 = vpop.xlane.xlu0 %2858 }
0x12cd   : > { %5484 = vrcp.f32 %v2859_v48  ;;  %5266 = vmatpush3.bf16.msra.mxu1 %v5587_v34 }
0x12ce   : > { %5267 = vmatprep.subr.bf16.mxu1 %v7433_v1 }
0x12d1   : > { %5268 = vmatpush3.bf16.msra.mxu1 %v5588_v52  ;;  %v3077_v52 = vpack.c.bf16 %v6564_v24, %v6564_v24 }
0x12d2   : > { %5269 = vmatprep.subr.bf16.mxu1 %v7433_v1 }
0x12d5   : > { %5270 = vmatpush3.bf16.msra.mxu1 %v5589_v41 }
0x12d6   : > { %5271 = vmatprep.subr.bf16.mxu1 %v7433_v1 }
0x12d7   : > { %v5485_v6 = vpop.eup %5484 }
0x12d8   : > { %v2865_v3 = vrot.slane %v5485_v6, %v5932_v39  ;;  %v2869_v22 = vrot.slane %v5485_v6, %v6042_v56  ;;  %v2877_v11 = vrot.slane %v5485_v6, %v6048_v58  ;;  %v2873_v54 = vrot.slane %v5485_v6, %v6045_v57 }
0x12d9   : > { %5272 = vmatpush3.bf16.msra.mxu1 %v6734_v20  ;;  %v2881_v45 = vrot.slane %v5485_v6, %v6054_v2  ;;  %v2893_v48 = vrot.slane %v5485_v6, %v6066_v63  ;;  %v2889_v34 = vrot.slane %v5485_v6, %v6062_v53 }
0x12da   : > { %v2902_v43 = vmul.f32 %v6651_v38, %v2865_v3  ;;  %v2903_v55 = vmul.f32 %v6673_v51, %v2869_v22  ;;  %5273 = vmatprep.subr.bf16.mxu1 %v7433_v1  ;;  %v2905_v9 = vmul.f32 %v6654_v30, %v2877_v11  ;;  %v2904_v38 = vmul.f32 %v6676_v27, %v2873_v54 }
0x12db   : > { %v2885_v51 = vrot.slane %v5485_v6, %v6058_v40  ;;  %v2906_v62 = vmul.f32 %v6679_v10, %v2881_v45  ;;  %v2909_v30 = vmul.f32 %v6660_v31, %v2893_v48  ;;  %v2908_v27 = vmul.f32 %v6682_v37, %v2889_v34 }
0x12dc   : > { %2912 = vperm.xlu0 %5393, %v2902_v43   ;;  %2917 = vperm.xlu1 %5394, %v2903_v55  }
0x12dd   : > { %5274 = vmatpush3.bf16.msra.mxu1 %v6745_v46  ;;  %v2907_v44 = vmul.f32 %v6657_v21, %v2885_v51 }
0x12de   : > { %5297 = vmatprep.subr.bf16.mxu1 %v7433_v1 }
0x12e0   : > { %2927 = vperm.xlu0 %5393, %v2905_v9   ;;  %2922 = vperm.xlu1 %5394, %v2904_v38  }
0x12e4   : > { %2937 = vperm.xlu0 %5393, %v2907_v44   ;;  %2932 = vperm.xlu1 %5394, %v2906_v62  }
0x12e8   : > { %2947 = vperm.xlu0 %5393, %v2909_v30   ;;  %2942 = vperm.xlu1 %5394, %v2908_v27  }
0x12ec   : > { %3079 = vrot.lane.b32.xlu0 %v3077_v52, %s5647_s14 }
0x135b   : > { %v2913_v21 = vpop.permute.xlu0 %2912  ;;  %v2918_v41 = vpop.permute.xlu1 %2917 }
0x135c   : > { %v2950_v10 = vmul.f32 %v6451_v16, %v2913_v21  ;;  %v2951_v3 = vmul.f32 %v6455_v47, %v2918_v41 }
0x135e   : > { %v2958_v6 = vsel %vm517_vm3, %v2950_v10, 0.0  ;;  %v2965_v22 = vsel %vm517_vm3, %v2951_v3, 0.0 }
0x135f   : > { %v2959_v31 = vrot.slane %v2958_v6, 4  ;;  %v2966_v43 = vrot.slane %v2965_v22, 4  ;;  %v2928_v37 = vpop.permute.xlu0 %2927  ;;  %v2923_v55 = vpop.permute.xlu1 %2922 }
0x1360   : > { %v2953_v11 = vmul.f32 %v6461_v32, %v2928_v37  ;;  %v2952_v54 = vmul.f32 %v6465_v14, %v2923_v55 }
0x1361   : > { %v2960_v9 = vadd.f32 %v2959_v31, %v2958_v6  ;;  %v2967_v38 = vadd.f32 %v2966_v43, %v2965_v22 }
0x1362   : > { %v2979_v51 = vsel %vm517_vm3, %v2953_v11, 0.0  ;;  %v2972_v16 = vsel %vm517_vm3, %v2952_v54, 0.0 }
0x1363   : > { %v2961_v45 = vrot.slane %v2960_v9, 2  ;;  %v2968_v47 = vrot.slane %v2967_v38, 2  ;;  %v2980_v44 = vrot.slane %v2979_v51, 4  ;;  %v2973_v62 = vrot.slane %v2972_v16, 4  ;;  %v2938_v48 = vpop.permute.xlu0 %2937  ;;  %v2933_v34 = vpop.permute.xlu1 %2932 }
0x1364   : > { %v2955_v30 = vmul.f32 %v6471_v13, %v2938_v48  ;;  %v2954_v27 = vmul.f32 %v6475_v17, %v2933_v34 }
0x1365   : > { %v2962_v52 = vadd.f32 %v2961_v45, %v2960_v9  ;;  %v2969_v32 = vadd.f32 %v2968_v47, %v2967_v38  ;;  %v2981_v21 = vadd.f32 %v2980_v44, %v2979_v51  ;;  %v2974_v14 = vadd.f32 %v2973_v62, %v2972_v16 }
0x1366   : > { %v2993_v41 = vsel %vm517_vm3, %v2955_v30, 0.0  ;;  %v2986_v10 = vsel %vm517_vm3, %v2954_v27, 0.0 }
0x1367   : > { %v2963_v3 = vrot.slane %v2962_v52, 1  ;;  %v2970_v6 = vrot.slane %v2969_v32, 1  ;;  %v2982_v22 = vrot.slane %v2981_v21, 2  ;;  %v2975_v31 = vrot.slane %v2974_v14, 2  ;;  %v2948_v43 = vpop.permute.xlu0 %2947  ;;  %v2943_v37 = vpop.permute.xlu1 %2942 }
0x1368   : > { %v2994_v55 = vrot.slane %v2993_v41, 4  ;;  %v2987_v11 = vrot.slane %v2986_v10, 4  ;;  %v2957_v13 = vmul.f32 %v6481_v12, %v2948_v43  ;;  %v2956_v17 = vmul.f32 %v6485_v26, %v2943_v37 }
0x1369   : > { %v2964_v54 = vadd.f32 %v2963_v3, %v2962_v52  ;;  %v2983_v9 = vadd.f32 %v2982_v22, %v2981_v21  ;;  %v2976_v38 = vadd.f32 %v2975_v31, %v2974_v14  ;;  %v2971_v44 = vadd.f32 %v2970_v6, %v2969_v32 }
0x136a   : > { %v2995_v51 = vadd.f32 %v2994_v55, %v2993_v41  ;;  %v2988_v16 = vadd.f32 %v2987_v11, %v2986_v10  ;;  %v3007_v45 = vsel %vm517_vm3, %v2957_v13, 0.0  ;;  %v3000_v47 = vsel %vm517_vm3, %v2956_v17, 0.0 }
0x136b   : > { %v2984_v62 = vrot.slane %v2983_v9, 1  ;;  %v2977_v48 = vrot.slane %v2976_v38, 1  ;;  %v3008_v34 = vrot.slane %v3007_v45, 4  ;;  %v3001_v46 = vrot.slane %v3000_v47, 4 }
0x136c   : > { %v2996_v30 = vrot.slane %v2995_v51, 2  ;;  %v2989_v27 = vrot.slane %v2988_v16, 2  ;;  %v3022_v21 = vsel %vm1187_vm5, %v2971_v44, %v2964_v54 }
0x136d   : > { %v2978_v20 = vadd.f32 %v2977_v48, %v2976_v38  ;;  %v3009_v12 = vadd.f32 %v3008_v34, %v3007_v45  ;;  %v3002_v52 = vadd.f32 %v3001_v46, %v3000_v47  ;;  %v2985_v14 = vadd.f32 %v2984_v62, %v2983_v9 }
0x136e   : > { %v2997_v43 = vadd.f32 %v2996_v30, %v2995_v51  ;;  %v2990_v26 = vadd.f32 %v2989_v27, %v2988_v16  ;;  %v3080_v30 = vpop.permute.xlu0 %3079 }
0x136f   : > { %v3010_v41 = vrot.slane %v3009_v12, 2  ;;  %v3023_v10 = vsel %vm1189_vm6, %v2978_v20, %v3022_v21  ;;  %v3003_v32 = vrot.slane %v3002_v52, 2 }
0x1370   : > { %v2998_v3 = vrot.slane %v2997_v43, 1  ;;  %v2991_v22 = vrot.slane %v2990_v26, 1  ;;  %v3024_v13 = vsel %vm1191_vm7, %v2985_v14, %v3023_v10 }
0x1371   : > { %v3011_v6 = vadd.f32 %v3010_v41, %v3009_v12  ;;  %v3004_v37 = vadd.f32 %v3003_v32, %v3002_v52 }
0x1372   : > { %v2992_v31 = vadd.f32 %v2991_v22, %v2990_v26  ;;  %v2999_v55 = vadd.f32 %v2998_v3, %v2997_v43 }
0x1373   : > { %v3012_v11 = vrot.slane %v3011_v6, 1  ;;  %v3005_v17 = vrot.slane %v3004_v37, 1 }
0x1374   : > { %v3025_v38 = vsel %vm1193_vm8, %v2992_v31, %v3024_v13 }
0x1375   : > { %v3013_v46 = vadd.f32 %v3012_v11, %v3011_v6  ;;  %v3006_v51 = vadd.f32 %v3005_v17, %v3004_v37  ;;  %v3026_v54 = vsel %vm1195_vm9, %v2999_v55, %v3025_v38 }
0x1377   : > { %v3027_v9 = vsel %vm1197_vm10, %v3006_v51, %v3026_v54 }
0x1378   : > { %v3028_v20 = vsel %vm1199_vm11, %v3013_v46, %v3027_v9 }
0x1379   : > { %3029 = vrot.lane.b32.xlu1 %v3028_v20, %s5645_s27 }
0x1393   : > { %v2510_v16 = vpop.f32.mrb[20].mxu1 }
0x1394   : > { %v5227_v45 = vpop.f32.mrb[21].mxu1 }
0x1395   : > { %v2513_v47 = vpop.f32.mrb[22].mxu1 }
0x1396   : > { %v5228_v44 = vpop.f32.mrb[23].mxu1 }
0x13eb   : > { %v3030_v62 = vpop.permute.xlu1 %3029 }
0x13ec   : > { %v3032_v48 = vsel %vm603_vm1, %v2510_v16, %v3030_v62 }
0x13ed   : > { %v3033_v34 = vpack.c.bf16 %v3032_v48, %v3032_v48 }
0x13ef   : > { %5236 = vmatmul.mubr.msk.bf16.vlgmr.msra.gmra.mrb[32].mxu0 %vm630_vm2, %v3033_v34 }
0x13f0   : > { %5240 = vmatpush3.bf16.msra.mxu0 %v6503_v23  ;;  %5243 = vmatprep.mubr.msk.bf16.mxu0 %vm5643_vm0, %v7433_v1 }
0x13f1   : > { %5241 = vmatprep.subr.bf16.mxu0 %v7433_v1 }
0x13f4   : > { %5242 = vmatpush3.bf16.msra.mxu0 %v6512_v29 }
0x13f5   : > { %5247 = vmatprep.subr.bf16.mxu0 %v7433_v1 }
0x13f7   : > { %5244 = vmatmul.mubr.msk.bf16.vlgmr.msra.gmra.mrb[36].mxu0 %vm517_vm3, %v3080_v30 }
0x13f8   : > { %5248 = vmatpush3.bf16.msra.mxu0 %v6520_v15  ;;  %5255 = vmatprep.mubr.msk.bf16.mxu0 %vm5643_vm0, %v7433_v1 }
0x13f9   : > { %5249 = vmatprep.subr.bf16.mxu0 %v7433_v1 }
0x13fc   : > { %5250 = vmatpush3.bf16.msra.mxu0 %v6529_v36 }
0x13fd   : > { %5251 = vmatprep.subr.bf16.mxu0 %v7433_v1 }
0x1400   : > { %5252 = vmatpush3.bf16.msra.mxu0 %v6536_v35 }
0x1401   : > { %5253 = vmatprep.subr.bf16.mxu0 %v7433_v1 }
0x1404   : > { %5254 = vmatpush3.bf16.msra.mxu0 %v6543_v0 }
0x1405   : > { %5279 = vmatprep.subr.bf16.mxu0 %v7433_v1 }
0x14c2   : > { %v3071_v23 = vpop.f32.mrb[32].mxu0 }
0x14c3   : > { %v5237_v29 = vpop.f32.mrb[33].mxu0  ;;  %v3072_v35 = vadd.f32 %v6557_v50, %v3071_v23 }
0x14c4   : > { %v3074_v15 = vpop.f32.mrb[34].mxu0 }
0x14c5   : > { %v5238_v27 = vpop.f32.mrb[35].mxu0 }
0x14ca   : > { %v3118_v12 = vpop.f32.mrb[36].mxu0 }
0x14cb   : > { %v3119_v43 = vadd.f32 %v6550_v25, %v3118_v12  ;;  %v5245_v26 = vpop.f32.mrb[37].mxu0 }
0x14cc   : > { %v3121_v52 = vpop.f32.mrb[38].mxu0 }
0x14cd   : > { %3132 = vrot.lane.b32.xlu1 %v3119_v43, %s5646_s17  ;;  %v5246_v36 = vpop.f32.mrb[39].mxu0  ;;  %v3124_v21 = vadd.f32 %v3119_v43, %v3072_v35 }
0x14cf   : > { %v4922_v14 = vmul.f32 -1.442695, %v3124_v21 }
0x14d1   : > { %5486 = vpow2.f32 %v4922_v14 }
0x14db   : > { %v5487_v0 = vpop.eup %5486 }
0x14dc   : > { %v3128_v41 = vadd.f32 1.0, %v5487_v0 }
0x14de   : > { %5488 = vrcp.f32 %v3128_v41 }
0x14e8   : > { %v5489_v10 = vpop.eup %5488 }
0x14e9   : > { %v3142_v50 = vsub.f32 1.0, %v5489_v10  ;;  %v3148_v37 = vmul.f32 %v5489_v10, %v6564_v24 }
0x153f   : > { %v3133_v3 = vpop.permute.xlu1 %3132 }
0x1540   : > { %v3135_v22 = vmul.f32 %v5489_v10, %v3133_v3 }
0x1542   : > { %3137 = vrot.lane.b32.xlu0 %v3135_v22, %s5646_s17  ;;  %v6854_v22 = vld [vmem:[%s7379_s4] sm:$0xff]  }
0x15b4   : > { %v3138_v32 = vpop.permute.xlu0 %3137 }
0x15b5   : > { %v3140_v25 = vadd.f32 %v3138_v32, %v3072_v35 }
0x15b7   : > { %5490 = vtanh.f32 %v3140_v25 }
0x15c1   : > { %v5491_v6 = vpop.eup %5490 }
0x15c2   : > { %3144 = vrot.lane.b32.xlu1 %v5491_v6, %s5647_s14  ;;  %v6864_v6 = vld [vmem:[%s7379_s4 + $0x8] sm:$0xff]  }
0x15c6   : > { %3154 = vrot.lane.b32.xlu1 %v3028_v20, %s5648_s15 }
0x1634   : > { %v3145_v31 = vpop.permute.xlu1 %3144 }
0x1635   : > { %v3147_v55 = vmul.f32 %v3145_v31, %v3142_v50 }
0x1637   : > { %v6812_v11 = vadd.f32 %v3148_v37, %v3147_v55 }
0x1638   : > { %v3155_v0 = vpop.permute.xlu1 %3154 }
0x1639   : > { %v3273_v13 = vcombine.high %v6812_v11, %v6812_v11  ;;  %3151 = vrot.lane.b32.xlu0 %v6812_v11, %s5647_s14  ;;  %v3280_v17 = vrot.slane %v6812_v11, %v5916_v28 }
0x163b   : > { %v3296_v38 = vrot.slane %v3280_v17, %v5916_v28  ;;  %v3288_v46 = vcombine.high %v3280_v17, %v3280_v17  ;;  %v3287_v51 = vrot.slane %v3273_v13, %v5916_v28  ;;  %v6873_v13 = vld [vmem:[%s7379_s4 + $0x10] sm:$0xff]  }
0x163d   : > { %v3325_v54 = vrot.slane %v3296_v38, %v5932_v39  ;;  %v3310_v24 = vrot.slane %v3288_v46, %v5916_v28  ;;  %v3318_v9 = vcombine.high %v3296_v38, %v3296_v38  ;;  %v3303_v20 = vrot.slane %v3287_v51, %v5916_v28 }
0x163e   : > { %v3289_v16 = vcombine.high %v3287_v51, %v3287_v51 }
0x163f   : > { %v3362_v45 = vmul.f32 %v3325_v54, %v5961_v61  ;;  %v3329_v47 = vrot.slane %v3310_v24, %v5932_v39  ;;  %v3333_v44 = vrot.slane %v3318_v9, %v5932_v39  ;;  %v3320_v62 = vcombine.high %v3310_v24, %v3310_v24 }
0x1640   : > { %v3317_v30 = vrot.slane %v3289_v16, %v5916_v28  ;;  %v3341_v29 = vrot.slane %v3303_v20, %v5932_v39  ;;  %v3319_v15 = vcombine.high %v3303_v20, %v3303_v20 }
0x1641   : > { %3378 = vrot.lane.b32.xlu0 %v3362_v45, %s5647_s14  ;;  %v3363_v48 = vmul.f32 %v3329_v47, %v7434_v4  ;;  %v3337_v34 = vrot.slane %v3320_v62, %v5932_v39  ;;  %v3364_v23 = vmul.f32 %v3333_v44, %v7435_v5 }
0x1642   : > { %v3345_v12 = vrot.slane %v3317_v30, %v5932_v39  ;;  %v3321_v43 = vcombine.high %v3317_v30, %v3317_v30  ;;  %v3366_v26 = vmul.f32 %v3341_v29, %v7437_v7  ;;  %v3349_v52 = vrot.slane %v3319_v15, %v5932_v39 }
0x1643   : > { %3380 = vrot.lane.b32.xlu1 %v3363_v48, %s5647_s14  ;;  %v3365_v27 = vmul.f32 %v3337_v34, %v7436_v49 }
0x1644   : > { %v3367_v36 = vmul.f32 %v3345_v12, %v7438_v8  ;;  %v3353_v35 = vrot.slane %v3321_v43, %v5932_v39  ;;  %v3368_v21 = vmul.f32 %v3349_v52, %v7439_v42 }
0x1645   : > { %3382 = vrot.lane.b32.xlu0 %v3364_v23, %s5647_s14 }
0x1646   : > { %v3369_v14 = vmul.f32 %v3353_v35, %v7440_v18 }
0x1647   : > { %3384 = vrot.lane.b32.xlu1 %v3365_v27, %s5647_s14 }
0x1649   : > { %3386 = vrot.lane.b32.xlu0 %v3366_v26, %s5647_s14 }
0x164b   : > { %3388 = vrot.lane.b32.xlu1 %v3367_v36, %s5647_s14 }
0x164d   : > { %3390 = vrot.lane.b32.xlu0 %v3368_v21, %s5647_s14 }
0x164f   : > { %3392 = vrot.lane.b32.xlu1 %v3369_v14, %s5647_s14 }
0x16ab   : > { %v3152_v41 = vpop.permute.xlu0 %3151 }
0x16ac   : > { %v3157_v10 = vsel %vm517_vm3, %v3152_v41, %v3155_v0 }
0x16ad   : > { %v3158_v3 = vpack.c.bf16 %v3157_v10, %v3157_v10 }
0x16af   : > { %5256 = vmatmul.mubr.msk.bf16.vlgmr.msra.gmra.mrb[40].mxu0 %vm800_vm4, %v3158_v3 }
0x16b0   : > { %5280 = vmatpush3.bf16.msra.mxu0 %v6854_v22  ;;  %5285 = vmatprep.mubr.msk.bf16.mxu0 %vm5643_vm0, %v7433_v1 }
0x16b1   : > { %5281 = vmatprep.subr.bf16.mxu0 %v7433_v1 }
0x16b3   : > { %v3379_v32 = vpop.permute.xlu0 %3378 }
0x16b4   : > { %v3402_v25 = vsel %vm517_vm3, %v3379_v32, 0.0  ;;  %5282 = vmatpush3.bf16.msra.mxu0 %v6864_v6 }
0x16b5   : > { %3403 = vadd.xlane.f32.xlu0 %v3402_v25  ;;  %v3381_v50 = vpop.permute.xlu1 %3380  ;;  %5283 = vmatprep.subr.bf16.mxu0 %v7433_v1 }
0x16b6   : > { %v3405_v31 = vsel %vm517_vm3, %v3381_v50, 0.0 }
0x16b7   : > { %v3383_v37 = vpop.permute.xlu0 %3382  ;;  %3406 = vadd.xlane.f32.xlu1 %v3405_v31 }
0x16b8   : > { %v3408_v55 = vsel %vm517_vm3, %v3383_v37, 0.0  ;;  %5284 = vmatpush3.bf16.msra.mxu0 %v6873_v13 }
0x16b9   : > { %3409 = vadd.xlane.f32.xlu0 %v3408_v55  ;;  %v3385_v17 = vpop.permute.xlu1 %3384  ;;  %5289 = vmatprep.subr.bf16.mxu0 %v7433_v1 }
0x16ba   : > { %v3411_v46 = vsel %vm517_vm3, %v3385_v17, 0.0 }
0x16bb   : > { %v3387_v38 = vpop.permute.xlu0 %3386 }
0x16bc   : > { %v3414_v51 = vsel %vm517_vm3, %v3387_v38, 0.0 }
0x16bd   : > { %3415 = vadd.xlane.f32.xlu1 %v3414_v51  ;;  %3412 = vadd.xlane.f32.xlu0 %v3411_v46  ;;  %v3389_v54 = vpop.permute.xlu1 %3388 }
0x16be   : > { %v3417_v9 = vsel %vm517_vm3, %v3389_v54, 0.0 }
0x16bf   : > { %v3391_v24 = vpop.permute.xlu0 %3390 }
0x16c0   : > { %v3420_v20 = vsel %vm517_vm3, %v3391_v24, 0.0 }
0x16c1   : > { %3421 = vadd.xlane.f32.xlu1 %v3420_v20  ;;  %3418 = vadd.xlane.f32.xlu0 %v3417_v9  ;;  %v3393_v16 = vpop.permute.xlu1 %3392 }
0x16c2   : > { %v3423_v45 = vsel %vm517_vm3, %v3393_v16, 0.0 }
0x16c5   : > { %3424 = vadd.xlane.f32.xlu0 %v3423_v45 }
0x1742   : > { %v3404_v47 = vpop.xlane.xlu0 %3403 }
0x1743   : > { %v3437_v34 = vrot.slane %v3404_v47, %v6012_v60 }
0x1744   : > { %v3407_v44 = vpop.xlane.xlu1 %3406 }
0x1745   : > { %v3441_v62 = vrot.slane %v3407_v44, %v6012_v60 }
0x1746   : > { %v6883_v48 = vpop.xlane.xlu0 %3409 }
0x1747   : > { %v3445_v30 = vrot.slane %v6883_v48, %v6012_v60  ;;  %v3466_v23 = vsel %vm1187_vm5, %v3441_v62, %v3437_v34 }
0x1749   : > { %v3467_v12 = vsel %vm1189_vm6, %v3445_v30, %v3466_v23 }
0x174a   : > { %v3413_v29 = vpop.xlane.xlu0 %3412  ;;  %v3416_v15 = vpop.xlane.xlu1 %3415 }
0x174b   : > { %v3449_v27 = vrot.slane %v3413_v29, %v6012_v60  ;;  %v3453_v43 = vrot.slane %v3416_v15, %v6012_v60 }
0x174d   : > { %v3468_v26 = vsel %vm1191_vm7, %v3449_v27, %v3467_v12 }
0x174e   : > { %v3419_v52 = vpop.xlane.xlu0 %3418  ;;  %v3422_v36 = vpop.xlane.xlu1 %3421  ;;  %v3469_v21 = vsel %vm1193_vm8, %v3453_v43, %v3468_v26 }
0x174f   : > { %v3457_v35 = vrot.slane %v3419_v52, %v6012_v60  ;;  %v3461_v14 = vrot.slane %v3422_v36, %v6012_v60 }
0x1751   : > { %v3470_v0 = vsel %vm1195_vm9, %v3457_v35, %v3469_v21 }
0x1752   : > { %v3425_v41 = vpop.xlane.xlu0 %3424  ;;  %v3471_v3 = vsel %vm1197_vm10, %v3461_v14, %v3470_v0 }
0x1753   : > { %v3465_v10 = vrot.slane %v3425_v41, %v6012_v60 }
0x1755   : > { %v3472_v32 = vsel %vm1199_vm11, %v3465_v10, %v3471_v3 }
0x1756   : > { %v3474_v25 = vsel %vm1202_vm12, %v3472_v32, -inf }
0x1757   : > { %3475 = vmax.xlane.f32.xlu0 %v3474_v25 }
0x1782   : > { %v3196_v50 = vpop.f32.mrb[40].mxu0 }
0x1783   : > { %v6902_v31 = vadd.f32 %v6641_v19, %v3196_v50  ;;  %v5257_v37 = vpop.f32.mrb[41].mxu0 }
0x1784   : > { %v3199_v55 = vpop.f32.mrb[42].mxu0 }
0x1785   : > { %7449 = vst [vmem:[#allocation6_spill] sm:$0xff] %v6902_v31  ;;  %3202 = vmax.xlane.f32.xlu1 %v6902_v31  ;;  %v5258_v17 = vpop.f32.mrb[43].mxu0 }
0x17e4   : > { %v3476_v38 = vpop.xlane.xlu0 %3475 }
0x17e5   : > { %v3481_v46 = vrot.slane %v3476_v38, %v5932_v39  ;;  %v3493_v51 = vrot.slane %v3476_v38, %v6048_v58  ;;  %v3501_v54 = vrot.slane %v3476_v38, %v6058_v40  ;;  %v3509_v16 = vrot.slane %v3476_v38, %v6066_v63 }
0x17e6   : > { %v3485_v43 = vrot.slane %v3476_v38, %v6042_v56  ;;  %v3489_v35 = vrot.slane %v3476_v38, %v6045_v57  ;;  %v3497_v0 = vrot.slane %v3476_v38, %v6054_v2  ;;  %v3505_v3 = vrot.slane %v3476_v38, %v6062_v53 }
0x17e7   : > { %v3518_v24 = vsub.f32 %v3404_v47, %v3481_v46  ;;  %v3521_v9 = vsub.f32 %v3413_v29, %v3493_v51  ;;  %v3523_v45 = vsub.f32 %v3419_v52, %v3501_v54  ;;  %v3525_v62 = vsub.f32 %v3425_v41, %v3509_v16 }
0x17e8   : > { %v3519_v21 = vsub.f32 %v3407_v44, %v3485_v43  ;;  %v3520_v41 = vsub.f32 %v6883_v48, %v3489_v35  ;;  %v3522_v32 = vsub.f32 %v3416_v15, %v3497_v0  ;;  %v3524_v50 = vsub.f32 %v3422_v36, %v3505_v3 }
0x17e9   : > { %v3526_v20 = vmul.f32 1.442695, %v3518_v24  ;;  %v3532_v19 = vmul.f32 1.442695, %v3521_v9  ;;  %v3536_v34 = vmul.f32 1.442695, %v3523_v45 }
0x17ea   : > { %v3540_v30 = vmul.f32 1.442695, %v3525_v62  ;;  %v3528_v10 = vmul.f32 1.442695, %v3519_v21  ;;  %v3530_v25 = vmul.f32 1.442695, %v3520_v41 }
0x17eb   : > { %5492 = vpow2.f32 %v3526_v20  ;;  %v3534_v37 = vmul.f32 1.442695, %v3522_v32  ;;  %v3538_v55 = vmul.f32 1.442695, %v3524_v50 }
0x17ec   : > { %5494 = vpow2.f32 %v3532_v19 }
0x17ed   : > { %5496 = vpow2.f32 %v3536_v34 }
0x17ee   : > { %5498 = vpow2.f32 %v3540_v30 }
0x17ef   : > { %5500 = vpow2.f32 %v3528_v10 }
0x17f0   : > { %5502 = vpow2.f32 %v3530_v25 }
0x17f1   : > { %5504 = vpow2.f32 %v3534_v37 }
0x17f2   : > { %5506 = vpow2.f32 %v3538_v55 }
0x17f5   : > { %v6909_v23 = vpop.eup %5492 }
0x17f6   : > { %3551 = vperm.xlu0 %5393, %v6909_v23   ;;  %v6912_v27 = vpop.eup %5494 }
0x17f7   : > { %v6915_v47 = vpop.eup %5496 }
0x17f8   : > { %v6918_v29 = vpop.eup %5498 }
0x17f9   : > { %v6931_v17 = vpop.eup %5500 }
0x17fa   : > { %3560 = vperm.xlu0 %5393, %v6912_v27   ;;  %v6934_v44 = vpop.eup %5502 }
0x17fb   : > { %v6937_v48 = vpop.eup %5504 }
0x17fc   : > { %v6940_v15 = vpop.eup %5506 }
0x17fe   : > { %3566 = vperm.xlu0 %5393, %v6915_v47  }
0x1802   : > { %3572 = vperm.xlu0 %5393, %v6918_v29  }
0x1812   : > { %v6921_v12 = vpop.xlane.xlu1 %3202 }
0x1813   : > { %7450 = vst [vmem:[#allocation10_spill] sm:$0xff] %v6921_v12  ;;  %vm3213_vm13 = vcmp.eq.f32.partialorder %v6902_v31, %v6921_v12 }
0x1814   : > { %v3214_v26 = vsel %vm3213_vm13, %v6008_v59, 128 }
0x1815   : > { %v3216_v52 = vshra.s32 %v3214_v26, 16  ;;  %v3215_v36 = vand.u32 65535, %v3214_v26 }
0x1817   : > { %v3218_v14 = vcvt.s32.f32 %v3216_v52  ;;  %v3217_v51 = vcvt.s32.f32 %v3215_v36 }
0x1819   : > { %3219 = vmin.xlane.f32.xlu1 %v3218_v14 }
0x182a   : > { %3554 = vperm.xlu1 %5394, %v6931_v17  }
0x182e   : > { %3557 = vperm.xlu1 %5394, %v6934_v44  }
0x1832   : > { %3563 = vperm.xlu1 %5394, %v6937_v48  }
0x1836   : > { %3569 = vperm.xlu1 %5394, %v6940_v15  }
0x1875   : > { %v3552_v38 = vpop.permute.xlu0 %3551 }
0x1876   : > { %v3577_v16 = vrot.slane %v3552_v38, %v6012_v60 }
0x1879   : > { %v3561_v24 = vpop.permute.xlu0 %3560 }
0x187a   : > { %v3589_v43 = vrot.slane %v3561_v24, %v6012_v60  ;;  %v6964_v24 = vld [vmem:[%s7383_s8] sm:$0xff]  }
0x187d   : > { %v3567_v19 = vpop.permute.xlu0 %3566 }
0x187e   : > { %v3597_v0 = vrot.slane %v3567_v19, %v6012_v60 }
0x1881   : > { %v3573_v21 = vpop.permute.xlu0 %3572 }
0x1882   : > { %v3605_v3 = vrot.slane %v3573_v21, %v6012_v60 }
0x18a6   : > { %v3220_v46 = vpop.xlane.xlu1 %3219 }
0x18a7   : > { %vm3221_vm14 = vcmp.eq.f32.partialorder %v3218_v14, %v3220_v46  ;;  %v3226_v55 = vcvt.f32.s32 %v3220_v46  ;;  %v6973_v46 = vld [vmem:[%s7383_s8 + $0x8] sm:$0xff]  }
0x18a8   : > { %v3222_v54 = vsel %vm3221_vm14, %v3217_v51, inf }
0x18a9   : > { %3223 = vmin.xlane.f32.xlu1 %v3222_v54  ;;  %v3227_v38 = vshll.u32 %v3226_v55, 16 }
0x18aa   : > { %v3555_v9 = vpop.permute.xlu1 %3554 }
0x18ab   : > { %v3581_v20 = vrot.slane %v3555_v9, %v6012_v60  ;;  %v6980_v9 = vld [vmem:[%s7383_s8 + $0x10] sm:$0xff]  }
0x18ad   : > { %v3606_v34 = vsel %vm1187_vm5, %v3581_v20, %v3577_v16  ;;  %v6987_v16 = vld [vmem:[%s7383_s8 + $0x18] sm:$0xff]  }
0x18ae   : > { %v3558_v45 = vpop.permute.xlu1 %3557 }
0x18af   : > { %v3585_v62 = vrot.slane %v3558_v45, %v6012_v60 }
0x18b1   : > { %v3607_v30 = vsel %vm1189_vm6, %v3585_v62, %v3606_v34 }
0x18b2   : > { %v3564_v26 = vpop.permute.xlu1 %3563  ;;  %v3608_v35 = vsel %vm1191_vm7, %v3589_v43, %v3607_v30 }
0x18b3   : > { %v3593_v52 = vrot.slane %v3564_v26, %v6012_v60 }
0x18b5   : > { %v3609_v14 = vsel %vm1193_vm8, %v3593_v52, %v3608_v35 }
0x18b6   : > { %v3570_v41 = vpop.permute.xlu1 %3569  ;;  %v3610_v32 = vsel %vm1195_vm9, %v3597_v0, %v3609_v14 }
0x18b7   : > { %v3601_v10 = vrot.slane %v3570_v41, %v6012_v60 }
0x18b9   : > { %v3611_v25 = vsel %vm1197_vm10, %v3601_v10, %v3610_v32  ;;  %v3834_v10 = vpack.c.bf16 %v6812_v11, %v6812_v11 }
0x18ba   : > { %v3612_v50 = vsel %vm1199_vm11, %v3605_v3, %v3611_v25  ;;  %v7011_v3 = vld [vmem:[%s5815_s18] sm:$0xff]  ;;  %v7015_v25 = vld [vmem:[%s5815_s18 + $0x8] sm:$0xff] }
0x18bb   : > { %v3614_v37 = vsel %vm1202_vm12, %v3612_v50, 0.0 }
0x18bc   : > { %3615 = vadd.xlane.f32.xlu0 %v3614_v37 }
0x1936   : > { %v3224_v36 = vpop.xlane.xlu1 %3223 }
0x1937   : > { %v3225_v51 = vcvt.f32.s32 %v3224_v36 }
0x1939   : > { %v3228_v54 = vadd.s32 %v3227_v38, %v3225_v51  ;;  %v7021_v51 = vld [vmem:[%s5815_s18 + $0x18] sm:$0xff] }
0x193a   : > { %7451 = vst [vmem:[#allocation13_spill] sm:$0xff] %v7021_v51 }
0x193b   : > { %vm3229_vm15 = vcmp.eq.s32.totalorder %v6008_v59, %v3228_v54 }
0x193c   : > { %vm4926_vm13 = vmpackc.low %vm3229_vm15, %vm3229_vm15 }
0x193d   : > { %5276 = vmatmul.mubr.msk.bf16.vlgmr.msra.gmra.mrb[24].mxu1 %vm4926_vm13, %v7446_v33 }
0x193e   : > { %5298 = vmatpush3.bf16.msra.mxu1 %v6964_v24  ;;  %5305 = vmatprep.mubr.msk.bf16.mxu1 %vm5643_vm0, %v7433_v1 }
0x193f   : > { %5299 = vmatprep.subr.bf16.mxu1 %v7433_v1 }
0x1942   : > { %5300 = vmatpush3.bf16.msra.mxu1 %v6973_v46 }
0x1943   : > { %5301 = vmatprep.subr.bf16.mxu1 %v7433_v1 }
0x1946   : > { %5302 = vmatpush3.bf16.msra.mxu1 %v6980_v9 }
0x1947   : > { %5303 = vmatprep.subr.bf16.mxu1 %v7433_v1 }
0x1949   : > { %v3616_v20 = vpop.xlane.xlu0 %3615 }
0x194a   : > { %5508 = vrcp.f32 %v3616_v20  ;;  %5304 = vmatpush3.bf16.msra.mxu1 %v6987_v16  ;;  %v7025_v20 = vld [vmem:[%s5815_s18 + $0x10] sm:$0xff] }
0x194b   : > { %5329 = vmatprep.subr.bf16.mxu1 %v7433_v1  ;;  %7452 = vst [vmem:[#allocation14_spill] sm:$0xff] %v7025_v20 }
0x1954   : > { %v5509_v45 = vpop.eup %5508 }
0x1955   : > { %v3622_v19 = vrot.slane %v5509_v45, %v5932_v39  ;;  %v3626_v62 = vrot.slane %v5509_v45, %v6042_v56  ;;  %v3634_v43 = vrot.slane %v5509_v45, %v6048_v58  ;;  %v3630_v26 = vrot.slane %v5509_v45, %v6045_v57 }
0x1956   : > { %v3642_v21 = vrot.slane %v5509_v45, %v6058_v40  ;;  %v3638_v14 = vrot.slane %v5509_v45, %v6054_v2  ;;  %v3650_v0 = vrot.slane %v5509_v45, %v6066_v63  ;;  %v3646_v41 = vrot.slane %v5509_v45, %v6062_v53 }
0x1957   : > { %v3659_v34 = vmul.f32 %v6909_v23, %v3622_v19  ;;  %v3660_v30 = vmul.f32 %v6931_v17, %v3626_v62  ;;  %v3662_v52 = vmul.f32 %v6912_v27, %v3634_v43  ;;  %v3661_v35 = vmul.f32 %v6934_v44, %v3630_v26 }
0x1958   : > { %v3664_v23 = vmul.f32 %v6915_v47, %v3642_v21  ;;  %v3663_v17 = vmul.f32 %v6937_v48, %v3638_v14  ;;  %v3666_v27 = vmul.f32 %v6918_v29, %v3650_v0  ;;  %v3665_v44 = vmul.f32 %v6940_v15, %v3646_v41  ;;  %v7035_v0 = vld [vmem:[%s5815_s18 + $0x20] sm:$0xff] }
0x1959   : > { %3669 = vperm.xlu0 %5393, %v3659_v34   ;;  %3674 = vperm.xlu1 %5394, %v3660_v30   ;;  %7454 = vst [vmem:[#allocation16_spill] sm:$0xff] %v7035_v0 }
0x195d   : > { %3684 = vperm.xlu0 %5393, %v3662_v52   ;;  %3679 = vperm.xlu1 %5394, %v3661_v35  }
0x1961   : > { %3694 = vperm.xlu0 %5393, %v3664_v23   ;;  %3689 = vperm.xlu1 %5394, %v3663_v17   ;;  %v7031_v23 = vld [vmem:[%s5815_s18 + $0x28] sm:$0xff] }
0x1962   : > { %7453 = vst [vmem:[#allocation15_spill] sm:$0xff] %v7031_v23 }
0x1965   : > { %3704 = vperm.xlu0 %5393, %v3666_v27   ;;  %3699 = vperm.xlu1 %5394, %v3665_v44  }
0x1969   : > { %3836 = vrot.lane.b32.xlu0 %v3834_v10, %s5647_s14 }
0x19d8   : > { %v3670_v47 = vpop.permute.xlu0 %3669  ;;  %v3675_v48 = vpop.permute.xlu1 %3674 }
0x19d9   : > { %v3707_v32 = vmul.f32 %v7011_v3, %v3670_v47  ;;  %v3708_v29 = vmul.f32 %v7015_v25, %v3675_v48 }
0x19db   : > { %v3715_v15 = vsel %vm517_vm3, %v3707_v32, 0.0  ;;  %v3722_v50 = vsel %vm517_vm3, %v3708_v29, 0.0 }
0x19dc   : > { %v3716_v37 = vrot.slane %v3715_v15, 4  ;;  %v3723_v55 = vrot.slane %v3722_v50, 4  ;;  %v3685_v36 = vpop.permute.xlu0 %3684  ;;  %v3680_v38 = vpop.permute.xlu1 %3679 }
0x19dd   : > { %v3710_v54 = vmul.f32 %v7021_v51, %v3685_v36  ;;  %v3709_v45 = vmul.f32 %v7025_v20, %v3680_v38 }
0x19de   : > { %v3717_v19 = vadd.f32 %v3716_v37, %v3715_v15  ;;  %v3724_v62 = vadd.f32 %v3723_v55, %v3722_v50 }
0x19df   : > { %v3736_v34 = vsel %vm517_vm3, %v3710_v54, 0.0  ;;  %v3729_v30 = vsel %vm517_vm3, %v3709_v45, 0.0  ;;  %v7041_v45 = vld [vmem:[%s5815_s18 + $0x38] sm:$0xff] }
0x19e0   : > { %v3718_v43 = vrot.slane %v3717_v19, 2  ;;  %v3725_v26 = vrot.slane %v3724_v62, 2  ;;  %v3737_v52 = vrot.slane %v3736_v34, 4  ;;  %v3730_v35 = vrot.slane %v3729_v30, 4  ;;  %v3695_v21 = vpop.permute.xlu0 %3694  ;;  %v3690_v14 = vpop.permute.xlu1 %3689  ;;  %7455 = vst [vmem:[#allocation17_spill] sm:$0xff] %v7041_v45 }
0x19e1   : > { %v3712_v17 = vmul.f32 %v7031_v23, %v3695_v21  ;;  %v3711_v41 = vmul.f32 %v7035_v0, %v3690_v14 }
0x19e2   : > { %v3719_v27 = vadd.f32 %v3718_v43, %v3717_v19  ;;  %v3726_v44 = vadd.f32 %v3725_v26, %v3724_v62  ;;  %v3738_v10 = vadd.f32 %v3737_v52, %v3736_v34  ;;  %v3731_v47 = vadd.f32 %v3730_v35, %v3729_v30  ;;  %v7045_v43 = vld [vmem:[%s5815_s18 + $0x30] sm:$0xff] }
0x19e3   : > { %v3750_v48 = vsel %vm517_vm3, %v3712_v17, 0.0  ;;  %v3743_v32 = vsel %vm517_vm3, %v3711_v41, 0.0 }
0x19e4   : > { %v3720_v29 = vrot.slane %v3719_v27, 1  ;;  %v3727_v15 = vrot.slane %v3726_v44, 1  ;;  %v3739_v50 = vrot.slane %v3738_v10, 2  ;;  %v3732_v37 = vrot.slane %v3731_v47, 2  ;;  %v3705_v55 = vpop.permute.xlu0 %3704  ;;  %v3700_v36 = vpop.permute.xlu1 %3699 }
0x19e5   : > { %v3751_v38 = vrot.slane %v3750_v48, 4  ;;  %v3744_v54 = vrot.slane %v3743_v32, 4  ;;  %v3714_v19 = vmul.f32 %v7041_v45, %v3705_v55  ;;  %v3713_v62 = vmul.f32 %v7045_v43, %v3700_v36 }
0x19e6   : > { %v3721_v34 = vadd.f32 %v3720_v29, %v3719_v27  ;;  %v3740_v30 = vadd.f32 %v3739_v50, %v3738_v10  ;;  %v3733_v26 = vadd.f32 %v3732_v37, %v3731_v47  ;;  %v3728_v17 = vadd.f32 %v3727_v15, %v3726_v44 }
0x19e7   : > { %v3752_v52 = vadd.f32 %v3751_v38, %v3750_v48  ;;  %v3745_v35 = vadd.f32 %v3744_v54, %v3743_v32  ;;  %v3764_v21 = vsel %vm517_vm3, %v3714_v19, 0.0  ;;  %v3757_v14 = vsel %vm517_vm3, %v3713_v62, 0.0 }
0x19e8   : > { %v3741_v41 = vrot.slane %v3740_v30, 1  ;;  %v3734_v31 = vrot.slane %v3733_v26, 1  ;;  %v3765_v12 = vrot.slane %v3764_v21, 4  ;;  %v3758_v55 = vrot.slane %v3757_v14, 4 }
0x19e9   : > { %v3753_v0 = vrot.slane %v3752_v52, 2  ;;  %v3746_v23 = vrot.slane %v3745_v35, 2  ;;  %v3779_v10 = vsel %vm1187_vm5, %v3728_v17, %v3721_v34  ;;  %v7066_v17 = vld [vmem:[%s7380_s5] sm:$0xff]  }
0x19ea   : > { %v3735_v45 = vadd.f32 %v3734_v31, %v3733_v26  ;;  %v3766_v20 = vadd.f32 %v3765_v12, %v3764_v21  ;;  %v3759_v27 = vadd.f32 %v3758_v55, %v3757_v14  ;;  %v3742_v47 = vadd.f32 %v3741_v41, %v3740_v30  ;;  %v7075_v41 = vld [vmem:[%s7380_s5 + $0x8] sm:$0xff]   ;;  %v3837_v55 = vpop.permute.xlu0 %3836 }
0x19eb   : > { %v3754_v51 = vadd.f32 %v3753_v0, %v3752_v52  ;;  %v3747_v36 = vadd.f32 %v3746_v23, %v3745_v35 }
0x19ec   : > { %v3767_v48 = vrot.slane %v3766_v20, 2  ;;  %v3780_v32 = vsel %vm1189_vm6, %v3735_v45, %v3779_v10  ;;  %v3760_v44 = vrot.slane %v3759_v27, 2  ;;  %v5611_v10 = vld [vmem:[%s7378_s3 + $0x10] sm:$0xff]  }
0x19ed   : > { %v3755_v29 = vrot.slane %v3754_v51, 1  ;;  %v3748_v50 = vrot.slane %v3747_v36, 1  ;;  %v3781_v31 = vsel %vm1191_vm7, %v3742_v47, %v3780_v32  ;;  %v5612_v47 = vld [vmem:[%s7378_s3 + $0x18] sm:$0xff]   ;;  %v5614_v32 = vld [vmem:[%s7378_s3 + $0x28] sm:$0xff]  }
0x19ee   : > { %v3768_v15 = vadd.f32 %v3767_v48, %v3766_v20  ;;  %v3761_v38 = vadd.f32 %v3760_v44, %v3759_v27  ;;  %v5610_v27 = vld [vmem:[%s7378_s3 + $0x8] sm:$0xff]   ;;  %v5613_v48 = vld [vmem:[%s7378_s3 + $0x20] sm:$0xff]  }
0x19ef   : > { %v3749_v37 = vadd.f32 %v3748_v50, %v3747_v36  ;;  %v3756_v54 = vadd.f32 %v3755_v29, %v3754_v51  ;;  %v5609_v36 = vld [vmem:[%s7378_s3] sm:$0xff]   ;;  %v7456_v29 = vld [vmem:[#allocation5_spill] sm:$0xff] }
0x19f0   : > { %v3769_v19 = vrot.slane %v3768_v15, 1  ;;  %v3762_v12 = vrot.slane %v3761_v38, 1  ;;  %v7457_v50 = vld [vmem:[#allocation9_spill] sm:$0xff] }
0x19f1   : > { %v3782_v23 = vsel %vm1193_vm8, %v3749_v37, %v3781_v31 }
0x19f2   : > { %v3770_v0 = vadd.f32 %v3769_v19, %v3768_v15  ;;  %v3763_v62 = vadd.f32 %v3762_v12, %v3761_v38  ;;  %v3783_v34 = vsel %vm1195_vm9, %v3756_v54, %v3782_v23  ;;  %v7113_v19 = vld [vmem:[%s7382_s7] ss:$0 sm:$0xff] }
0x19f4   : > { %v3784_v30 = vsel %vm1197_vm10, %v3763_v62, %v3783_v34  ;;  %v7120_v62 = vld [vmem:[%s7381_s6] ss:$0 sm:$0xff] }
0x19f5   : > { %v7057_v45 = vsel %vm1199_vm11, %v3770_v0, %v3784_v30 }
0x19f6   : > { %3786 = vrot.lane.b32.xlu1 %v7057_v45, %s5645_s27 }
0x1a10   : > { %v3267_v20 = vpop.f32.mrb[24].mxu1 }
0x1a11   : > { %v5277_v51 = vpop.f32.mrb[25].mxu1 }
0x1a12   : > { %v3270_v26 = vpop.f32.mrb[26].mxu1 }
0x1a13   : > { %v5278_v52 = vpop.f32.mrb[27].mxu1 }
0x1a68   : > { %v3787_v35 = vpop.permute.xlu1 %3786 }
0x1a69   : > { %v3789_v21 = vsel %vm603_vm1, %v3267_v20, %v3787_v35 }
0x1a6a   : > { %v3790_v14 = vpack.c.bf16 %v3789_v21, %v3789_v21 }
0x1a6c   : > { %5286 = vmatmul.mubr.msk.bf16.vlgmr.msra.gmra.mrb[44].mxu0 %vm630_vm2, %v3790_v14 }
0x1a6d   : > { %5290 = vmatpush3.bf16.msra.mxu0 %v7066_v17  ;;  %5293 = vmatprep.mubr.msk.bf16.mxu0 %vm5643_vm0, %v7433_v1 }
0x1a6e   : > { %5291 = vmatprep.subr.bf16.mxu0 %v7433_v1 }
0x1a71   : > { %5292 = vmatpush3.bf16.msra.mxu0 %v7075_v41 }
0x1a72   : > { %5309 = vmatprep.subr.bf16.mxu0 %v7433_v1 }
0x1a74   : > { %5294 = vmatmul.mubr.msk.bf16.vlgmr.msra.gmra.mrb[48].mxu0 %vm517_vm3, %v3837_v55 }
0x1a75   : > { %5310 = vmatpush3.bf16.msra.mxu0 %v5609_v36  ;;  %5325 = vmatprep.mubr.msk.bf16.mxu0 %vm5643_vm0, %v7433_v1 }
0x1a76   : > { %5311 = vmatprep.subr.bf16.mxu0 %v7433_v1 }
0x1a79   : > { %5312 = vmatpush3.bf16.msra.mxu0 %v5610_v27 }
0x1a7a   : > { %5313 = vmatprep.subr.bf16.mxu0 %v7433_v1 }
0x1a7d   : > { %5314 = vmatpush3.bf16.msra.mxu0 %v5611_v10 }
0x1a7e   : > { %5315 = vmatprep.subr.bf16.mxu0 %v7433_v1 }
0x1a81   : > { %5316 = vmatpush3.bf16.msra.mxu0 %v5612_v47 }
0x1a82   : > { %5317 = vmatprep.subr.bf16.mxu0 %v7433_v1 }
0x1a85   : > { %5318 = vmatpush3.bf16.msra.mxu0 %v5613_v48 }
0x1a86   : > { %5319 = vmatprep.subr.bf16.mxu0 %v7433_v1 }
0x1a89   : > { %5320 = vmatpush3.bf16.msra.mxu0 %v5614_v32 }
0x1a8a   : > { %5321 = vmatprep.subr.bf16.mxu0 %v7433_v1 }
0x1a8d   : > { %5322 = vmatpush3.bf16.msra.mxu0 %v7456_v29 }
0x1a8e   : > { %5323 = vmatprep.subr.bf16.mxu0 %v7433_v1 }
0x1a91   : > { %5324 = vmatpush3.bf16.msra.mxu0 %v7457_v50 }
0x1a92   : > { %5347 = vmatprep.subr.bf16.mxu0 %v7433_v1 }
0x1b3f   : > { %v3828_v44 = vpop.f32.mrb[44].mxu0 }
0x1b40   : > { %v5287_v15 = vpop.f32.mrb[45].mxu0  ;;  %v3829_v34 = vadd.f32 %v7120_v62, %v3828_v44 }
0x1b41   : > { %v3831_v37 = vpop.f32.mrb[46].mxu0 }
0x1b42   : > { %v5288_v38 = vpop.f32.mrb[47].mxu0 }
0x1b47   : > { %v3875_v54 = vpop.f32.mrb[48].mxu0 }
0x1b48   : > { %v3876_v31 = vadd.f32 %v7113_v19, %v3875_v54  ;;  %v5295_v12 = vpop.f32.mrb[49].mxu0 }
0x1b49   : > { %v3878_v23 = vpop.f32.mrb[50].mxu0 }
0x1b4a   : > { %3889 = vrot.lane.b32.xlu1 %v3876_v31, %s5646_s17  ;;  %v5296_v0 = vpop.f32.mrb[51].mxu0  ;;  %v3881_v30 = vadd.f32 %v3876_v31, %v3829_v34 }
0x1b4c   : > { %v4930_v20 = vmul.f32 -1.442695, %v3881_v30 }
0x1b4e   : > { %5510 = vpow2.f32 %v4930_v20 }
0x1b58   : > { %v5511_v51 = vpop.eup %5510 }
0x1b59   : > { %v3885_v26 = vadd.f32 1.0, %v5511_v51 }
0x1b5b   : > { %5512 = vrcp.f32 %v3885_v26 }
0x1b65   : > { %v5513_v52 = vpop.eup %5512 }
0x1b66   : > { %v3899_v27 = vsub.f32 1.0, %v5513_v52  ;;  %v3905_v47 = vmul.f32 %v5513_v52, %v6812_v11 }
0x1bbc   : > { %v3890_v35 = vpop.permute.xlu1 %3889 }
0x1bbd   : > { %v3892_v21 = vmul.f32 %v5513_v52, %v3890_v35 }
0x1bbf   : > { %3894 = vrot.lane.b32.xlu0 %v3892_v21, %s5646_s17 }
0x1c31   : > { %v3895_v14 = vpop.permute.xlu0 %3894 }
0x1c32   : > { %v3897_v55 = vadd.f32 %v3895_v14, %v3829_v34 }
0x1c34   : > { %5514 = vtanh.f32 %v3897_v55 }
0x1c3e   : > { %v5515_v36 = vpop.eup %5514 }
0x1c3f   : > { %3901 = vrot.lane.b32.xlu1 %v5515_v36, %s5647_s14 }
0x1c43   : > { %3911 = vrot.lane.b32.xlu1 %v7057_v45, %s5648_s15 }
0x1cb1   : > { %v3902_v10 = vpop.permute.xlu1 %3901 }
0x1cb2   : > { %v3904_v48 = vmul.f32 %v3902_v10, %v3899_v27 }
0x1cb4   : > { %v7128_v32 = vadd.f32 %v3905_v47, %v3904_v48 }
0x1cb5   : > { %v3912_v27 = vpop.permute.xlu1 %3911 }
0x1cb6   : > { %v4030_v29 = vcombine.high %v7128_v32, %v7128_v32  ;;  %3908 = vrot.lane.b32.xlu0 %v7128_v32, %s5647_s14  ;;  %v4037_v50 = vrot.slane %v7128_v32, %v5916_v28 }
0x1cb8   : > { %v4053_v44 = vrot.slane %v4037_v50, %v5916_v28  ;;  %v4045_v15 = vcombine.high %v4037_v50, %v4037_v50  ;;  %v4044_v45 = vrot.slane %v4030_v29, %v5916_v28 }
0x1cba   : > { %v4082_v37 = vrot.slane %v4053_v44, %v5932_v39  ;;  %v4067_v11 = vrot.slane %v4045_v15, %v5916_v28  ;;  %v4075_v38 = vcombine.high %v4053_v44, %v4053_v44  ;;  %v4060_v54 = vrot.slane %v4044_v45, %v5916_v28 }
0x1cbb   : > { %v4046_v31 = vcombine.high %v4044_v45, %v4044_v45 }
0x1cbc   : > { %v4119_v12 = vmul.f32 %v4082_v37, %v5961_v61  ;;  %v4086_v23 = vrot.slane %v4067_v11, %v5932_v39  ;;  %v4090_v0 = vrot.slane %v4075_v38, %v5932_v39  ;;  %v4077_v34 = vcombine.high %v4067_v11, %v4067_v11 }
0x1cbd   : > { %v4074_v51 = vrot.slane %v4046_v31, %v5916_v28  ;;  %v4098_v52 = vrot.slane %v4060_v54, %v5932_v39  ;;  %v4076_v61 = vcombine.high %v4060_v54, %v4060_v54 }
0x1cbe   : > { %4135 = vrot.lane.b32.xlu0 %v4119_v12, %s5647_s14  ;;  %v4120_v30 = vmul.f32 %v4086_v23, %v7434_v4  ;;  %v4094_v20 = vrot.slane %v4077_v34, %v5932_v39  ;;  %v4121_v26 = vmul.f32 %v4090_v0, %v7435_v5 }
0x1cbf   : > { %v4102_v21 = vrot.slane %v4074_v51, %v5932_v39  ;;  %v4078_v14 = vcombine.high %v4074_v51, %v4074_v51  ;;  %v4123_v4 = vmul.f32 %v4098_v52, %v7437_v7  ;;  %v4106_v28 = vrot.slane %v4076_v61, %v5932_v39 }
0x1cc0   : > { %4137 = vrot.lane.b32.xlu1 %v4120_v30, %s5647_s14  ;;  %v4122_v35 = vmul.f32 %v4094_v20, %v7436_v49 }
0x1cc1   : > { %v4124_v5 = vmul.f32 %v4102_v21, %v7438_v8  ;;  %v4110_v55 = vrot.slane %v4078_v14, %v5932_v39  ;;  %v4125_v36 = vmul.f32 %v4106_v28, %v7439_v42 }
0x1cc2   : > { %4139 = vrot.lane.b32.xlu0 %v4121_v26, %s5647_s14 }
0x1cc3   : > { %v4126_v49 = vmul.f32 %v4110_v55, %v7440_v18 }
0x1cc4   : > { %4141 = vrot.lane.b32.xlu1 %v4122_v35, %s5647_s14 }
0x1cc6   : > { %4143 = vrot.lane.b32.xlu0 %v4123_v4, %s5647_s14 }
0x1cc8   : > { %4145 = vrot.lane.b32.xlu1 %v4124_v5, %s5647_s14 }
0x1cca   : > { %4147 = vrot.lane.b32.xlu0 %v4125_v36, %s5647_s14 }
0x1ccc   : > { %4149 = vrot.lane.b32.xlu1 %v4126_v49, %s5647_s14 }
0x1d28   : > { %v3909_v7 = vpop.permute.xlu0 %3908 }
0x1d29   : > { %v3914_v10 = vsel %vm517_vm3, %v3909_v7, %v3912_v27 }
0x1d2a   : > { %v3915_v47 = vpack.c.bf16 %v3914_v10, %v3914_v10 }
0x1d2c   : > { %5306 = vmatmul.mubr.msk.bf16.vlgmr.msra.gmra.mrb[28].mxu1 %vm800_vm4, %v3915_v47 }
0x1d2d   : > { %5330 = vmatpush3.bf16.msra.mxu1 %v6854_v22  ;;  %5335 = vmatprep.mubr.msk.bf16.mxu1 %vm5643_vm0, %v7433_v1 }
0x1d2e   : > { %5331 = vmatprep.subr.bf16.mxu1 %v7433_v1 }
0x1d30   : > { %v4136_v8 = vpop.permute.xlu0 %4135 }
0x1d31   : > { %v4159_v42 = vsel %vm517_vm3, %v4136_v8, 0.0  ;;  %5332 = vmatpush3.bf16.msra.mxu1 %v6864_v6 }
0x1d32   : > { %4160 = vadd.xlane.f32.xlu0 %v4159_v42  ;;  %v4138_v18 = vpop.permute.xlu1 %4137  ;;  %5333 = vmatprep.subr.bf16.mxu1 %v7433_v1  ;;  %v7205_v42 = vld [vmem:[%s7384_s9] ss:$0 sm:$0xff] }
0x1d33   : > { %v4162_v48 = vsel %vm517_vm3, %v4138_v18, 0.0 }
0x1d34   : > { %v4140_v29 = vpop.permute.xlu0 %4139  ;;  %4163 = vadd.xlane.f32.xlu1 %v4162_v48 }
0x1d35   : > { %v4165_v22 = vsel %vm517_vm3, %v4140_v29, 0.0  ;;  %5334 = vmatpush3.bf16.msra.mxu1 %v6873_v13 }
0x1d36   : > { %4166 = vadd.xlane.f32.xlu0 %v4165_v22  ;;  %v4142_v50 = vpop.permute.xlu1 %4141  ;;  %5339 = vmatprep.subr.bf16.mxu1 %v7433_v1 }
0x1d37   : > { %v4168_v15 = vsel %vm517_vm3, %v4142_v50, 0.0 }
0x1d38   : > { %v4144_v44 = vpop.permute.xlu0 %4143 }
0x1d39   : > { %v4171_v6 = vsel %vm517_vm3, %v4144_v44, 0.0 }
0x1d3a   : > { %4172 = vadd.xlane.f32.xlu1 %v4171_v6  ;;  %4169 = vadd.xlane.f32.xlu0 %v4168_v15  ;;  %v4146_v45 = vpop.permute.xlu1 %4145 }
0x1d3b   : > { %v4174_v11 = vsel %vm517_vm3, %v4146_v45, 0.0 }
0x1d3c   : > { %v4148_v37 = vpop.permute.xlu0 %4147 }
0x1d3d   : > { %v4177_v38 = vsel %vm517_vm3, %v4148_v37, 0.0 }
0x1d3e   : > { %4178 = vadd.xlane.f32.xlu1 %v4177_v38  ;;  %4175 = vadd.xlane.f32.xlu0 %v4174_v11  ;;  %v4150_v13 = vpop.permute.xlu1 %4149 }
0x1d3f   : > { %v4180_v54 = vsel %vm517_vm3, %v4150_v13, 0.0 }
0x1d42   : > { %4181 = vadd.xlane.f32.xlu0 %v4180_v54 }
0x1dbf   : > { %v4161_v31 = vpop.xlane.xlu0 %4160 }
0x1dc0   : > { %v4194_v34 = vrot.slane %v4161_v31, %v6012_v60 }
0x1dc1   : > { %v4164_v12 = vpop.xlane.xlu1 %4163 }
0x1dc2   : > { %v4198_v23 = vrot.slane %v4164_v12, %v6012_v60 }
0x1dc3   : > { %v7184_v0 = vpop.xlane.xlu0 %4166 }
0x1dc4   : > { %v4202_v30 = vrot.slane %v7184_v0, %v6012_v60  ;;  %v4223_v20 = vsel %vm1187_vm5, %v4198_v23, %v4194_v34 }
0x1dc6   : > { %v4224_v61 = vsel %vm1189_vm6, %v4202_v30, %v4223_v20 }
0x1dc7   : > { %v4170_v51 = vpop.xlane.xlu0 %4169  ;;  %v4173_v26 = vpop.xlane.xlu1 %4172 }
0x1dc8   : > { %v4206_v52 = vrot.slane %v4170_v51, %v6012_v60  ;;  %v4210_v35 = vrot.slane %v4173_v26, %v6012_v60 }
0x1dca   : > { %v4225_v21 = vsel %vm1191_vm7, %v4206_v52, %v4224_v61 }
0x1dcb   : > { %v4176_v14 = vpop.xlane.xlu0 %4175  ;;  %v4179_v4 = vpop.xlane.xlu1 %4178  ;;  %v4226_v5 = vsel %vm1193_vm8, %v4210_v35, %v4225_v21 }
0x1dcc   : > { %v4214_v28 = vrot.slane %v4176_v14, %v6012_v60  ;;  %v4218_v55 = vrot.slane %v4179_v4, %v6012_v60 }
0x1dce   : > { %v4227_v36 = vsel %vm1195_vm9, %v4214_v28, %v4226_v5 }
0x1dcf   : > { %v4182_v49 = vpop.xlane.xlu0 %4181  ;;  %v4228_v7 = vsel %vm1197_vm10, %v4218_v55, %v4227_v36 }
0x1dd0   : > { %v4222_v27 = vrot.slane %v4182_v49, %v6012_v60 }
0x1dd2   : > { %v4229_v10 = vsel %vm1199_vm11, %v4222_v27, %v4228_v7 }
0x1dd3   : > { %v4231_v47 = vsel %vm1202_vm12, %v4229_v10, -inf }
0x1dd4   : > { %4232 = vmax.xlane.f32.xlu0 %v4231_v47 }
0x1dff   : > { %v3953_v8 = vpop.f32.mrb[28].mxu1 }
0x1e00   : > { %v7208_v18 = vadd.f32 %v7205_v42, %v3953_v8  ;;  %v5307_v48 = vpop.f32.mrb[29].mxu1 }
0x1e01   : > { %v3956_v29 = vpop.f32.mrb[30].mxu1 }
0x1e02   : > { %3959 = vmax.xlane.f32.xlu1 %v7208_v18  ;;  %v5308_v22 = vpop.f32.mrb[31].mxu1 }
0x1e61   : > { %v4233_v50 = vpop.xlane.xlu0 %4232 }
0x1e62   : > { %v4238_v44 = vrot.slane %v4233_v50, %v5932_v39  ;;  %v4250_v15 = vrot.slane %v4233_v50, %v6048_v58  ;;  %v4258_v6 = vrot.slane %v4233_v50, %v6058_v40  ;;  %v4266_v38 = vrot.slane %v4233_v50, %v6066_v63 }
0x1e63   : > { %v4242_v35 = vrot.slane %v4233_v50, %v6042_v56  ;;  %v4246_v28 = vrot.slane %v4233_v50, %v6045_v57  ;;  %v4254_v36 = vrot.slane %v4233_v50, %v6054_v2  ;;  %v4262_v7 = vrot.slane %v4233_v50, %v6062_v53 }
0x1e64   : > { %v4275_v45 = vsub.f32 %v4161_v31, %v4238_v44  ;;  %v4278_v37 = vsub.f32 %v4170_v51, %v4250_v15  ;;  %v4280_v13 = vsub.f32 %v4176_v14, %v4258_v6  ;;  %v4282_v23 = vsub.f32 %v4182_v49, %v4266_v38 }
0x1e65   : > { %v4276_v5 = vsub.f32 %v4164_v12, %v4242_v35  ;;  %v4277_v49 = vsub.f32 %v7184_v0, %v4246_v28  ;;  %v4279_v10 = vsub.f32 %v4173_v26, %v4254_v36  ;;  %v4281_v8 = vsub.f32 %v4179_v4, %v4262_v7 }
0x1e66   : > { %v4283_v11 = vmul.f32 1.442695, %v4275_v45  ;;  %v4289_v54 = vmul.f32 1.442695, %v4278_v37  ;;  %v4293_v34 = vmul.f32 1.442695, %v4280_v13 }
0x1e67   : > { %v4297_v30 = vmul.f32 1.442695, %v4282_v23  ;;  %v4285_v27 = vmul.f32 1.442695, %v4276_v5  ;;  %v4287_v47 = vmul.f32 1.442695, %v4277_v49 }
0x1e68   : > { %5516 = vpow2.f32 %v4283_v11  ;;  %v4291_v48 = vmul.f32 1.442695, %v4279_v10  ;;  %v4295_v29 = vmul.f32 1.442695, %v4281_v8 }
0x1e69   : > { %5518 = vpow2.f32 %v4289_v54 }
0x1e6a   : > { %5520 = vpow2.f32 %v4293_v34 }
0x1e6b   : > { %5522 = vpow2.f32 %v4297_v30 }
0x1e6c   : > { %5524 = vpow2.f32 %v4285_v27 }
0x1e6d   : > { %5526 = vpow2.f32 %v4287_v47 }
0x1e6e   : > { %5528 = vpow2.f32 %v4291_v48 }
0x1e6f   : > { %5530 = vpow2.f32 %v4295_v29 }
0x1e72   : > { %v7215_v20 = vpop.eup %5516 }
0x1e73   : > { %4308 = vperm.xlu0 %5393, %v7215_v20   ;;  %v7218_v52 = vpop.eup %5518 }
0x1e74   : > { %v7221_v31 = vpop.eup %5520 }
0x1e75   : > { %v7224_v51 = vpop.eup %5522 }
0x1e76   : > { %v5525_v22 = vpop.eup %5524 }
0x1e77   : > { %4317 = vperm.xlu0 %5393, %v7218_v52   ;;  %v7237_v12 = vpop.eup %5526 }
0x1e78   : > { %v7240_v44 = vpop.eup %5528 }
0x1e79   : > { %v7243_v0 = vpop.eup %5530 }
0x1e7b   : > { %4323 = vperm.xlu0 %5393, %v7221_v31  }
0x1e7f   : > { %4329 = vperm.xlu0 %5393, %v7224_v51  }
0x1e8f   : > { %v7227_v61 = vpop.xlane.xlu1 %3959 }
0x1e90   : > { %vm3970_vm14 = vcmp.eq.f32.partialorder %v7208_v18, %v7227_v61 }
0x1e91   : > { %v3971_v21 = vsel %vm3970_vm14, %v6008_v59, 128 }
0x1e92   : > { %v3973_v14 = vshra.s32 %v3971_v21, 16  ;;  %v3972_v26 = vand.u32 65535, %v3971_v21 }
0x1e94   : > { %v3975_v55 = vcvt.s32.f32 %v3973_v14  ;;  %v3974_v15 = vcvt.s32.f32 %v3972_v26 }
0x1e96   : > { %3976 = vmin.xlane.f32.xlu1 %v3975_v55 }
0x1ea7   : > { %4311 = vperm.xlu1 %5394, %v5525_v22  }
0x1eab   : > { %4314 = vperm.xlu1 %5394, %v7237_v12  }
0x1eaf   : > { %4320 = vperm.xlu1 %5394, %v7240_v44  }
0x1eb3   : > { %4326 = vperm.xlu1 %5394, %v7243_v0  }
0x1ef2   : > { %v4309_v4 = vpop.permute.xlu0 %4308 }
0x1ef3   : > { %v4334_v38 = vrot.slane %v4309_v4, %v6012_v60 }
0x1ef6   : > { %v4318_v45 = vpop.permute.xlu0 %4317 }
0x1ef7   : > { %v4346_v35 = vrot.slane %v4318_v45, %v6012_v60 }
0x1efa   : > { %v4324_v54 = vpop.permute.xlu0 %4323 }
0x1efb   : > { %v4354_v36 = vrot.slane %v4324_v54, %v6012_v60  ;;  %v7458_v54 = vld [vmem:[#allocation13_spill] sm:$0xff] }
0x1efe   : > { %v4330_v5 = vpop.permute.xlu0 %4329 }
0x1eff   : > { %v4362_v7 = vrot.slane %v4330_v5, %v6012_v60 }
0x1f23   : > { %v3977_v50 = vpop.xlane.xlu1 %3976 }
0x1f24   : > { %vm3978_vm15 = vcmp.eq.f32.partialorder %v3975_v55, %v3977_v50  ;;  %v3983_v29 = vcvt.f32.s32 %v3977_v50 }
0x1f25   : > { %v3979_v6 = vsel %vm3978_vm15, %v3974_v15, inf }
0x1f26   : > { %3980 = vmin.xlane.f32.xlu1 %v3979_v6  ;;  %v3984_v4 = vshll.u32 %v3983_v29, 16 }
0x1f27   : > { %v4312_v37 = vpop.permute.xlu1 %4311 }
0x1f28   : > { %v4338_v11 = vrot.slane %v4312_v37, %v6012_v60 }
0x1f2a   : > { %v4363_v34 = vsel %vm1187_vm5, %v4338_v11, %v4334_v38 }
0x1f2b   : > { %v4315_v13 = vpop.permute.xlu1 %4314 }
0x1f2c   : > { %v4342_v23 = vrot.slane %v4315_v13, %v6012_v60 }
0x1f2e   : > { %v4364_v30 = vsel %vm1189_vm6, %v4342_v23, %v4363_v34  ;;  %v7459_v34 = vld [vmem:[#allocation14_spill] sm:$0xff] }
0x1f2f   : > { %v4321_v21 = vpop.permute.xlu1 %4320  ;;  %v4365_v28 = vsel %vm1191_vm7, %v4346_v35, %v4364_v30 }
0x1f30   : > { %v4350_v14 = vrot.slane %v4321_v21, %v6012_v60 }
0x1f32   : > { %v4366_v55 = vsel %vm1193_vm8, %v4350_v14, %v4365_v28 }
0x1f33   : > { %v4327_v49 = vpop.permute.xlu1 %4326  ;;  %v4367_v10 = vsel %vm1195_vm9, %v4354_v36, %v4366_v55 }
0x1f34   : > { %v4358_v27 = vrot.slane %v4327_v49, %v6012_v60 }
0x1f36   : > { %v4368_v47 = vsel %vm1197_vm10, %v4358_v27, %v4367_v10  ;;  %v7460_v27 = vld [vmem:[#allocation15_spill] sm:$0xff]  ;;  %v7461_v10 = vld [vmem:[#allocation16_spill] sm:$0xff] }
0x1f37   : > { %v4369_v8 = vsel %vm1199_vm11, %v4362_v7, %v4368_v47 }
0x1f38   : > { %v4371_v48 = vsel %vm1202_vm12, %v4369_v8, 0.0 }
0x1f39   : > { %4372 = vadd.xlane.f32.xlu0 %v4371_v48 }
0x1fb3   : > { %v3981_v26 = vpop.xlane.xlu1 %3980 }
0x1fb4   : > { %v3982_v15 = vcvt.f32.s32 %v3981_v26 }
0x1fb6   : > { %v3985_v6 = vadd.s32 %v3984_v4, %v3982_v15 }
0x1fb8   : > { %vm3986_vm13 = vcmp.eq.s32.totalorder %v6008_v59, %v3985_v6 }
0x1fb9   : > { %vm4934_vm14 = vmpackc.low %vm3986_vm13, %vm3986_vm13 }
0x1fba   : > { %5326 = vmatmul.mubr.msk.bf16.vlgmr.msra.gmra.mrb[52].mxu0 %vm4934_vm14, %v7446_v33 }
0x1fbb   : > { %5348 = vmatpush3.bf16.msra.mxu0 %v6964_v24  ;;  %5355 = vmatprep.mubr.msk.bf16.mxu0 %vm5643_vm0, %v7433_v1 }
0x1fbc   : > { %5349 = vmatprep.subr.bf16.mxu0 %v7433_v1 }
0x1fbf   : > { %5350 = vmatpush3.bf16.msra.mxu0 %v6973_v46 }
0x1fc0   : > { %5351 = vmatprep.subr.bf16.mxu0 %v7433_v1 }
0x1fc3   : > { %5352 = vmatpush3.bf16.msra.mxu0 %v6980_v9 }
0x1fc4   : > { %5353 = vmatprep.subr.bf16.mxu0 %v7433_v1 }
0x1fc6   : > { %v4373_v60 = vpop.xlane.xlu0 %4372 }
0x1fc7   : > { %5532 = vrcp.f32 %v4373_v60  ;;  %5354 = vmatpush3.bf16.msra.mxu0 %v6987_v16 }
0x1fd1   : > { %v5533_v59 = vpop.eup %5532 }
0x1fd2   : > { %v4379_v33 = vrot.slane %v5533_v59, %v5932_v39  ;;  %v4383_v24 = vrot.slane %v5533_v59, %v6042_v56  ;;  %v4391_v46 = vrot.slane %v5533_v59, %v6048_v58  ;;  %v4387_v37 = vrot.slane %v5533_v59, %v6045_v57 }
0x1fd3   : > { %v4399_v16 = vrot.slane %v5533_v59, %v6058_v40  ;;  %v4395_v38 = vrot.slane %v5533_v59, %v6054_v2  ;;  %v4407_v58 = vrot.slane %v5533_v59, %v6066_v63  ;;  %v4403_v57 = vrot.slane %v5533_v59, %v6062_v53 }
0x1fd4   : > { %v4416_v50 = vmul.f32 %v7215_v20, %v4379_v33  ;;  %v4417_v45 = vmul.f32 %v5525_v22, %v4383_v24  ;;  %v4419_v9 = vmul.f32 %v7218_v52, %v4391_v46  ;;  %v4418_v11 = vmul.f32 %v7237_v12, %v4387_v37  ;;  %v7462_v37 = vld [vmem:[#allocation17_spill] sm:$0xff] }
0x1fd5   : > { %v4421_v39 = vmul.f32 %v7221_v31, %v4399_v16  ;;  %v4420_v56 = vmul.f32 %v7240_v44, %v4395_v38  ;;  %v4423_v20 = vmul.f32 %v7224_v51, %v4407_v58  ;;  %v4422_v52 = vmul.f32 %v7243_v0, %v4403_v57 }
0x1fd6   : > { %4426 = vperm.xlu0 %5393, %v4416_v50   ;;  %4431 = vperm.xlu1 %5394, %v4417_v45   ;;  %v4591_v2 = vpack.c.bf16 %v7128_v32, %v7128_v32 }
0x1fda   : > { %4441 = vperm.xlu0 %5393, %v4419_v9   ;;  %4436 = vperm.xlu1 %5394, %v4418_v11  }
0x1fde   : > { %4451 = vperm.xlu0 %5393, %v4421_v39   ;;  %4446 = vperm.xlu1 %5394, %v4420_v56  }
0x1fe2   : > { %4461 = vperm.xlu0 %5393, %v4423_v20   ;;  %4456 = vperm.xlu1 %5394, %v4422_v52  }
0x1fe6   : > { %4593 = vrot.lane.b32.xlu0 %v4591_v2, %s5647_s14 }
0x2055   : > { %v4427_v40 = vpop.permute.xlu0 %4426  ;;  %v4432_v31 = vpop.permute.xlu1 %4431 }
0x2056   : > { %v4464_v22 = vmul.f32 %v7011_v3, %v4427_v40  ;;  %v4465_v63 = vmul.f32 %v7015_v25, %v4432_v31 }
0x2058   : > { %v4472_v53 = vsel %vm517_vm3, %v4464_v22, 0.0  ;;  %v4479_v12 = vsel %vm517_vm3, %v4465_v63, 0.0 }
0x2059   : > { %v4473_v51 = vrot.slane %v4472_v53, 4  ;;  %v4480_v44 = vrot.slane %v4479_v12, 4  ;;  %v4442_v0 = vpop.permute.xlu0 %4441  ;;  %v4437_v13 = vpop.permute.xlu1 %4436 }
0x205a   : > { %v4467_v23 = vmul.f32 %v7458_v54, %v4442_v0  ;;  %v4466_v30 = vmul.f32 %v7459_v34, %v4437_v13 }
0x205b   : > { %v4474_v35 = vadd.f32 %v4473_v51, %v4472_v53  ;;  %v4481_v21 = vadd.f32 %v4480_v44, %v4479_v12 }
0x205c   : > { %v4493_v14 = vsel %vm517_vm3, %v4467_v23, 0.0  ;;  %v4486_v3 = vsel %vm517_vm3, %v4466_v30, 0.0 }
0x205d   : > { %v4475_v28 = vrot.slane %v4474_v35, 2  ;;  %v4482_v25 = vrot.slane %v4481_v21, 2  ;;  %v4494_v5 = vrot.slane %v4493_v14, 4  ;;  %v4487_v55 = vrot.slane %v4486_v3, 4  ;;  %v4452_v36 = vpop.permute.xlu0 %4451  ;;  %v4447_v49 = vpop.permute.xlu1 %4446 }
0x205e   : > { %v4469_v7 = vmul.f32 %v7460_v27, %v4452_v36  ;;  %v4468_v47 = vmul.f32 %v7461_v10, %v4447_v49 }
0x205f   : > { %v4476_v8 = vadd.f32 %v4475_v28, %v4474_v35  ;;  %v4483_v48 = vadd.f32 %v4482_v25, %v4481_v21  ;;  %v4495_v29 = vadd.f32 %v4494_v5, %v4493_v14  ;;  %v4488_v26 = vadd.f32 %v4487_v55, %v4486_v3 }
0x2060   : > { %v4507_v4 = vsel %vm517_vm3, %v4469_v7, 0.0  ;;  %v4500_v15 = vsel %vm517_vm3, %v4468_v47, 0.0 }
0x2061   : > { %v4477_v6 = vrot.slane %v4476_v8, 1  ;;  %v4484_v60 = vrot.slane %v4483_v48, 1  ;;  %v4496_v59 = vrot.slane %v4495_v29, 2  ;;  %v4489_v33 = vrot.slane %v4488_v26, 2  ;;  %v4462_v24 = vpop.permute.xlu0 %4461  ;;  %v4457_v50 = vpop.permute.xlu1 %4456 }
0x2062   : > { %v4508_v45 = vrot.slane %v4507_v4, 4  ;;  %v4501_v46 = vrot.slane %v4500_v15, 4  ;;  %v4471_v9 = vmul.f32 %v7462_v37, %v4462_v24  ;;  %v4470_v11 = vmul.f32 %v7045_v43, %v4457_v50 }
0x2063   : > { %v4478_v16 = vadd.f32 %v4477_v6, %v4476_v8  ;;  %v4497_v38 = vadd.f32 %v4496_v59, %v4495_v29  ;;  %v4490_v39 = vadd.f32 %v4489_v33, %v4488_v26  ;;  %v4485_v52 = vadd.f32 %v4484_v60, %v4483_v48 }
0x2064   : > { %v4509_v56 = vadd.f32 %v4508_v45, %v4507_v4  ;;  %v4502_v58 = vadd.f32 %v4501_v46, %v4500_v15  ;;  %v4521_v57 = vsel %vm517_vm3, %v4471_v9, 0.0  ;;  %v4514_v20 = vsel %vm517_vm3, %v4470_v11, 0.0 }
0x2065   : > { %v4498_v2 = vrot.slane %v4497_v38, 1  ;;  %v4491_v40 = vrot.slane %v4490_v39, 1  ;;  %v4522_v31 = vrot.slane %v4521_v57, 4  ;;  %v4515_v53 = vrot.slane %v4514_v20, 4  ;;  %v4594_v59 = vpop.permute.xlu0 %4593 }
0x2066   : > { %v4510_v22 = vrot.slane %v4509_v56, 2  ;;  %v4503_v63 = vrot.slane %v4502_v58, 2  ;;  %v4536_v13 = vsel %vm1187_vm5, %v4485_v52, %v4478_v16 }
0x2067   : > { %v4492_v12 = vadd.f32 %v4491_v40, %v4490_v39  ;;  %v4523_v51 = vadd.f32 %v4522_v31, %v4521_v57  ;;  %v4516_v0 = vadd.f32 %v4515_v53, %v4514_v20  ;;  %v4499_v54 = vadd.f32 %v4498_v2, %v4497_v38  ;;  %v7464_v2 = vld [vmem:[#allocation11_spill] sm:$0xff] }
0x2068   : > { %v4511_v44 = vadd.f32 %v4510_v22, %v4509_v56  ;;  %v4504_v43 = vadd.f32 %v4503_v63, %v4502_v58  ;;  %v7465_v22 = vld [vmem:[#allocation10_spill] sm:$0xff] }
0x2069   : > { %v4524_v23 = vrot.slane %v4523_v51, 2  ;;  %v4537_v34 = vsel %vm1189_vm6, %v4492_v12, %v4536_v13  ;;  %v4517_v21 = vrot.slane %v4516_v0, 2  ;;  %v7466_v63 = vld [vmem:[#allocation6_spill] sm:$0xff] }
0x206a   : > { %v4512_v30 = vrot.slane %v4511_v44, 1  ;;  %v4505_v35 = vrot.slane %v4504_v43, 1  ;;  %v4538_v55 = vsel %vm1191_vm7, %v4499_v54, %v4537_v34  ;;  %v3204_v53 = vsub.f32 %v7466_v63, %v7465_v22 }
0x206b   : > { %v4525_v14 = vadd.f32 %v4524_v23, %v4523_v51  ;;  %v4518_v28 = vadd.f32 %v4517_v21, %v4516_v0 }
0x206c   : > { %v4506_v3 = vadd.f32 %v4505_v35, %v4504_v43  ;;  %v4513_v25 = vadd.f32 %v4512_v30, %v4511_v44  ;;  %v3205_v12 = vmul.f32 1.442695, %v3204_v53 }
0x206d   : > { %v4526_v5 = vrot.slane %v4525_v14, 1  ;;  %v4519_v36 = vrot.slane %v4518_v28, 1 }
0x206e   : > { %v4539_v49 = vsel %vm1193_vm8, %v4506_v3, %v4538_v55  ;;  %v7467_v55 = vld [vmem:[#allocation7_spill] sm:$0xff] }
0x206f   : > { %v4527_v27 = vadd.f32 %v4526_v5, %v4525_v14  ;;  %v4520_v7 = vadd.f32 %v4519_v36, %v4518_v28  ;;  %v4540_v10 = vsel %vm1195_vm9, %v4513_v25, %v4539_v49  ;;  %v7468_v36 = vld [vmem:[#allocation3_spill] sm:$0xff] }
0x2070   : > { %v1690_v49 = vsub.f32 %v7468_v36, %v7467_v55 }
0x2071   : > { %v4541_v47 = vsel %vm1197_vm10, %v4520_v7, %v4540_v10  ;;  %v7469_v7 = vld [vmem:[#allocation8_spill] sm:$0xff] }
0x2072   : > { %v4542_v8 = vsel %vm1199_vm11, %v4527_v27, %v4541_v47  ;;  %v1691_v27 = vmul.f32 1.442695, %v1690_v49  ;;  %v7470_v10 = vld [vmem:[#allocation4_spill] sm:$0xff] }
0x2073   : > { %4543 = vrot.lane.b32.xlu1 %v4542_v8, %s5645_s27  ;;  %s427_s27 = sand.u32 1, %s5632_s21   ;;  %v2447_v47 = vsub.f32 %v7470_v10, %v7469_v7 }
0x208d   : > { %v4024_v48 = vpop.f32.mrb[52].mxu0 }
0x208e   : > { %v5327_v29 = vpop.f32.mrb[53].mxu0 }
0x208f   : > { %v4027_v26 = vpop.f32.mrb[54].mxu0 }
0x2090   : > { %v5328_v4 = vpop.f32.mrb[55].mxu0 }
0x20e5   : > { %v4544_v15 = vpop.permute.xlu1 %4543 }
0x20e6   : > { %v4546_v6 = vsel %vm603_vm1, %v4024_v48, %v4544_v15  ;;  %v3961_v48 = vsub.f32 %v7208_v18, %v7227_v61 }
0x20e7   : > { %v4547_v60 = vpack.c.bf16 %v4546_v6, %v4546_v6 }
0x20e8   : > { %v3962_v29 = vmul.f32 1.442695, %v3961_v48 }
0x20e9   : > { %5336 = vmatmul.mubr.msk.bf16.vlgmr.msra.gmra.mrb[32].mxu1 %vm630_vm2, %v4547_v60 }
0x20ea   : > { %5340 = vmatpush3.bf16.msra.mxu1 %v7066_v17  ;;  %5343 = vmatprep.mubr.msk.bf16.mxu1 %vm5643_vm0, %v7433_v1 }
0x20eb   : > { %5341 = vmatprep.subr.bf16.mxu1 %v7433_v1 }
0x20ee   : > { %5342 = vmatpush3.bf16.msra.mxu1 %v7075_v41 }
0x20f1   : > { %5344 = vmatmul.mubr.msk.bf16.vlgmr.msra.gmra.mrb[36].mxu1 %vm517_vm3, %v4594_v59 }
0x21bc   : > { %v4585_v33 = vpop.f32.mrb[32].mxu1 }
0x21bd   : > { %v5337_v24 = vpop.f32.mrb[33].mxu1  ;;  %v4586_v16 = vadd.f32 %v7120_v62, %v4585_v33  ;;  %v7463_v62 = vld [vmem:[#allocation12_spill] sm:$0xff] }
0x21be   : > { %v4588_v50 = vpop.f32.mrb[34].mxu1  ;;  %v846_v40 = vsub.f32 %v7464_v2, %v7463_v62 }
0x21bf   : > { %v5338_v45 = vpop.f32.mrb[35].mxu1 }
0x21c0   : > { %v847_v31 = vmul.f32 1.442695, %v846_v40 }
0x21c4   : > { %v4632_v46 = vpop.f32.mrb[36].mxu1 }
0x21c5   : > { %v4633_v37 = vadd.f32 %v7113_v19, %v4632_v46  ;;  %v5345_v9 = vpop.f32.mrb[37].mxu1 }
0x21c6   : > { %v4635_v11 = vpop.f32.mrb[38].mxu1 }
0x21c7   : > { %4646 = vrot.lane.b32.xlu1 %v4633_v37, %s5646_s17  ;;  %v5346_v17 = vpop.f32.mrb[39].mxu1  ;;  %v4638_v1 = vadd.f32 %v4633_v37, %v4586_v16 }
0x21c9   : > { %v4938_v38 = vmul.f32 -1.442695, %v4638_v1 }
0x21cb   : > { %5534 = vpow2.f32 %v4938_v38 }
0x21d5   : > { %v5535_v41 = vpop.eup %5534 }
0x21d6   : > { %v4642_v39 = vadd.f32 1.0, %v5535_v41 }
0x21d8   : > { %5536 = vrcp.f32 %v4642_v39 }
0x21e2   : > { %v5537_v56 = vpop.eup %5536 }
0x21e3   : > { %v4656_v43 = vsub.f32 1.0, %v5537_v56  ;;  %v4662_v13 = vmul.f32 %v5537_v56, %v7128_v32 }
0x2239   : > { %v4647_v58 = vpop.permute.xlu1 %4646 }
0x223a   : > { %v4649_v57 = vmul.f32 %v5537_v56, %v4647_v58 }
0x223c   : > { %4651 = vrot.lane.b32.xlu0 %v4649_v57, %s5646_s17  ;;  %s5359_s17 = smul.u32 48, %s427_s27 }
0x22ae   : > { %v4652_v20 = vpop.permute.xlu0 %4651 }
0x22af   : > { %v4654_v19 = vadd.f32 %v4652_v20, %v4586_v16 }
0x22b1   : > { %5538 = vtanh.f32 %v4654_v19 }
0x22b2   : > { %5540 = vpow2.f32 %v847_v31 }
0x22b3   : > { %5542 = vpow2.f32 %v3205_v12 }
0x22bb   : > { %v5539_v52 = vpop.eup %5538 }
0x22bc   : > { %4658 = vrot.lane.b32.xlu1 %v5539_v52, %s5647_s14  ;;  %v5541_v51 = vpop.eup %5540 }
0x22bd   : > { %v5543_v44 = vpop.eup %5542 }
0x22c0   : > { %4668 = vrot.lane.b32.xlu1 %v4542_v8, %s5648_s15  ;;  %s7336_s15 = scalar_lea.vmem [#allocation2], %s5359_s17  ;;  %v2448_v8 = vmul.f32 1.442695, %v2447_v47 }
0x22e4   : > { %849 = vadd.xlane.f32.xlu1 %v5541_v51 }
0x22e8   : > { %3207 = vadd.xlane.f32.xlu1 %v5543_v44 }
0x232e   : > { %v4659_v0 = vpop.permute.xlu1 %4658 }
0x232f   : > { %v4661_v54 = vmul.f32 %v4659_v0, %v4656_v43 }
0x2331   : > { %v4663_v23 = vadd.f32 %v4662_v13, %v4661_v54 }
0x2332   : > { %v4669_v34 = vpop.permute.xlu1 %4668 }
0x2333   : > { %4665 = vrot.lane.b32.xlu0 %v4663_v23, %s5647_s14 }
0x2371   : > { %v850_v30 = vpop.xlane.xlu1 %849 }
0x2372   : > { %5544 = vrcp.f32 %v850_v30 }
0x2375   : > { %v3208_v35 = vpop.xlane.xlu1 %3207 }
0x2376   : > { %5546 = vrcp.f32 %v3208_v35 }
0x2377   : > { %5548 = vpow2.f32 %v1691_v27 }
0x2378   : > { %5550 = vpow2.f32 %v2448_v8 }
0x2379   : > { %5552 = vpow2.f32 %v3962_v29 }
0x237c   : > { %v5545_v21 = vpop.eup %5544 }
0x237d   : > { %v852_v14 = vmul.f32 %v5545_v21, %v5541_v51 }
0x237f   : > { %853 = vst [vmem:[%s7336_s15] sm:$0xff] %v852_v14 }
0x2380   : > { %v5547_v3 = vpop.eup %5546 }
0x2381   : > { %v3210_v32 = vmul.f32 %v5547_v3, %v5543_v44  ;;  %v5549_v59 = vpop.eup %5548 }
0x2382   : > { %v5551_v33 = vpop.eup %5550 }
0x2383   : > { %4924 = vst [vmem:[%s7336_s15 + $0x18] sm:$0xff] %v3210_v32  ;;  %v5553_v24 = vpop.eup %5552 }
0x2386   : > { %v4773_v58 = vld [vmem:[%s7336_s15] sm:$0xff] (%p5741_p4) }
0x2387   : > { %4774 = vst [vmem:[%s4735_s24] sm:$0xff] (%p5741_p4), %v4773_v58 }
0x238a   : > { %v4779_v19 = vld [vmem:[%s7336_s15 + $0x18] sm:$0xff] (%p5741_p4) }
0x238b   : > { %4780 = vst [vmem:[%s4735_s24 + $0x30] sm:$0xff] (%p5741_p4), %v4779_v19 }
0x23a5   : > { %v4666_v28 = vpop.permute.xlu0 %4665 }
0x23a6   : > { %v4671_v25 = vsel %vm517_vm3, %v4666_v28, %v4669_v34 }
0x23a7   : > { %v4672_v5 = vpack.c.bf16 %v4671_v25, %v4671_v25 }
0x23a9   : > { %5356 = vmatmul.mubr.msk.bf16.vlgmr.msra.gmra.mrb[56].mxu0 %vm800_vm4, %v4672_v5 }
0x247c   : > { %v4710_v26 = vpop.f32.mrb[56].mxu0 }
0x247d   : > { %v4711_v4 = vadd.f32 %v7205_v42, %v4710_v26  ;;  %v5357_v15 = vpop.f32.mrb[57].mxu0 }
0x247e   : > { %v4713_v6 = vpop.f32.mrb[58].mxu0 }
0x247f   : > { %4716 = vmax.xlane.f32.xlu0 %v4711_v4  ;;  %v5358_v60 = vpop.f32.mrb[59].mxu0 }
0x2483   : > { %1693 = vadd.xlane.f32.xlu0 %v5549_v59 }
0x2487   : > { %2450 = vadd.xlane.f32.xlu0 %v5551_v33 }
0x248b   : > { %3964 = vadd.xlane.f32.xlu0 %v5553_v24 }
0x250c   : > { %v4717_v50 = vpop.xlane.xlu0 %4716 }
0x250d   : > { %v4718_v45 = vsub.f32 %v4711_v4, %v4717_v50 }
0x250f   : > { %v4719_v18 = vmul.f32 1.442695, %v4718_v45 }
0x2510   : > { %v1694_v61 = vpop.xlane.xlu0 %1693 }
0x2511   : > { %5554 = vpow2.f32 %v4719_v18 }
0x2512   : > { %5556 = vrcp.f32 %v1694_v61 }
0x2514   : > { %v2451_v42 = vpop.xlane.xlu0 %2450 }
0x2515   : > { %5558 = vrcp.f32 %v2451_v42 }
0x2518   : > { %v3965_v46 = vpop.xlane.xlu0 %3964 }
0x2519   : > { %5560 = vrcp.f32 %v3965_v46 }
0x251b   : > { %v5555_v37 = vpop.eup %5554 }
0x251c   : > { %v5557_v9 = vpop.eup %5556  ;;  %4721 = vadd.xlane.f32.xlu1 %v5555_v37 }
0x251d   : > { %v1696_v11 = vmul.f32 %v5557_v9, %v5549_v59 }
0x251f   : > { %v5559_v17 = vpop.eup %5558  ;;  %4908 = vst [vmem:[%s7336_s15 + $0x8] sm:$0xff] %v1696_v11 }
0x2520   : > { %v2453_v16 = vmul.f32 %v5559_v17, %v5551_v33 }
0x2522   : > { %4916 = vst [vmem:[%s7336_s15 + $0x10] sm:$0xff] %v2453_v16 }
0x2523   : > { %v5561_v1 = vpop.eup %5560 }
0x2524   : > { %v3967_v38 = vmul.f32 %v5561_v1, %v5553_v24 }
0x2526   : > { %4932 = vst [vmem:[%s7336_s15 + $0x20] sm:$0xff] %v3967_v38  ;;  %v4775_v57 = vld [vmem:[%s7336_s15 + $0x8] sm:$0xff] (%p5741_p4) }
0x2527   : > { %4776 = vst [vmem:[%s4735_s24 + $0x10] sm:$0xff] (%p5741_p4), %v4775_v57 }
0x2529   : > { %v4777_v20 = vld [vmem:[%s7336_s15 + $0x10] sm:$0xff] (%p5741_p4) }
0x252a   : > { %4778 = vst [vmem:[%s4735_s24 + $0x20] sm:$0xff] (%p5741_p4), %v4777_v20 }
0x252d   : > { %v4781_v52 = vld [vmem:[%s7336_s15 + $0x20] sm:$0xff] (%p5741_p4) }
0x252e   : > { %4782 = vst [vmem:[%s4735_s24 + $0x40] sm:$0xff] (%p5741_p4), %v4781_v52 }
0x25a9   : > { %v4722_v41 = vpop.xlane.xlu1 %4721 }
0x25aa   : > { %5562 = vrcp.f32 %v4722_v41 }
0x25b1   : > { %4733 = sbr.rel (!%p5741_p4) target bundleno = 9664 (0x25c0), region = 72 }
0x25b4   : > { %v5563_v39 = vpop.eup %5562 }
0x25b5   : > { %v4724_v56 = vmul.f32 %v5563_v39, %v5555_v37 }
0x25b7   : > { %4940 = vst [vmem:[%s7336_s15 + $0x28] sm:$0xff] %v4724_v56 }
0x25be   : > { %v4783_v62 = vld [vmem:[%s7336_s15 + $0x28] sm:$0xff] }
0x25bf   : > { %4784 = vst [vmem:[%s4735_s24 + $0x50] sm:$0xff] %v4783_v62 }
0x25c0 PF: > { %p19_p9 = scmp.ge.s32.totalorder %s5731_s25, 4   ;;  %s7471_s21 = smov %s5636_s22 }
0x25c1   : > { %s7472_s22 = smov %s5739_s28  ;;  %s7473_s23 = smov %s5731_s25 }
0x25c2   :  { %21 = sbr.rel (!%p19_p9) target bundleno = 2 (0x2), region = 147 }

</bundles_post_ra>
